<compile_context>
chip_gen: v7x
topology: tpu7x:2x2x1
jax: 0.10.0
libtpu: 0.0.40
codegen_flags: <defaults>
</compile_context>

<pallas_src>
import math

import numpy as np
import jax
import jax.numpy as jnp
from jax import lax
from jax.experimental import pallas as pl
from jax.experimental.pallas import tpu as pltpu


# ---------------------------------------------------------------------------
# Fused LeNet kernel: processes one batch tile (B images) per grid step.
#
# Layout conventions inside the kernel:
#   conv1 accumulator: rows = (b, oh) [oh in 0..23], cols = ow*6  + oc  (144 lanes)
#   conv2 accumulator: rows = (b, oh) [oh in 0..7],  cols = ow*16 + oc  (128 lanes)
# The banded weight matrices r1/r2 and the fc1 weight blocks w1p are built at init
# so that plain jnp.dot against contiguous row-slices implements conv / pool / flatten.
# ---------------------------------------------------------------------------
def _lenet_kernel(x_ref, r1_ref, bias1_ref, selh_ref, r2_ref, bias2_ref,
                  w1p_ref, bfc1_ref, w2t_ref, bfc2_ref, w3t_ref, bfc3_ref,
                  o_ref):
    B = x_ref.shape[0]
    x = x_ref[...]                                             # (B, 28, 28) bf16

    # ---- conv1 (1->6, 5x5, valid) as 5 banded MXU matmuls, + bias + ReLU ----
    acc1 = jnp.zeros((B * 24, 144), jnp.float32)
    for di in range(5):
        lhs = x[:, di:di + 24, :].reshape(B * 24, 28)          # rows = (b, oh)
        acc1 = acc1 + jnp.dot(lhs, r1_ref[di],
                              preferred_element_type=jnp.float32)
    z1 = jnp.maximum(acc1 + bias1_ref[...], 0.0).reshape(B, 24, 144)

    # ---- fused 2x2 max-pool #1 (in VMEM/vregs, never touches HBM) ----
    m1 = jnp.maximum(z1[:, :, :138], z1[:, :, 6:])             # pair cols (ow, ow+1)
    m1 = jnp.maximum(m1[:, :23, :], m1[:, 1:, :])              # pair rows (oh, oh+1)
    m1 = m1.astype(jnp.bfloat16)
    # keep rows oh = 2i via a tiny one-hot selector (batched MXU matmul; exact in bf16)
    selh = jnp.broadcast_to(selh_ref[...][None], (B, 12, 23))
    x1 = jnp.einsum('bih,bhw->biw', selh, m1,
                    preferred_element_type=jnp.float32)        # (B, 12, 138)
    x1 = x1.astype(jnp.bfloat16)

    # ---- conv2 (6->16, 5x5, valid) as 5 banded MXU matmuls, + bias + ReLU ----
    acc2 = jnp.zeros((B * 8, 128), jnp.float32)
    for di in range(5):
        lhs = x1[:, di:di + 8, :].reshape(B * 8, 138)
        acc2 = acc2 + jnp.dot(lhs, r2_ref[di],
                              preferred_element_type=jnp.float32)
    z2 = jnp.maximum(acc2 + bias2_ref[...], 0.0).reshape(B, 8, 128)

    # ---- fused 2x2 max-pool #2 ----
    m2 = jnp.maximum(z2[:, :, :112], z2[:, :, 16:])            # pair cols (ow, ow+1)
    m2 = jnp.maximum(m2[:, :7, :], m2[:, 1:, :])               # pair rows -> (B,7,112)
    m2 = m2.astype(jnp.bfloat16)

    # ---- fc1 (flatten folded into reorganized weights; lanes padded to 128) + ReLU ----
    h = jnp.zeros((B, 128), jnp.float32)
    for i in range(4):                                         # pooled row i  (oh = 2i)
        h = h + jnp.dot(m2[:, 2 * i, :], w1p_ref[i],
                        preferred_element_type=jnp.float32)
    h = jnp.maximum(h + bfc1_ref[...], 0.0).astype(jnp.bfloat16)

    # ---- fc2 + ReLU (128-lane padded) ----
    h = jnp.dot(h, w2t_ref[...], preferred_element_type=jnp.float32)
    h = jnp.maximum(h + bfc2_ref[...], 0.0).astype(jnp.bfloat16)

    # ---- fc3 (128-lane padded output; cols 10..127 are zero) ----
    out = jnp.dot(h, w3t_ref[...], preferred_element_type=jnp.float32)
    o_ref[...] = (out + bfc3_ref[...]).astype(o_ref.dtype)


# ---------------------------------------------------------------------------
# Wrapper: batch tiling + one pallas_call
# ---------------------------------------------------------------------------
def lenet_forward(params, x):
    n, c, h, w = x.shape
    assert (c, h, w) == (1, 28, 28), "MNIST branch expects (N, 1, 28, 28)"
    if n <= 8:
        b_tile = 8
    elif n <= 32:
        b_tile = 32
    else:
        b_tile = 64
    n_pad = -(-n // b_tile) * b_tile

    x2 = x[:, 0, :, :].astype(jnp.bfloat16)
    x2 = jnp.pad(x2, ((0, n_pad - n), (0, 0), (0, 0)))

    def wspec(shape):
        nd = len(shape)
        return pl.BlockSpec(shape, lambda i, _nd=nd: (0,) * _nd)

    out = pl.pallas_call(
        _lenet_kernel,
        out_shape=jax.ShapeDtypeStruct((n_pad, 128), jnp.float32),
        grid=(n_pad // b_tile,),
        in_specs=[
            pl.BlockSpec((b_tile, 28, 28), lambda i: (i, 0, 0)),
            wspec(params["r1"].shape), wspec(params["bias1"].shape),
            wspec(params["selh"].shape),
            wspec(params["r2"].shape), wspec(params["bias2"].shape),
            wspec(params["w1p"].shape), wspec(params["bfc1"].shape),
            wspec(params["w2t"].shape), wspec(params["bfc2"].shape),
            wspec(params["w3t"].shape), wspec(params["bfc3"].shape),
        ],
        out_specs=pl.BlockSpec((b_tile, 128), lambda i: (i, 0)),
        compiler_params=pltpu.CompilerParams(
            dimension_semantics=("parallel",)),
    )(x2, params["r1"], params["bias1"], params["selh"], params["r2"],
      params["bias2"], params["w1p"], params["bfc1"], params["w2t"],
      params["bfc2"], params["w3t"], params["bfc3"])
    return out[:n, :10]


# ---------------------------------------------------------------------------
# Parameters: PyTorch-default-style init, then one-time reorganization for the kernel
# ---------------------------------------------------------------------------
def init_raw_params(key):
    ks = jax.random.split(key, 10)

    def unif(k, shape, fan_in):
        bound = 1.0 / math.sqrt(fan_in)
        return jax.random.uniform(k, shape, jnp.float32, -bound, bound)

    return {
        "conv1_w": unif(ks[0], (6, 1, 5, 5), 1 * 5 * 5),
        "conv1_b": unif(ks[1], (6,), 1 * 5 * 5),
        "conv2_w": unif(ks[2], (16, 6, 5, 5), 6 * 5 * 5),
        "conv2_b": unif(ks[3], (16,), 6 * 5 * 5),
        "fc1_w": unif(ks[4], (120, 16 * 4 * 4), 16 * 4 * 4),
        "fc1_b": unif(ks[5], (120,), 16 * 4 * 4),
        "fc2_w": unif(ks[6], (84, 120), 120),
        "fc2_b": unif(ks[7], (84,), 120),
        "fc3_w": unif(ks[8], (10, 84), 84),
        "fc3_b": unif(ks[9], (10,), 84),
    }


def preprocess_params(raw):
    """One-time host-side weight reorganization (banded conv matrices, fused
    pool/flatten for fc1, pre-transposed + 128-lane-padded fc weights,
    pre-broadcast biases)."""
    w1 = np.asarray(raw["conv1_w"], np.float32)     # (6,1,5,5)
    b1 = np.asarray(raw["conv1_b"], np.float32)
    w2 = np.asarray(raw["conv2_w"], np.float32)     # (16,6,5,5)
    b2 = np.asarray(raw["conv2_b"], np.float32)
    fw1 = np.asarray(raw["fc1_w"], np.float32)      # (120,256)
    fb1 = np.asarray(raw["fc1_b"], np.float32)
    fw2 = np.asarray(raw["fc2_w"], np.float32)      # (84,120)
    fb2 = np.asarray(raw["fc2_b"], np.float32)
    fw3 = np.asarray(raw["fc3_w"], np.float32)      # (10,84)
    fb3 = np.asarray(raw["fc3_b"], np.float32)

    # conv1: acc1[(b,oh), ow*6+oc] = sum_w x[b,oh+di,w] * r1[di][w, ow*6+oc]
    r1 = np.zeros((5, 28, 24 * 6), np.float32)
    for di in range(5):
        for ow in range(24):
            for dj in range(5):
                r1[di, ow + dj, ow * 6:(ow + 1) * 6] = w1[:, 0, di, dj]
    bias1 = np.tile(b1, 24)[None, :]

    # even-row selector used after pool #1 (keeps rows oh = 2i); one-hot -> exact in bf16
    selh = np.zeros((12, 23), np.float32)
    selh[np.arange(12), 2 * np.arange(12)] = 1.0

    # conv2: acc2[(b,oh), ow*16+oc] = sum_k x1[b,oh+di,k] * r2[di][k, ow*16+oc]
    # x1 columns are k = w*6 + c (w = pre-downsample pool position; odd w unused -> 0)
    r2 = np.zeros((5, 138, 128), np.float32)
    for di in range(5):
        for ow in range(8):
            for dj in range(5):
                wpos = 2 * (ow + dj)
                r2[di, wpos * 6:(wpos + 1) * 6,
                   ow * 16:(ow + 1) * 16] = w2[:, :, di, dj].T
    bias2 = np.tile(b2, 8)[None, :]

    # fc1: pool #2 + NCHW-flatten folded into 4 weight blocks (one per pooled row i);
    # rows of odd pool positions are zero; output lanes padded 120 -> 128.
    w1p = np.zeros((4, 112, 128), np.float32)
    for i in range(4):
        for j in range(4):
            wpos = 2 * j
            for oc in range(16):
                w1p[i, wpos * 16 + oc, :120] = fw1[:, oc * 16 + i * 4 + j]

    # fc2 / fc3: transposed and zero-padded to 128x128 (zero rows/cols are inert).
    w2t = np.zeros((128, 128), np.float32)
    w2t[:120, :84] = fw2.T
    w3t = np.zeros((128, 128), np.float32)
    w3t[:84, :10] = fw3.T

    bfc1 = np.zeros((1, 128), np.float32); bfc1[0, :120] = fb1
    bfc2 = np.zeros((1, 128), np.float32); bfc2[0, :84] = fb2
    bfc3 = np.zeros((1, 128), np.float32); bfc3[0, :10] = fb3

    bf = jnp.bfloat16
    return {
        "r1": jnp.asarray(r1, bf), "bias1": jnp.asarray(bias1, jnp.float32),
        "selh": jnp.asarray(selh, bf),
        "r2": jnp.asarray(r2, bf), "bias2": jnp.asarray(bias2, jnp.float32),
        "w1p": jnp.asarray(w1p, bf), "bfc1": jnp.asarray(bfc1, jnp.float32),
        "w2t": jnp.asarray(w2t, bf), "bfc2": jnp.asarray(bfc2, jnp.float32),
        "w3t": jnp.asarray(w3t, bf), "bfc3": jnp.asarray(bfc3, jnp.float32),
    }


# ---------------------------------------------------------------------------
# Pure-JAX reference (f32) of the PyTorch forward, for validation only.
# ---------------------------------------------------------------------------
def reference_forward(raw, x):
    dn = ("NCHW", "OIHW", "NCHW")
    y = lax.conv_general_dilated(x, raw["conv1_w"], (1, 1), "VALID",
                                 dimension_numbers=dn)
    y = jnp.maximum(y + raw["conv1_b"][None, :, None, None], 0.0)
    y = lax.reduce_window(y, -jnp.inf, lax.max, (1, 1, 2, 2), (1, 1, 2, 2), "VALID")
    y = lax.conv_general_dilated(y, raw["conv2_w"], (1, 1), "VALID",
                                 dimension_numbers=dn)
    y = jnp.maximum(y + raw["conv2_b"][None, :, None, None], 0.0)
    y = lax.reduce_window(y, -jnp.inf, lax.max, (1, 1, 2, 2), (1, 1, 2, 2), "VALID")
    f = y.reshape(y.shape[0], -1)
    h = jnp.maximum(f @ raw["fc1_w"].T + raw["fc1_b"], 0.0)
    h = jnp.maximum(h @ raw["fc2_w"].T + raw["fc2_b"], 0.0)
    return h @ raw["fc3_w"].T + raw["fc3_b"]


if __name__ == "__main__":
    key = jax.random.PRNGKey(0)
    x = jax.random.normal(key, (2, 1, 28, 28), jnp.float32)   # MNIST-shaped, batch=2
    raw = init_raw_params(jax.random.PRNGKey(1))
    params = preprocess_params(raw)

    fwd = jax.jit(lenet_forward)
    out = fwd(params, x)
    jax.block_until_ready(out)

    assert out.shape == (2, 10), out.shape
    assert bool(jnp.all(jnp.isfinite(out)))

    ref = reference_forward(raw, x)
    max_err = float(jnp.max(jnp.abs(out - ref)))
    assert max_err < 5e-2, f"kernel/reference mismatch: {max_err}"

    print("KERNEL_OK")
</pallas_src>

<mosaic_0001>
module attributes {stable_mosaic.version = 11 : i64} {
  func.func @_lenet_kernel(%arg0: i32, %arg1: memref<8x28x28xbf16, #tpu.memory_space<vmem>>, %arg2: memref<5x28x144xbf16, #tpu.memory_space<vmem>>, %arg3: memref<1x144xf32, #tpu.memory_space<vmem>>, %arg4: memref<12x23xbf16, #tpu.memory_space<vmem>>, %arg5: memref<5x138x128xbf16, #tpu.memory_space<vmem>>, %arg6: memref<1x128xf32, #tpu.memory_space<vmem>>, %arg7: memref<4x112x128xbf16, #tpu.memory_space<vmem>>, %arg8: memref<1x128xf32, #tpu.memory_space<vmem>>, %arg9: memref<128x128xbf16, #tpu.memory_space<vmem>>, %arg10: memref<1x128xf32, #tpu.memory_space<vmem>>, %arg11: memref<128x128xbf16, #tpu.memory_space<vmem>>, %arg12: memref<1x128xf32, #tpu.memory_space<vmem>>, %arg13: memref<8x128xf32, #tpu.memory_space<vmem>>) attributes {dimension_semantics = [#tpu.dimension_semantics<parallel>], iteration_bounds = array<i64: 1>, scalar_prefetch = 0 : i64, scratch_operands = 0 : i64, tpu.core_type = #tpu.core_type<tc>, window_params = [{transform_indices = @transform_0, window_bounds = array<i64: 8, 28, 28>}, {pipeline_mode = #tpu.pipeline_mode<synchronous>, transform_indices = @transform_1, window_bounds = array<i64: 5, 28, 144>}, {pipeline_mode = #tpu.pipeline_mode<synchronous>, transform_indices = @transform_2, window_bounds = array<i64: 1, 144>}, {pipeline_mode = #tpu.pipeline_mode<synchronous>, transform_indices = @transform_3, window_bounds = array<i64: 12, 23>}, {pipeline_mode = #tpu.pipeline_mode<synchronous>, transform_indices = @transform_4, window_bounds = array<i64: 5, 138, 128>}, {pipeline_mode = #tpu.pipeline_mode<synchronous>, transform_indices = @transform_5, window_bounds = array<i64: 1, 128>}, {pipeline_mode = #tpu.pipeline_mode<synchronous>, transform_indices = @transform_6, window_bounds = array<i64: 4, 112, 128>}, {pipeline_mode = #tpu.pipeline_mode<synchronous>, transform_indices = @transform_7, window_bounds = array<i64: 1, 128>}, {pipeline_mode = #tpu.pipeline_mode<synchronous>, transform_indices = @transform_8, window_bounds = array<i64: 128, 128>}, {pipeline_mode = #tpu.pipeline_mode<synchronous>, transform_indices = @transform_9, window_bounds = array<i64: 1, 128>}, {pipeline_mode = #tpu.pipeline_mode<synchronous>, transform_indices = @transform_10, window_bounds = array<i64: 128, 128>}, {pipeline_mode = #tpu.pipeline_mode<synchronous>, transform_indices = @transform_11, window_bounds = array<i64: 1, 128>}, {transform_indices = @transform_12, window_bounds = array<i64: 8, 128>}]} {
    %c0 = arith.constant 0 : index
    %c0_0 = arith.constant 0 : index
    %c0_1 = arith.constant 0 : index
    %0 = vector.load %arg1[%c0, %c0_0, %c0_1] : memref<8x28x28xbf16, #tpu.memory_space<vmem>>, vector<8x28x28xbf16>
    %cst = arith.constant 0.000000e+00 : f32
    %1 = vector.broadcast %cst : f32 to vector<192x144xf32>
    %2 = vector.extract_strided_slice %0 {offsets = [0, 0, 0], sizes = [8, 24, 28], strides = [1, 1, 1]} : vector<8x28x28xbf16> to vector<8x24x28xbf16>
    %3 = vector.shape_cast %2 : vector<8x24x28xbf16> to vector<192x28xbf16>
    %c0_2 = arith.constant 0 : index
    %c0_3 = arith.constant 0 : index
    %c0_4 = arith.constant 0 : index
    %4 = vector.load %arg2[%c0_2, %c0_3, %c0_4] : memref<5x28x144xbf16, #tpu.memory_space<vmem>>, vector<1x28x144xbf16>
    %5 = vector.shape_cast %4 : vector<1x28x144xbf16> to vector<28x144xbf16>
    %cst_5 = arith.constant dense<0.000000e+00> : vector<192x144xf32>
    %6 = tpu.matmul %3, %5, %cst_5 {dimension_numbers = #tpu.dot_dimension_numbers<[1], [0], [0], [1], [0, 0, 1, 1], [], []>} : vector<192x28xbf16>, vector<28x144xbf16>, vector<192x144xf32> -> vector<192x144xf32>
    %7 = arith.addf %1, %6 : vector<192x144xf32>
    %8 = vector.extract_strided_slice %0 {offsets = [0, 1, 0], sizes = [8, 24, 28], strides = [1, 1, 1]} : vector<8x28x28xbf16> to vector<8x24x28xbf16>
    %9 = vector.shape_cast %8 : vector<8x24x28xbf16> to vector<192x28xbf16>
    %c1 = arith.constant 1 : index
    %c0_6 = arith.constant 0 : index
    %c0_7 = arith.constant 0 : index
    %10 = vector.load %arg2[%c1, %c0_6, %c0_7] : memref<5x28x144xbf16, #tpu.memory_space<vmem>>, vector<1x28x144xbf16>
    %11 = vector.shape_cast %10 : vector<1x28x144xbf16> to vector<28x144xbf16>
    %cst_8 = arith.constant dense<0.000000e+00> : vector<192x144xf32>
    %12 = tpu.matmul %9, %11, %cst_8 {dimension_numbers = #tpu.dot_dimension_numbers<[1], [0], [0], [1], [0, 0, 1, 1], [], []>} : vector<192x28xbf16>, vector<28x144xbf16>, vector<192x144xf32> -> vector<192x144xf32>
    %13 = arith.addf %7, %12 : vector<192x144xf32>
    %14 = vector.extract_strided_slice %0 {offsets = [0, 2, 0], sizes = [8, 24, 28], strides = [1, 1, 1]} : vector<8x28x28xbf16> to vector<8x24x28xbf16>
    %15 = vector.shape_cast %14 : vector<8x24x28xbf16> to vector<192x28xbf16>
    %c2 = arith.constant 2 : index
    %c0_9 = arith.constant 0 : index
    %c0_10 = arith.constant 0 : index
    %16 = vector.load %arg2[%c2, %c0_9, %c0_10] : memref<5x28x144xbf16, #tpu.memory_space<vmem>>, vector<1x28x144xbf16>
    %17 = vector.shape_cast %16 : vector<1x28x144xbf16> to vector<28x144xbf16>
    %cst_11 = arith.constant dense<0.000000e+00> : vector<192x144xf32>
    %18 = tpu.matmul %15, %17, %cst_11 {dimension_numbers = #tpu.dot_dimension_numbers<[1], [0], [0], [1], [0, 0, 1, 1], [], []>} : vector<192x28xbf16>, vector<28x144xbf16>, vector<192x144xf32> -> vector<192x144xf32>
    %19 = arith.addf %13, %18 : vector<192x144xf32>
    %20 = vector.extract_strided_slice %0 {offsets = [0, 3, 0], sizes = [8, 24, 28], strides = [1, 1, 1]} : vector<8x28x28xbf16> to vector<8x24x28xbf16>
    %21 = vector.shape_cast %20 : vector<8x24x28xbf16> to vector<192x28xbf16>
    %c3 = arith.constant 3 : index
    %c0_12 = arith.constant 0 : index
    %c0_13 = arith.constant 0 : index
    %22 = vector.load %arg2[%c3, %c0_12, %c0_13] : memref<5x28x144xbf16, #tpu.memory_space<vmem>>, vector<1x28x144xbf16>
    %23 = vector.shape_cast %22 : vector<1x28x144xbf16> to vector<28x144xbf16>
    %cst_14 = arith.constant dense<0.000000e+00> : vector<192x144xf32>
    %24 = tpu.matmul %21, %23, %cst_14 {dimension_numbers = #tpu.dot_dimension_numbers<[1], [0], [0], [1], [0, 0, 1, 1], [], []>} : vector<192x28xbf16>, vector<28x144xbf16>, vector<192x144xf32> -> vector<192x144xf32>
    %25 = arith.addf %19, %24 : vector<192x144xf32>
    %26 = vector.extract_strided_slice %0 {offsets = [0, 4, 0], sizes = [8, 24, 28], strides = [1, 1, 1]} : vector<8x28x28xbf16> to vector<8x24x28xbf16>
    %27 = vector.shape_cast %26 : vector<8x24x28xbf16> to vector<192x28xbf16>
    %c4 = arith.constant 4 : index
    %c0_15 = arith.constant 0 : index
    %c0_16 = arith.constant 0 : index
    %28 = vector.load %arg2[%c4, %c0_15, %c0_16] : memref<5x28x144xbf16, #tpu.memory_space<vmem>>, vector<1x28x144xbf16>
    %29 = vector.shape_cast %28 : vector<1x28x144xbf16> to vector<28x144xbf16>
    %cst_17 = arith.constant dense<0.000000e+00> : vector<192x144xf32>
    %30 = tpu.matmul %27, %29, %cst_17 {dimension_numbers = #tpu.dot_dimension_numbers<[1], [0], [0], [1], [0, 0, 1, 1], [], []>} : vector<192x28xbf16>, vector<28x144xbf16>, vector<192x144xf32> -> vector<192x144xf32>
    %31 = arith.addf %25, %30 : vector<192x144xf32>
    %c0_18 = arith.constant 0 : index
    %c0_19 = arith.constant 0 : index
    %32 = vector.load %arg3[%c0_18, %c0_19] : memref<1x144xf32, #tpu.memory_space<vmem>>, vector<1x144xf32>
    %33 = vector.broadcast %32 : vector<1x144xf32> to vector<192x144xf32>
    %34 = arith.addf %31, %33 : vector<192x144xf32>
    %cst_20 = arith.constant 0.000000e+00 : f32
    %35 = vector.broadcast %cst_20 : f32 to vector<192x144xf32>
    %36 = arith.maximumf %34, %35 : vector<192x144xf32>
    %37 = vector.shape_cast %36 : vector<192x144xf32> to vector<8x24x144xf32>
    %38 = vector.extract_strided_slice %37 {offsets = [0, 0, 0], sizes = [8, 24, 138], strides = [1, 1, 1]} : vector<8x24x144xf32> to vector<8x24x138xf32>
    %39 = vector.extract_strided_slice %37 {offsets = [0, 0, 6], sizes = [8, 24, 138], strides = [1, 1, 1]} : vector<8x24x144xf32> to vector<8x24x138xf32>
    %40 = arith.maximumf %38, %39 : vector<8x24x138xf32>
    %41 = vector.extract_strided_slice %40 {offsets = [0, 0, 0], sizes = [8, 23, 138], strides = [1, 1, 1]} : vector<8x24x138xf32> to vector<8x23x138xf32>
    %42 = vector.extract_strided_slice %40 {offsets = [0, 1, 0], sizes = [8, 23, 138], strides = [1, 1, 1]} : vector<8x24x138xf32> to vector<8x23x138xf32>
    %43 = arith.maximumf %41, %42 : vector<8x23x138xf32>
    %44 = arith.truncf %43 : vector<8x23x138xf32> to vector<8x23x138xbf16>
    %c0_21 = arith.constant 0 : index
    %c0_22 = arith.constant 0 : index
    %45 = vector.load %arg4[%c0_21, %c0_22] : memref<12x23xbf16, #tpu.memory_space<vmem>>, vector<12x23xbf16>
    %46 = vector.shape_cast %45 : vector<12x23xbf16> to vector<1x12x23xbf16>
    %47 = vector.shape_cast %46 : vector<1x12x23xbf16> to vector<1x12x23xbf16>
    %48 = vector.broadcast %47 : vector<1x12x23xbf16> to vector<8x12x23xbf16>
    "tpu.trace_start"() <{level = 10 : i32, message = "bih,bhw->biw"}> : () -> ()
    %cst_23 = arith.constant dense<0.000000e+00> : vector<8x12x138xf32>
    %49 = tpu.matmul %48, %44, %cst_23 {dimension_numbers = #tpu.dot_dimension_numbers<[2], [1], [1], [2], [0, 0, 0, 1, 1, 2], [0], [0]>} : vector<8x12x23xbf16>, vector<8x23x138xbf16>, vector<8x12x138xf32> -> vector<8x12x138xf32>
    "tpu.trace_stop"() : () -> ()
    %50 = arith.truncf %49 : vector<8x12x138xf32> to vector<8x12x138xbf16>
    %cst_24 = arith.constant 0.000000e+00 : f32
    %51 = vector.broadcast %cst_24 : f32 to vector<64x128xf32>
    %52 = vector.extract_strided_slice %50 {offsets = [0, 0, 0], sizes = [8, 8, 138], strides = [1, 1, 1]} : vector<8x12x138xbf16> to vector<8x8x138xbf16>
    %53 = vector.shape_cast %52 : vector<8x8x138xbf16> to vector<64x138xbf16>
    %c0_25 = arith.constant 0 : index
    %c0_26 = arith.constant 0 : index
    %c0_27 = arith.constant 0 : index
    %54 = vector.load %arg5[%c0_25, %c0_26, %c0_27] : memref<5x138x128xbf16, #tpu.memory_space<vmem>>, vector<1x138x128xbf16>
    %55 = vector.shape_cast %54 : vector<1x138x128xbf16> to vector<138x128xbf16>
    %cst_28 = arith.constant dense<0.000000e+00> : vector<64x128xf32>
    %56 = tpu.matmul %53, %55, %cst_28 {dimension_numbers = #tpu.dot_dimension_numbers<[1], [0], [0], [1], [0, 0, 1, 1], [], []>} : vector<64x138xbf16>, vector<138x128xbf16>, vector<64x128xf32> -> vector<64x128xf32>
    %57 = arith.addf %51, %56 : vector<64x128xf32>
    %58 = vector.extract_strided_slice %50 {offsets = [0, 1, 0], sizes = [8, 8, 138], strides = [1, 1, 1]} : vector<8x12x138xbf16> to vector<8x8x138xbf16>
    %59 = vector.shape_cast %58 : vector<8x8x138xbf16> to vector<64x138xbf16>
    %c1_29 = arith.constant 1 : index
    %c0_30 = arith.constant 0 : index
    %c0_31 = arith.constant 0 : index
    %60 = vector.load %arg5[%c1_29, %c0_30, %c0_31] : memref<5x138x128xbf16, #tpu.memory_space<vmem>>, vector<1x138x128xbf16>
    %61 = vector.shape_cast %60 : vector<1x138x128xbf16> to vector<138x128xbf16>
    %cst_32 = arith.constant dense<0.000000e+00> : vector<64x128xf32>
    %62 = tpu.matmul %59, %61, %cst_32 {dimension_numbers = #tpu.dot_dimension_numbers<[1], [0], [0], [1], [0, 0, 1, 1], [], []>} : vector<64x138xbf16>, vector<138x128xbf16>, vector<64x128xf32> -> vector<64x128xf32>
    %63 = arith.addf %57, %62 : vector<64x128xf32>
    %64 = vector.extract_strided_slice %50 {offsets = [0, 2, 0], sizes = [8, 8, 138], strides = [1, 1, 1]} : vector<8x12x138xbf16> to vector<8x8x138xbf16>
    %65 = vector.shape_cast %64 : vector<8x8x138xbf16> to vector<64x138xbf16>
    %c2_33 = arith.constant 2 : index
    %c0_34 = arith.constant 0 : index
    %c0_35 = arith.constant 0 : index
    %66 = vector.load %arg5[%c2_33, %c0_34, %c0_35] : memref<5x138x128xbf16, #tpu.memory_space<vmem>>, vector<1x138x128xbf16>
    %67 = vector.shape_cast %66 : vector<1x138x128xbf16> to vector<138x128xbf16>
    %cst_36 = arith.constant dense<0.000000e+00> : vector<64x128xf32>
    %68 = tpu.matmul %65, %67, %cst_36 {dimension_numbers = #tpu.dot_dimension_numbers<[1], [0], [0], [1], [0, 0, 1, 1], [], []>} : vector<64x138xbf16>, vector<138x128xbf16>, vector<64x128xf32> -> vector<64x128xf32>
    %69 = arith.addf %63, %68 : vector<64x128xf32>
    %70 = vector.extract_strided_slice %50 {offsets = [0, 3, 0], sizes = [8, 8, 138], strides = [1, 1, 1]} : vector<8x12x138xbf16> to vector<8x8x138xbf16>
    %71 = vector.shape_cast %70 : vector<8x8x138xbf16> to vector<64x138xbf16>
    %c3_37 = arith.constant 3 : index
    %c0_38 = arith.constant 0 : index
    %c0_39 = arith.constant 0 : index
    %72 = vector.load %arg5[%c3_37, %c0_38, %c0_39] : memref<5x138x128xbf16, #tpu.memory_space<vmem>>, vector<1x138x128xbf16>
    %73 = vector.shape_cast %72 : vector<1x138x128xbf16> to vector<138x128xbf16>
    %cst_40 = arith.constant dense<0.000000e+00> : vector<64x128xf32>
    %74 = tpu.matmul %71, %73, %cst_40 {dimension_numbers = #tpu.dot_dimension_numbers<[1], [0], [0], [1], [0, 0, 1, 1], [], []>} : vector<64x138xbf16>, vector<138x128xbf16>, vector<64x128xf32> -> vector<64x128xf32>
    %75 = arith.addf %69, %74 : vector<64x128xf32>
    %76 = vector.extract_strided_slice %50 {offsets = [0, 4, 0], sizes = [8, 8, 138], strides = [1, 1, 1]} : vector<8x12x138xbf16> to vector<8x8x138xbf16>
    %77 = vector.shape_cast %76 : vector<8x8x138xbf16> to vector<64x138xbf16>
    %c4_41 = arith.constant 4 : index
    %c0_42 = arith.constant 0 : index
    %c0_43 = arith.constant 0 : index
    %78 = vector.load %arg5[%c4_41, %c0_42, %c0_43] : memref<5x138x128xbf16, #tpu.memory_space<vmem>>, vector<1x138x128xbf16>
    %79 = vector.shape_cast %78 : vector<1x138x128xbf16> to vector<138x128xbf16>
    %cst_44 = arith.constant dense<0.000000e+00> : vector<64x128xf32>
    %80 = tpu.matmul %77, %79, %cst_44 {dimension_numbers = #tpu.dot_dimension_numbers<[1], [0], [0], [1], [0, 0, 1, 1], [], []>} : vector<64x138xbf16>, vector<138x128xbf16>, vector<64x128xf32> -> vector<64x128xf32>
    %81 = arith.addf %75, %80 : vector<64x128xf32>
    %c0_45 = arith.constant 0 : index
    %c0_46 = arith.constant 0 : index
    %82 = vector.load %arg6[%c0_45, %c0_46] : memref<1x128xf32, #tpu.memory_space<vmem>>, vector<1x128xf32>
    %83 = vector.broadcast %82 : vector<1x128xf32> to vector<64x128xf32>
    %84 = arith.addf %81, %83 : vector<64x128xf32>
    %cst_47 = arith.constant 0.000000e+00 : f32
    %85 = vector.broadcast %cst_47 : f32 to vector<64x128xf32>
    %86 = arith.maximumf %84, %85 : vector<64x128xf32>
    %87 = vector.shape_cast %86 : vector<64x128xf32> to vector<8x8x128xf32>
    %88 = vector.extract_strided_slice %87 {offsets = [0, 0, 0], sizes = [8, 8, 112], strides = [1, 1, 1]} : vector<8x8x128xf32> to vector<8x8x112xf32>
    %89 = vector.extract_strided_slice %87 {offsets = [0, 0, 16], sizes = [8, 8, 112], strides = [1, 1, 1]} : vector<8x8x128xf32> to vector<8x8x112xf32>
    %90 = arith.maximumf %88, %89 : vector<8x8x112xf32>
    %91 = vector.extract_strided_slice %90 {offsets = [0, 0, 0], sizes = [8, 7, 112], strides = [1, 1, 1]} : vector<8x8x112xf32> to vector<8x7x112xf32>
    %92 = vector.extract_strided_slice %90 {offsets = [0, 1, 0], sizes = [8, 7, 112], strides = [1, 1, 1]} : vector<8x8x112xf32> to vector<8x7x112xf32>
    %93 = arith.maximumf %91, %92 : vector<8x7x112xf32>
    %94 = arith.truncf %93 : vector<8x7x112xf32> to vector<8x7x112xbf16>
    %cst_48 = arith.constant 0.000000e+00 : f32
    %95 = vector.broadcast %cst_48 : f32 to vector<8x128xf32>
    %96 = vector.extract_strided_slice %94 {offsets = [0, 0, 0], sizes = [8, 1, 112], strides = [1, 1, 1]} : vector<8x7x112xbf16> to vector<8x1x112xbf16>
    %97 = vector.shape_cast %96 : vector<8x1x112xbf16> to vector<8x112xbf16>
    %c0_49 = arith.constant 0 : index
    %c0_50 = arith.constant 0 : index
    %c0_51 = arith.constant 0 : index
    %98 = vector.load %arg7[%c0_49, %c0_50, %c0_51] : memref<4x112x128xbf16, #tpu.memory_space<vmem>>, vector<1x112x128xbf16>
    %99 = vector.shape_cast %98 : vector<1x112x128xbf16> to vector<112x128xbf16>
    %cst_52 = arith.constant dense<0.000000e+00> : vector<8x128xf32>
    %100 = tpu.matmul %97, %99, %cst_52 {dimension_numbers = #tpu.dot_dimension_numbers<[1], [0], [0], [1], [0, 0, 1, 1], [], []>} : vector<8x112xbf16>, vector<112x128xbf16>, vector<8x128xf32> -> vector<8x128xf32>
    %101 = arith.addf %95, %100 : vector<8x128xf32>
    %102 = vector.extract_strided_slice %94 {offsets = [0, 2, 0], sizes = [8, 1, 112], strides = [1, 1, 1]} : vector<8x7x112xbf16> to vector<8x1x112xbf16>
    %103 = vector.shape_cast %102 : vector<8x1x112xbf16> to vector<8x112xbf16>
    %c1_53 = arith.constant 1 : index
    %c0_54 = arith.constant 0 : index
    %c0_55 = arith.constant 0 : index
    %104 = vector.load %arg7[%c1_53, %c0_54, %c0_55] : memref<4x112x128xbf16, #tpu.memory_space<vmem>>, vector<1x112x128xbf16>
    %105 = vector.shape_cast %104 : vector<1x112x128xbf16> to vector<112x128xbf16>
    %cst_56 = arith.constant dense<0.000000e+00> : vector<8x128xf32>
    %106 = tpu.matmul %103, %105, %cst_56 {dimension_numbers = #tpu.dot_dimension_numbers<[1], [0], [0], [1], [0, 0, 1, 1], [], []>} : vector<8x112xbf16>, vector<112x128xbf16>, vector<8x128xf32> -> vector<8x128xf32>
    %107 = arith.addf %101, %106 : vector<8x128xf32>
    %108 = vector.extract_strided_slice %94 {offsets = [0, 4, 0], sizes = [8, 1, 112], strides = [1, 1, 1]} : vector<8x7x112xbf16> to vector<8x1x112xbf16>
    %109 = vector.shape_cast %108 : vector<8x1x112xbf16> to vector<8x112xbf16>
    %c2_57 = arith.constant 2 : index
    %c0_58 = arith.constant 0 : index
    %c0_59 = arith.constant 0 : index
    %110 = vector.load %arg7[%c2_57, %c0_58, %c0_59] : memref<4x112x128xbf16, #tpu.memory_space<vmem>>, vector<1x112x128xbf16>
    %111 = vector.shape_cast %110 : vector<1x112x128xbf16> to vector<112x128xbf16>
    %cst_60 = arith.constant dense<0.000000e+00> : vector<8x128xf32>
    %112 = tpu.matmul %109, %111, %cst_60 {dimension_numbers = #tpu.dot_dimension_numbers<[1], [0], [0], [1], [0, 0, 1, 1], [], []>} : vector<8x112xbf16>, vector<112x128xbf16>, vector<8x128xf32> -> vector<8x128xf32>
    %113 = arith.addf %107, %112 : vector<8x128xf32>
    %114 = vector.extract_strided_slice %94 {offsets = [0, 6, 0], sizes = [8, 1, 112], strides = [1, 1, 1]} : vector<8x7x112xbf16> to vector<8x1x112xbf16>
    %115 = vector.shape_cast %114 : vector<8x1x112xbf16> to vector<8x112xbf16>
    %c3_61 = arith.constant 3 : index
    %c0_62 = arith.constant 0 : index
    %c0_63 = arith.constant 0 : index
    %116 = vector.load %arg7[%c3_61, %c0_62, %c0_63] : memref<4x112x128xbf16, #tpu.memory_space<vmem>>, vector<1x112x128xbf16>
    %117 = vector.shape_cast %116 : vector<1x112x128xbf16> to vector<112x128xbf16>
    %cst_64 = arith.constant dense<0.000000e+00> : vector<8x128xf32>
    %118 = tpu.matmul %115, %117, %cst_64 {dimension_numbers = #tpu.dot_dimension_numbers<[1], [0], [0], [1], [0, 0, 1, 1], [], []>} : vector<8x112xbf16>, vector<112x128xbf16>, vector<8x128xf32> -> vector<8x128xf32>
    %119 = arith.addf %113, %118 : vector<8x128xf32>
    %c0_65 = arith.constant 0 : index
    %c0_66 = arith.constant 0 : index
    %120 = vector.load %arg8[%c0_65, %c0_66] : memref<1x128xf32, #tpu.memory_space<vmem>>, vector<1x128xf32>
    %121 = vector.broadcast %120 : vector<1x128xf32> to vector<8x128xf32>
    %122 = arith.addf %119, %121 : vector<8x128xf32>
    %cst_67 = arith.constant 0.000000e+00 : f32
    %123 = vector.broadcast %cst_67 : f32 to vector<8x128xf32>
    %124 = arith.maximumf %122, %123 : vector<8x128xf32>
    %125 = arith.truncf %124 : vector<8x128xf32> to vector<8x128xbf16>
    %c0_68 = arith.constant 0 : index
    %c0_69 = arith.constant 0 : index
    %126 = vector.load %arg9[%c0_68, %c0_69] : memref<128x128xbf16, #tpu.memory_space<vmem>>, vector<128x128xbf16>
    %cst_70 = arith.constant dense<0.000000e+00> : vector<8x128xf32>
    %127 = tpu.matmul %125, %126, %cst_70 {dimension_numbers = #tpu.dot_dimension_numbers<[1], [0], [0], [1], [0, 0, 1, 1], [], []>} : vector<8x128xbf16>, vector<128x128xbf16>, vector<8x128xf32> -> vector<8x128xf32>
    %c0_71 = arith.constant 0 : index
    %c0_72 = arith.constant 0 : index
    %128 = vector.load %arg10[%c0_71, %c0_72] : memref<1x128xf32, #tpu.memory_space<vmem>>, vector<1x128xf32>
    %129 = vector.broadcast %128 : vector<1x128xf32> to vector<8x128xf32>
    %130 = arith.addf %127, %129 : vector<8x128xf32>
    %cst_73 = arith.constant 0.000000e+00 : f32
    %131 = vector.broadcast %cst_73 : f32 to vector<8x128xf32>
    %132 = arith.maximumf %130, %131 : vector<8x128xf32>
    %133 = arith.truncf %132 : vector<8x128xf32> to vector<8x128xbf16>
    %c0_74 = arith.constant 0 : index
    %c0_75 = arith.constant 0 : index
    %134 = vector.load %arg11[%c0_74, %c0_75] : memref<128x128xbf16, #tpu.memory_space<vmem>>, vector<128x128xbf16>
    %cst_76 = arith.constant dense<0.000000e+00> : vector<8x128xf32>
    %135 = tpu.matmul %133, %134, %cst_76 {dimension_numbers = #tpu.dot_dimension_numbers<[1], [0], [0], [1], [0, 0, 1, 1], [], []>} : vector<8x128xbf16>, vector<128x128xbf16>, vector<8x128xf32> -> vector<8x128xf32>
    %c0_77 = arith.constant 0 : index
    %c0_78 = arith.constant 0 : index
    %136 = vector.load %arg12[%c0_77, %c0_78] : memref<1x128xf32, #tpu.memory_space<vmem>>, vector<1x128xf32>
    %137 = vector.broadcast %136 : vector<1x128xf32> to vector<8x128xf32>
    %138 = arith.addf %135, %137 : vector<8x128xf32>
    %c0_79 = arith.constant 0 : index
    %c0_80 = arith.constant 0 : index
    %139 = vector.load %arg13[%c0_79, %c0_80] : memref<8x128xf32, #tpu.memory_space<vmem>>, vector<8x128xf32>
    tpu.vector_store %arg13[%c0_79, %c0_80], %138 {strides = array<i32>} : memref<8x128xf32, #tpu.memory_space<vmem>>, vector<8x128xf32>,
    return
  }
  func.func @transform_0(%arg0: i32) -> (i32, i32, i32) {
    %c0_i32 = arith.constant 0 : i32
    %c0_i32_0 = arith.constant 0 : i32
    %c0_i32_1 = arith.constant 0 : i32
    return %arg0, %c0_i32, %c0_i32_0 : i32, i32, i32
  }
  func.func @transform_1(%arg0: i32) -> (i32, i32, i32) {
    %c0_i32 = arith.constant 0 : i32
    %c0_i32_0 = arith.constant 0 : i32
    %c0_i32_1 = arith.constant 0 : i32
    %c0_i32_2 = arith.constant 0 : i32
    return %c0_i32, %c0_i32_0, %c0_i32_1 : i32, i32, i32
  }
  func.func @transform_2(%arg0: i32) -> (i32, i32) {
    %c0_i32 = arith.constant 0 : i32
    %c0_i32_0 = arith.constant 0 : i32
    %c0_i32_1 = arith.constant 0 : i32
    return %c0_i32, %c0_i32_0 : i32, i32
  }
  func.func @transform_3(%arg0: i32) -> (i32, i32) {
    %c0_i32 = arith.constant 0 : i32
    %c0_i32_0 = arith.constant 0 : i32
    %c0_i32_1 = arith.constant 0 : i32
    return %c0_i32, %c0_i32_0 : i32, i32
  }
  func.func @transform_4(%arg0: i32) -> (i32, i32, i32) {
    %c0_i32 = arith.constant 0 : i32
    %c0_i32_0 = arith.constant 0 : i32
    %c0_i32_1 = arith.constant 0 : i32
    %c0_i32_2 = arith.constant 0 : i32
    return %c0_i32, %c0_i32_0, %c0_i32_1 : i32, i32, i32
  }
  func.func @transform_5(%arg0: i32) -> (i32, i32) {
    %c0_i32 = arith.constant 0 : i32
    %c0_i32_0 = arith.constant 0 : i32
    %c0_i32_1 = arith.constant 0 : i32
    return %c0_i32, %c0_i32_0 : i32, i32
  }
  func.func @transform_6(%arg0: i32) -> (i32, i32, i32) {
    %c0_i32 = arith.constant 0 : i32
    %c0_i32_0 = arith.constant 0 : i32
    %c0_i32_1 = arith.constant 0 : i32
    %c0_i32_2 = arith.constant 0 : i32
    return %c0_i32, %c0_i32_0, %c0_i32_1 : i32, i32, i32
  }
  func.func @transform_7(%arg0: i32) -> (i32, i32) {
    %c0_i32 = arith.constant 0 : i32
    %c0_i32_0 = arith.constant 0 : i32
    %c0_i32_1 = arith.constant 0 : i32
    return %c0_i32, %c0_i32_0 : i32, i32
  }
  func.func @transform_8(%arg0: i32) -> (i32, i32) {
    %c0_i32 = arith.constant 0 : i32
    %c0_i32_0 = arith.constant 0 : i32
    %c0_i32_1 = arith.constant 0 : i32
    return %c0_i32, %c0_i32_0 : i32, i32
  }
  func.func @transform_9(%arg0: i32) -> (i32, i32) {
    %c0_i32 = arith.constant 0 : i32
    %c0_i32_0 = arith.constant 0 : i32
    %c0_i32_1 = arith.constant 0 : i32
    return %c0_i32, %c0_i32_0 : i32, i32
  }
  func.func @transform_10(%arg0: i32) -> (i32, i32) {
    %c0_i32 = arith.constant 0 : i32
    %c0_i32_0 = arith.constant 0 : i32
    %c0_i32_1 = arith.constant 0 : i32
    return %c0_i32, %c0_i32_0 : i32, i32
  }
  func.func @transform_11(%arg0: i32) -> (i32, i32) {
    %c0_i32 = arith.constant 0 : i32
    %c0_i32_0 = arith.constant 0 : i32
    %c0_i32_1 = arith.constant 0 : i32
    return %c0_i32, %c0_i32_0 : i32, i32
  }
  func.func @transform_12(%arg0: i32) -> (i32, i32) {
    %c0_i32 = arith.constant 0 : i32
    %c0_i32_0 = arith.constant 0 : i32
    return %arg0, %c0_i32 : i32, i32
  }
}

</mosaic_0001>

<bundles_post_ra>
// kernel: lenet_forward.1
= control target key start
LH: loop header
LB: loop body
LE: loop exit
PB: predicated region body
PF: predicated region fallthrough
CT: control target
= control target key end

     0   :  { %17 = vsyncpa [#allocation3], 0  ;;  %s8796_s0 = inlined_call_operand.vmem [shape: bf16[8,28,28], index: 0, kind: input, shape index: {}]   ;;  %s8797_s1 = inlined_call_operand.hbm [shape: bf16[5,28,144], index: 1, kind: input, shape index: {}]   ;;  %s8798_s2 = inlined_call_operand.vmem [shape: f32[1,144], index: 2, kind: input, shape index: {}]   ;;  %s8799_s3 = inlined_call_operand.vmem [shape: bf16[12,23], index: 3, kind: input, shape index: {}]   ;;  %s8800_s4 = inlined_call_operand.hbm [shape: bf16[5,138,128], index: 4, kind: input, shape index: {}]   ;;  %s8801_s5 = inlined_call_operand.vmem [shape: f32[1,128], index: 5, kind: input, shape index: {}]   ;;  %s8802_s6 = inlined_call_operand.vmem [shape: bf16[4,112,128], index: 6, kind: input, shape index: {}]   ;;  %s8803_s7 = inlined_call_operand.vmem [shape: f32[1,128], index: 7, kind: input, shape index: {}]   ;;  %s8804_s8 = inlined_call_operand.hbm [shape: bf16[128,128], index: 8, kind: input, shape index: {}]   ;;  %s8805_s9 = inlined_call_operand.vmem [shape: f32[1,128], index: 9, kind: input, shape index: {}]   ;;  %s8806_s10 = inlined_call_operand.hbm [shape: bf16[128,128], index: 10, kind: input, shape index: {}]   ;;  %s8807_s11 = inlined_call_operand.vmem [shape: f32[1,128], index: 11, kind: input, shape index: {}]   ;;  %s8808_s12 = inlined_call_operand.vmem [shape: f32[8,128], index: 12, kind: output, shape index: {}]  }
   0x1   :  { %18 = vsyncpa [#allocation5], 0 }
   0x2   :  { %19 = vsyncpa [#allocation8], 0  ;;  %s6479_s21 = smov [#allocation4]   ;;  %s6385_s25 = scalar_lea.hbm %s8800_s4, 5760 }
   0x3   :  { %s43_s22 = sshll.u32 %s6479_s21, 4  ;;  %p6386_p0 = scmp.ne.s32.totalorder %s8800_s4, %s6385_s25  ;;  %s44_s22 = int_to_ptr.vmem [resolvable:$true] %s43_s22 }
   0x4   :  { %p6389_p1 = scmp.lt.u32.totalorder %s6385_s25, %s8800_s4 }
   0x6   :  { %p6391_p2 = pnand %p6389_p1, %p6386_p0 }
   0x8   :  { %6394 = shalt.err (!%p6391_p2)
}
   0x9   :  { %s6395_s30 = scalar_lea.vmem %s44_s22, 5760  ;;  %p6400_p4 = scmp.lt.s32.totalorder %s44_s22, %s44_s22 }
   0xa   :  { %p6396_p3 = scmp.ne.s32.totalorder %s44_s22, %s6395_s30  ;;  %p6401_p5 = scmp.lt.s32.totalorder %s6395_s30, %s6395_s30 }
   0xc   :  { %p6402_p6 = por %p6401_p5, %p6400_p4 }
   0xe   :  { %p6403_p7 = pnand %p6402_p6, %p6396_p3 }
  0x10   :  { %6406 = shalt.err (!%p6403_p7)
}
  0x11   :  { %s6480_s13 = smov 64   ;;  %s6481_s14 = smov 4  }
  0x12   :  { %49 = dma.hbm_to_vmem [thread:$0]  %s8800_s4, 5760, %s44_s22, [#allocation5], %s6480_s13, %s6480_s13, %s6481_s14  }
  0x13   :  { %s6482_s17 = smov [#allocation2]   ;;  %s6407_s21 = scalar_lea.hbm %s8797_s1, 2560 }
  0x14   :  { %s27_s18 = sshll.u32 %s6482_s17, 4  ;;  %p6408_p8 = scmp.ne.s32.totalorder %s8797_s1, %s6407_s21  ;;  %s28_s18 = int_to_ptr.vmem [resolvable:$true] %s27_s18 }
  0x15   :  { %p6411_p9 = scmp.lt.u32.totalorder %s6407_s21, %s8797_s1 }
  0x17   :  { %p6413_p10 = pnand %p6411_p9, %p6408_p8 }
  0x19   :  { %6416 = shalt.err (!%p6413_p10)
}
  0x1a   :  { %s6417_s27 = scalar_lea.vmem %s28_s18, 2560  ;;  %p6422_p12 = scmp.lt.s32.totalorder %s28_s18, %s28_s18 }
  0x1b   :  { %p6418_p11 = scmp.ne.s32.totalorder %s28_s18, %s6417_s27  ;;  %p6423_p13 = scmp.lt.s32.totalorder %s6417_s27, %s6417_s27 }
  0x1d   :  { %p6424_p0 = por %p6423_p13, %p6422_p12 }
  0x1f   :  { %p6425_p1 = pnand %p6424_p0, %p6418_p11 }
  0x21   :  { %6428 = shalt.err (!%p6425_p1)
}
  0x22   :  { %s6483_s4 = smov 128   ;;  %s6484_s22 = smov 8  }
  0x23   :  { %33 = dma.hbm_to_vmem [thread:$0]  %s8797_s1, 2560, %s28_s18, [#allocation3], %s6483_s4, %s6483_s4, %s6484_s22  }
  0x24   :  { %s6485_s30 = smov [#allocation6]   ;;  %s6486_s16 = smov [#allocation7]  }
  0x25   :  { %s61_s15 = sshll.u32 %s6485_s30, 4  ;;  %s75_s17 = sshll.u32 %s6486_s16, 4  ;;  %s62_s15 = int_to_ptr.vmem [resolvable:$true] %s61_s15  ;;  %s6585_s17 = int_to_ptr.vmem [resolvable:$true] %s75_s17 }
  0x26   :  { %s6429_s21 = scalar_lea.hbm %s8804_s8, 1024 }
  0x27   :  { %p6430_p2 = scmp.ne.s32.totalorder %s8804_s8, %s6429_s21  ;;  %p6433_p3 = scmp.lt.u32.totalorder %s6429_s21, %s8804_s8 }
  0x29   :  { %p6435_p4 = pnand %p6433_p3, %p6430_p2 }
  0x2b   :  { %6438 = shalt.err (!%p6435_p4)
}
  0x2c   :  { %s6439_s1 = scalar_lea.vmem %s62_s15, 1024  ;;  %p6444_p6 = scmp.lt.s32.totalorder %s62_s15, %s62_s15 }
  0x2d   :  { %p6440_p5 = scmp.ne.s32.totalorder %s62_s15, %s6439_s1  ;;  %p6445_p7 = scmp.lt.s32.totalorder %s6439_s1, %s6439_s1 }
  0x2f   :  { %p6446_p8 = por %p6445_p7, %p6444_p6 }
  0x31   :  { %p6447_p9 = pnand %p6446_p8, %p6440_p5 }
  0x33   :  { %6450 = shalt.err (!%p6447_p9)
}
  0x34   :  { %67 = dma.hbm_to_vmem [thread:$0]  %s8804_s8, 1024, %s62_s15, [#allocation5], %s6480_s13, %s6480_s13, %s6481_s14  }
  0x35   :  { %s6451_s28 = scalar_lea.hbm %s8806_s10, 1024 }
  0x36   :  { %p6452_p10 = scmp.ne.s32.totalorder %s8806_s10, %s6451_s28  ;;  %p6455_p11 = scmp.lt.u32.totalorder %s6451_s28, %s8806_s10 }
  0x38   :  { %p6457_p12 = pnand %p6455_p11, %p6452_p10 }
  0x3a   :  { %6460 = shalt.err (!%p6457_p12)
}
  0x3b   :  { %s6461_s20 = scalar_lea.vmem %s6585_s17, 1024  ;;  %p6466_p0 = scmp.lt.s32.totalorder %s6585_s17, %s6585_s17 }
  0x3c   :  { %p6462_p13 = scmp.ne.s32.totalorder %s6585_s17, %s6461_s20  ;;  %p6467_p1 = scmp.lt.s32.totalorder %s6461_s20, %s6461_s20 }
  0x3e   :  { %p6468_p2 = por %p6467_p1, %p6466_p0 }
  0x40   :  { %p6469_p3 = pnand %p6468_p2, %p6462_p13 }
  0x42   :  { %6472 = shalt.err (!%p6469_p3)
}
  0x43   :  { %81 = dma.hbm_to_vmem [thread:$0]  %s8806_s10, 1024, %s6585_s17, [#allocation8], %s6480_s13, %s6480_s13, %s6481_s14  }
  0x44   :  { %6473 = dma.done.wait [#allocation3], 2560  }
  0x45   :  { %6474 = vsyncadd [#allocation3], 4294964736 }
  0x46   :  { %6475 = dma.done.wait [#allocation5], 6784  }
  0x47   :  { %6476 = vsyncadd [#allocation5], 4294960512 }
  0x48   :  { %6477 = dma.done.wait [#allocation8], 1024  }
  0x49   :  { %6478 = vsyncadd [#allocation8], 4294966272  ;;  %v8833_v0 = vmov 0   ;;  %v6229_v1 = vld [vmem:[#allocation2 + $0x24] ss:$8 sps:$4 sm:$0xff]   ;;  %vm504_vm1 = vcmask 1045504  }
  0x4a   :  { %543 = vmatprep.mubr.bf16.mxu0 %v8833_v0  ;;  %633 = vmatprep.mubr.bf16.mxu1 %v8833_v0  ;;  %vm133_vm0 = vsmask.f32 3328  ;;  %v6231_v2 = vld [vmem:[#allocation2 + $0x20] ss:$8 sps:$4 sm:$0xff]   ;;  %v6632_v6 = vld [vmem:[%s8796_s0 + $0x4] sm:$0xf] }
  0x4b   :  { %511 = vmatprep.subr.bf16.mxu0 %v6229_v1  ;;  %v6232_v3 = vld [vmem:[#allocation2 + $0x34] ss:$8 sps:$4 sm:$0x3f]   ;;  %v6234_v4 = vld [vmem:[#allocation2 + $0x30] ss:$8 sps:$4 sm:$0x3f]   ;;  %5879 = vmatprep.subr.bf16.mxu1 %v6229_v1 }
  0x4c   :  { %512 = vmatpush1.bf16.msra.mxu0 %v6231_v2  ;;  %v6627_v5 = vld [vmem:[%s8796_s0] sm:$0xf]  ;;  %v6637_v7 = vld [vmem:[%s8796_s0 + $0x8] sm:$0xf]  ;;  %5881 = vmatpush1.bf16.msra.mxu1 %v6231_v2  ;;  %v506_v8 = vsel %vm504_vm1, %v6234_v4, 0  ;;  %v146_v11 = vshll.u32 %v6632_v6, 16 }
  0x4d   :  { %5308 = vmatprep.subr.msk.bf16.mxu0 %vm504_vm1, %v6232_v3  ;;  %v137_v9 = vshrl.u32 %v6627_v5, 16  ;;  %v140_v10 = vshll.u32 %v6627_v5, 16  ;;  %5880 = vmatprep.subr.msk.bf16.mxu1 %vm504_vm1, %v6232_v3  ;;  %vm134_vm2 = vsmask.f32 7440  ;;  %v150_v12 = vshrl.u32 %v6632_v6, 16 }
  0x4e   :  { %v156_v13 = vshll.u32 %v6637_v7, 16  ;;  %v6237_v14 = vld [vmem:[#allocation2 + $0x4] ss:$8 sps:$4 sm:$0xff]   ;;  %v148_v17 = vrot.slane %v146_v11, 5  ;;  %v6659_v23 = vld [vmem:[%s8796_s0 + $0x10] sm:$0xf]  ;;  %vm6664_vm3 = vmor %vm133_vm0, %vm134_vm2 }
  0x4f   :  { %v139_v15 = vrot.slane %v137_v9, 4  ;;  %v142_v16 = vrot.slane %v140_v10, 5  ;;  %v6647_v18 = vrot.slane %v137_v9, 5  ;;  %v6652_v19 = vld [vmem:[%s8796_s0 + $0xc] sm:$0x3]  ;;  %v152_v20 = vrot.slane %v150_v12, 4 }
  0x50   :  { %514 = vmatpush1.bf16.msra.mxu0 %v506_v8  ;;  %v6654_v21 = vrot.slane %v140_v10, 6  ;;  %v1337_v22 = vrot.slane %v150_v12, 5  ;;  %5882 = vmatpush1.bf16.msra.mxu1 %v506_v8  ;;  %v158_v25 = vrot.slane %v156_v13, 5  ;;  %v1338_v26 = vrot.slane %v146_v11, 6  ;;  %v6677_v35 = vld [vmem:[%s8796_s0 + $0x14] sm:$0xf] }
  0x51   :  { %v143_v24 = vor.u32 %v142_v16, %v139_v15  ;;  %784 = vmatprep.subr.bf16.mxu0 %v6237_v14  ;;  %v160_v27 = vshrl.u32 %v6637_v7, 16  ;;  %v8899_v28 = vmov 0  ;;  %v153_v29 = vor.u32 %v152_v20, %v148_v17  ;;  %v6685_v41 = vld [vmem:[%s8796_s0 + $0x18] sm:$0xf]  ;;  %v6235_v43 = vld [vmem:[#allocation2] ss:$8 sps:$4 sm:$0xff]  }
  0x52   :  { %v8900_v28 = vsel %vm6664_vm3, 4294967295, %v8899_v28  ;;  %v1335_v30 = vor.u32 %v6654_v21, %v6647_v18  ;;  %v166_v31 = vshll.u32 %v6652_v19, 16  ;;  %v171_v32 = vshrl.u32 %v6659_v23, 16  ;;  %v6696_v47 = vld [vmem:[%s8796_s0 + $0x1c] sm:$0x3] }
  0x53   :  { %8901 = vst [vmem:[#allocation12_spill] sm:$0xff] %v8900_v28  ;;  %v144_v33 = vrot.slane %v143_v24, 4  ;;  %v6672_v34 = vor.u32 %v1338_v26, %v1337_v22  ;;  %v162_v36 = vrot.slane %v160_v27, 4  ;;  %v174_v37 = vshll.u32 %v6659_v23, 16  ;;  %v6705_v52 = vld [vmem:[%s8796_s0 + $0x20] sm:$0xf] }
  0x54   :  { %v154_v38 = vrot.slane %v153_v29, 4  ;;  %vm467_vm4 = vcmask 228352   ;;  %v1343_v39 = vrot.slane %v156_v13, 6  ;;  %v173_v40 = vrot.slane %v171_v32, 4  ;;  %v6711_v57 = vld [vmem:[%s8796_s0 + $0x24] sm:$0xf] }
  0x55   :  { %v149_v42 = vsel %vm6664_vm3, %v144_v33, %v148_v17  ;;  %v163_v44 = vor.u32 %v162_v36, %v158_v25  ;;  %v168_v45 = vrot.slane %v166_v31, 5  ;;  %v176_v46 = vrot.slane %v174_v37, 5  ;;  %v6238_v62 = vld [vmem:[#allocation2 + $0x14] ss:$8 sps:$4 sm:$0x3f]  }
  0x56   :  { %v159_v48 = vsel %vm6664_vm3, %v154_v38, %v158_v25  ;;  %v180_v49 = vshll.u32 %v6677_v35, 16  ;;  %v1342_v50 = vrot.slane %v160_v27, 5  ;;  %v184_v51 = vshrl.u32 %v6677_v35, 16  ;;  %v6739_v15 = vld [vmem:[%s8796_s0 + $0x28] sm:$0xf] }
  0x57   :  { %v5292_v53 = vcombine.low %v149_v42, %v159_v48  ;;  %v164_v54 = vrot.slane %v163_v44, 4  ;;  %v177_v55 = vor.u32 %v176_v46, %v173_v40  ;;  %v190_v56 = vshll.u32 %v6685_v41, 16  ;;  %v6240_v25 = vld [vmem:[#allocation2 + $0x10] ss:$8 sps:$4 sm:$0x3f]  }
  0x58   :  { %v182_v58 = vrot.slane %v180_v49, 5  ;;  %v6715_v59 = vor.u32 %v1343_v39, %v1342_v50  ;;  %v186_v60 = vrot.slane %v184_v51, 4  ;;  %v194_v61 = vshrl.u32 %v6685_v41, 16  ;;  %v6754_v33 = vld [vmem:[%s8796_s0 + $0x30] sm:$0xf] }
  0x59   :  { %5309 = vmatmul.mubr.msk.bf16.vlgmr.msra.gmra.mrb[0].mxu0 %vm467_vm4, %v5292_v53  ;;  %v169_v63 = vsel %vm6664_vm3, %v164_v54, %v168_v45  ;;  %v178_v1 = vrot.slane %v177_v55, 4  ;;  %v192_v2 = vrot.slane %v190_v56, 5  ;;  %v200_v3 = vshll.u32 %v6696_v47, 16  ;;  %v6770_v48 = vld [vmem:[%s8796_s0 + $0x2c] sm:$0x3] }
  0x5a   :  { %785 = vmatpush1.bf16.msra.mxu0 %v6235_v43  ;;  %553 = vmatprep.mubr.bf16.mxu0 %v8833_v0  ;;  %v187_v4 = vor.u32 %v186_v60, %v182_v58  ;;  %v196_v8 = vrot.slane %v194_v61, 4  ;;  %v205_v9 = vshrl.u32 %v6705_v52, 16  ;;  %v208_v10 = vshll.u32 %v6705_v52, 16  ;;  %v6244_v50 = vld [vmem:[#allocation2 + $0x44] ss:$8 sps:$4 sm:$0xff]  }
  0x5b   :  { %v183_v11 = vsel %vm6664_vm3, %v178_v1, %v182_v58  ;;  %v8828_v12 = vshll.u32 %v6711_v57, 16  ;;  %v8829_v13 = vshrl.u32 %v6711_v57, 16  ;;  %5337 = vmatprep.subr.msk.bf16.mxu0 %vm504_vm1, %v6238_v62  ;;  %v202_v29 = vrot.slane %v200_v3, 5  ;;  %v6779_v58 = vld [vmem:[%s8796_s0 + $0x38] sm:$0xf] }
  0x5c   :  { %v197_v14 = vor.u32 %v196_v8, %v192_v2  ;;  %v207_v16 = vrot.slane %v205_v9, 4  ;;  %v5293_v17 = vcombine.low %v169_v63, %v183_v11  ;;  %v210_v20 = vrot.slane %v208_v10, 5  ;;  %v6784_v63 = vld [vmem:[%s8796_s0 + $0x34] sm:$0xf] }
  0x5d   :  { %v216_v22 = vrot.slane %v8828_v12, 5  ;;  %v220_v24 = vrot.slane %v8829_v13, 4  ;;  %v188_v26 = vrot.slane %v187_v4, 4  ;;  %v8826_v38 = vshll.u32 %v6739_v15, 16  ;;  %v6793_v4 = vld [vmem:[%s8796_s0 + $0x40] sm:$0xf] }
  0x5e   :  { %v198_v27 = vrot.slane %v197_v14, 4  ;;  %v211_v36 = vor.u32 %v210_v20, %v207_v16  ;;  %v8827_v39 = vshrl.u32 %v6739_v15, 16  ;;  %v8818_v42 = vshrl.u32 %v6754_v33, 16 }
  0x5f   :  { %v221_v40 = vor.u32 %v220_v24, %v216_v22  ;;  %v8817_v43 = vshll.u32 %v6754_v33, 16  ;;  %v193_v44 = vsel %vm6664_vm3, %v188_v26, %v192_v2  ;;  %v779_v46 = vsel %vm504_vm1, %v6240_v25, 0 }
  0x60   :  { %v203_v45 = vsel %vm6664_vm3, %v198_v27, %v202_v29  ;;  %787 = vmatpush1.bf16.msra.mxu0 %v779_v46  ;;  %v212_v53 = vrot.slane %v211_v36, 4  ;;  %v226_v54 = vrot.slane %v8826_v38, 5  ;;  %v230_v55 = vrot.slane %v8827_v39, 4 }
  0x61   :  { %5310 = vmatmul.mubr.msk.bf16.gmra.mrb[4].mxu0 %vm467_vm4, %v5293_v17  ;;  %v5294_v60 = vcombine.low %v193_v44, %v203_v45  ;;  %v222_v62 = vrot.slane %v221_v40, 4  ;;  %v241_v1 = vrot.slane %v8818_v42, 4  ;;  %v244_v2 = vrot.slane %v8817_v43, 5  ;;  %1129 = vmatprep.subr.bf16.mxu0 %v6244_v50  ;;  %v6822_v45 = vld [vmem:[%s8796_s0 + $0x44] sm:$0xf] }
  0x62   :  { %563 = vmatprep.mubr.bf16.mxu0 %v8833_v0  ;;  %v8814_v8 = vshrl.u32 %v6784_v63, 16  ;;  %v8809_v11 = vshll.u32 %v6779_v58, 16  ;;  %v8810_v14 = vshrl.u32 %v6779_v58, 16  ;;  %v217_v16 = vsel %vm6664_vm3, %v212_v53, %v216_v22  ;;  %v6811_v22 = vld [vmem:[%s8796_s0 + $0x3c] sm:$0x3] }
  0x63   :  { %v231_v17 = vor.u32 %v230_v55, %v226_v54  ;;  %v8815_v20 = vshll.u32 %v6770_v48, 16  ;;  %v8813_v24 = vshll.u32 %v6784_v63, 16  ;;  %v227_v25 = vsel %vm6664_vm3, %v222_v62, %v226_v54  ;;  %v6831_v55 = vld [vmem:[%s8796_s0 + $0x48] sm:$0xf] }
  0x64   :  { %v245_v26 = vor.u32 %v244_v2, %v241_v1  ;;  %v8812_v27 = vshrl.u32 %v6793_v4, 16  ;;  %v8811_v29 = vshll.u32 %v6793_v4, 16  ;;  %v254_v36 = vrot.slane %v8814_v8, 4 }
  0x65   :  { %v260_v40 = vrot.slane %v8809_v11, 5  ;;  %v264_v44 = vrot.slane %v8810_v14, 4  ;;  %v5295_v46 = vcombine.low %v217_v16, %v227_v25  ;;  %v232_v50 = vrot.slane %v231_v17, 4  ;;  %v6843_v14 = vld [vmem:[%s8796_s0 + $0x4c] sm:$0x3] }
  0x66   :  { %v236_v53 = vrot.slane %v8815_v20, 5  ;;  %v250_v54 = vrot.slane %v8813_v24, 5  ;;  %v8816_v62 = vshll.u32 %v6811_v22, 16  ;;  %v275_v1 = vrot.slane %v8812_v27, 4 }
  0x67   :  { %v278_v2 = vrot.slane %v8811_v29, 5  ;;  %v8819_v16 = vshll.u32 %v6822_v45, 16  ;;  %v8822_v17 = vshrl.u32 %v6822_v45, 16  ;;  %v265_v11 = vor.u32 %v264_v44, %v260_v40 }
  0x68   :  { %v255_v25 = vor.u32 %v254_v36, %v250_v54  ;;  %v237_v29 = vsel %vm6664_vm3, %v232_v50, %v236_v53  ;;  %v270_v27 = vrot.slane %v8816_v62, 5  ;;  %v8820_v44 = vshll.u32 %v6831_v55, 16 }
  0x69   :  { %5311 = vmatmul.mubr.msk.bf16.gmra.mrb[8].mxu0 %vm467_vm4, %v5294_v60  ;;  %v246_v60 = vrot.slane %v245_v26, 4  ;;  %v6848_v26 = vld [vmem:[%s8796_s0 + $0x50] sm:$0xf]  ;;  %v279_v36 = vor.u32 %v278_v2, %v275_v1  ;;  %v284_v8 = vrot.slane %v8819_v16, 5  ;;  %v8821_v20 = vshrl.u32 %v6831_v55, 16 }
  0x6a   :  { %573 = vmatprep.mubr.bf16.mxu0 %v8833_v0  ;;  %v256_v50 = vrot.slane %v255_v25, 4  ;;  %v266_v53 = vrot.slane %v265_v11, 4  ;;  %v8823_v62 = vshll.u32 %v6843_v14, 16  ;;  %v8824_v1 = vshrl.u32 %v6848_v26, 16  ;;  %v6879_v25 = vld [vmem:[%s8796_s0 + $0x58] sm:$0xf] }
  0x6b   :  { %v251_v24 = vsel %vm6664_vm3, %v246_v60, %v250_v54  ;;  %v280_v43 = vrot.slane %v279_v36, 4  ;;  %v294_v42 = vrot.slane %v8820_v44, 5  ;;  %v6871_v60 = vld [vmem:[%s8796_s0 + $0x54] sm:$0xf]  ;;  %v298_v16 = vrot.slane %v8821_v20, 4 }
  0x6c   :  { %v5296_v2 = vcombine.low %v237_v29, %v251_v24  ;;  %v8825_v11 = vshll.u32 %v6848_v26, 16  ;;  %v261_v24 = vsel %vm6664_vm3, %v256_v50, %v260_v40  ;;  %v271_v29 = vsel %vm6664_vm3, %v266_v53, %v270_v27  ;;  %v6898_v27 = vld [vmem:[%s8796_s0 + $0x5c] sm:$0x3] }
  0x6d   :  { %v309_v44 = vrot.slane %v8824_v1, 4  ;;  %v326_v40 = vshll.u32 %v6879_v25, 16  ;;  %v330_v50 = vshrl.u32 %v6879_v25, 16  ;;  %v5297_v53 = vcombine.low %v261_v24, %v271_v29 }
  0x6e   :  { %v312_v20 = vrot.slane %v8825_v11, 5  ;;  %v285_v1 = vsel %vm6664_vm3, %v280_v43, %v284_v8  ;;  %v336_v12 = vshll.u32 %v6898_v27, 16  ;;  %vm1330_vm5 = vsmask.f32 2304 }
  0x6f   :  { %v328_v43 = vrot.slane %v326_v40, 5  ;;  %vm1331_vm6 = vsmask.f32 6416  ;;  %v5329_v21 = vcombine.low %v6871_v60, %v6879_v25  ;;  %vm945_vm8 = vcmask 1042432  }
  0x70   :  { %v338_v29 = vrot.slane %v336_v12, 5  ;;  %vm6971_vm7 = vmor %vm1330_vm5, %vm1331_vm6  ;;  %vm946_vm9 = vcmask 1046532   ;;  %vm1795_vm11 = vcmask 1041408   ;;  %vm1796_vm12 = vcmask 1045508  }
  0x71   :  { %5312 = vmatmul.mubr.msk.bf16.gmra.mrb[12].mxu0 %vm467_vm4, %v5295_v46  ;;  %v288_v46 = vrot.slane %v8822_v17, 4  ;;  %v320_v17 = vshrl.u32 %v6871_v60, 16  ;;  %vm7031_vm10 = vmor %vm945_vm8, %vm946_vm9  ;;  %vm2432_vm14 = vcmask 998400   ;;  %vm2601_vm15 = vcmask 1046528  }
  0x72   :  { %583 = vmatprep.mubr.bf16.mxu0 %v8833_v0  ;;  %vm7422_vm13 = vmor %vm1795_vm11, %vm1796_vm12  ;;  %vm2822_vm0 = vcmask 1043456   ;;  %vm3540_vm2 = vcmask 1044480   ;;  %vm4612_vm5 = vcmask 1041409   ;;  %vm4617_vm6 = vcmask 1043459  }
  0x73   :  { %v289_v54 = vor.u32 %v288_v46, %v284_v8  ;;  %v304_v46 = vrot.slane %v8823_v62, 5  ;;  %v313_v62 = vor.u32 %v312_v20, %v309_v44  ;;  %v322_v20 = vrot.slane %v320_v17, 4 }
  0x74   :  { %v332_v8 = vrot.slane %v330_v50, 4  ;;  %vm4620_vm9 = vcmask 1044484   ;;  %vm4629_vm11 = vcmask 1047559   ;;  %vm4674_vm12 = vcmask 916480  }
  0x75   :  { %v290_v36 = vrot.slane %v289_v54, 4  ;;  %v299_v54 = vor.u32 %v298_v16, %v294_v42  ;;  %v314_v13 = vrot.slane %v313_v62, 4 }
  0x76   :  { %v333_v44 = vor.u32 %v332_v8, %v328_v43  ;;  %v6261_v8 = vld [vmem:[#allocation2 + $0x64] ss:$8 sps:$4 sm:$0xff]  }
  0x77   :  { %v295_v11 = vsel %vm6664_vm3, %v290_v36, %v294_v42  ;;  %v300_v38 = vrot.slane %v299_v54, 4 }
  0x78   :  { %v5298_v16 = vcombine.low %v285_v1, %v295_v11 }
  0x79   :  { %5313 = vmatmul.mubr.msk.bf16.gmra.mrb[16].mxu0 %vm467_vm4, %v5296_v2  ;;  %v316_v2 = vshll.u32 %v6871_v60, 16  ;;  %v305_v24 = vsel %vm6664_vm3, %v300_v38, %v304_v46  ;;  %v5321_v46 = vcombine.low %v6627_v5, %v6632_v6 }
  0x7a   :  { %593 = vmatprep.mubr.bf16.mxu0 %v8833_v0 }
  0x7b   :  { %v318_v39 = vrot.slane %v316_v2, 5 }
  0x7d   :  { %v323_v42 = vor.u32 %v322_v20, %v318_v39  ;;  %v319_v62 = vsel %vm6664_vm3, %v314_v13, %v318_v39  ;;  %v6242_v13 = vld [vmem:[#allocation2 + $0x40] ss:$8 sps:$4 sm:$0xff]   ;;  %v6253_v39 = vld [vmem:[#allocation2 + $0x50] ss:$8 sps:$4 sm:$0x3f]  }
  0x7e   :  { %v5299_v54 = vcombine.low %v305_v24, %v319_v62  ;;  %v6251_v20 = vld [vmem:[#allocation2 + $0x54] ss:$8 sps:$4 sm:$0x3f]   ;;  %v5325_v24 = vcombine.low %v6739_v15, %v6754_v33  ;;  %v5326_v62 = vcombine.low %v6784_v63, %v6779_v58 }
  0x7f   :  { %v324_v36 = vrot.slane %v323_v42, 4  ;;  %v5323_v42 = vcombine.low %v6677_v35, %v6685_v41 }
  0x81   :  { %5314 = vmatmul.mubr.msk.bf16.gmra.mrb[20].mxu0 %vm467_vm4, %v5297_v53  ;;  %v334_v53 = vrot.slane %v333_v44, 4  ;;  %v329_v1 = vsel %vm6664_vm3, %v324_v36, %v328_v43  ;;  %v1124_v43 = vsel %vm504_vm1, %v6253_v39, 0  ;;  %v5324_v44 = vcombine.low %v6705_v52, %v6711_v57  ;;  %v7004_v39 = vld [vmem:[%s8796_s0 + $0x68] sm:$0xf] }
  0x82   :  { %603 = vmatprep.mubr.bf16.mxu0 %v8833_v0  ;;  %v5328_v36 = vcombine.low %v6831_v55, %v6848_v26 }
  0x83   :  { %v339_v11 = vsel %vm6664_vm3, %v334_v53, %v338_v29  ;;  %v5327_v29 = vcombine.low %v6793_v4, %v6822_v45  ;;  %v1336_v53 = vrot.slane %v1335_v30, 4 }
  0x84   :  { %v5300_v38 = vcombine.low %v329_v1, %v339_v11  ;;  %v8902_v1 = vmov 0 }
  0x85   :  { %v8903_v1 = vsel %vm6971_vm7, 4294967295, %v8902_v1  ;;  %v1340_v11 = vsel %vm6971_vm7, %v1336_v53, %v6672_v34 }
  0x86   :  { %8904 = vst [vmem:[#allocation13_spill] sm:$0xff] %v8903_v1 }
  0x89   :  { %5315 = vmatmul.mubr.msk.bf16.gmra.mrb[24].mxu0 %vm467_vm4, %v5298_v16  ;;  %v5322_v16 = vcombine.low %v6637_v7, %v6659_v23 }
  0x8a   :  { %613 = vmatprep.mubr.bf16.mxu0 %v8833_v0 }
  0x91   :  { %5316 = vmatmul.mubr.msk.bf16.gmra.mrb[28].mxu0 %vm467_vm4, %v5299_v54  ;;  %v1341_v54 = vrot.slane %v6672_v34, 4  ;;  %v6995_v34 = vld [vmem:[%s8796_s0 + $0x64] sm:$0xf] }
  0x92   :  { %623 = vmatprep.mubr.bf16.mxu0 %v8833_v0 }
  0x93   :  { %v1345_v18 = vsel %vm6971_vm7, %v1341_v54, %v6715_v59 }
  0x94   :  { %v6983_v30 = vcombine.low %v1340_v11, %v1345_v18  ;;  %v5351_v11 = vrot.slane %v6659_v23, 9  ;;  %v960_v18 = vrot.slane %v6677_v35, 5 }
  0x99   :  { %5317 = vmatmul.mubr.msk.bf16.gmra.mrb[32].mxu0 %vm467_vm4, %v5300_v38  ;;  %v6990_v38 = vld [vmem:[%s8796_s0 + $0x60] sm:$0xf] }
  0x9a   :  { %816 = vmatprep.mubr.bf16.mxu0 %v8833_v0 }
  0xa1   :  { %5338 = vmatmul.mubr.msk.bf16.vlgmr.msra.gmra.mrb[0].mxu0 %vm467_vm4, %v5321_v46  ;;  %v7009_v46 = vld [vmem:[%s8796_s0 + $0x70] sm:$0xf] }
  0xa2   :  { %1130 = vmatpush1.bf16.msra.mxu0 %v6242_v13  ;;  %826 = vmatprep.mubr.bf16.mxu0 %v8833_v0  ;;  %v5330_v13 = vcombine.low %v6990_v38, %v6995_v34 }
  0xa3   :  { %5374 = vmatprep.subr.msk.bf16.mxu0 %vm504_vm1, %v6251_v20  ;;  %v5331_v20 = vcombine.low %v7004_v39, %v7009_v46 }
  0xa6   :  { %1132 = vmatpush1.bf16.msra.mxu0 %v1124_v43  ;;  %v7018_v43 = vld [vmem:[%s8796_s0 + $0x74] sm:$0xf] }
  0xa7   :  { %1594 = vmatprep.subr.bf16.mxu0 %v6261_v8  ;;  %v7023_v8 = vld [vmem:[%s8796_s0 + $0x78] sm:$0xf] }
  0xa9   :  { %5339 = vmatmul.mubr.msk.bf16.gmra.mrb[4].mxu0 %vm467_vm4, %v5322_v16  ;;  %v950_v16 = vrot.slane %v6632_v6, 5 }
  0xaa   :  { %836 = vmatprep.mubr.bf16.mxu0 %v8833_v0 }
  0xb1   :  { %5340 = vmatmul.mubr.msk.bf16.gmra.mrb[8].mxu0 %vm467_vm4, %v5323_v42  ;;  %v5332_v42 = vcombine.low %v7018_v43, %v7023_v8 }
  0xb2   :  { %846 = vmatprep.mubr.bf16.mxu0 %v8833_v0 }
  0xb9   :  { %5341 = vmatmul.mubr.msk.bf16.gmra.mrb[12].mxu0 %vm467_vm4, %v5324_v44  ;;  %v5350_v44 = vrot.slane %v6627_v5, 9  ;;  %v6259_v5 = vld [vmem:[#allocation2 + $0x60] ss:$8 sps:$4 sm:$0xff]  }
  0xba   :  { %856 = vmatprep.mubr.bf16.mxu0 %v8833_v0 }
  0xbb   :  { %v951_v6 = vsel %vm7031_vm10, %v5350_v44, %v950_v16 }
  0xc1   :  { %5342 = vmatmul.mubr.msk.bf16.gmra.mrb[16].mxu0 %vm467_vm4, %v5325_v24  ;;  %v952_v24 = vrot.slane %v950_v16, 4  ;;  %v961_v16 = vsel %vm7031_vm10, %v5351_v11, %v960_v18 }
  0xc2   :  { %866 = vmatprep.mubr.bf16.mxu0 %v8833_v0 }
  0xc9   :  { %5343 = vmatmul.mubr.msk.bf16.gmra.mrb[20].mxu0 %vm467_vm4, %v5326_v62  ;;  %v953_v62 = vrot.slane %v6637_v7, 5  ;;  %v956_v7 = vrot.slane %v6652_v19, 5  ;;  %v1363_v19 = vrot.slane %v190_v56, 6 }
  0xca   :  { %876 = vmatprep.mubr.bf16.mxu0 %v8833_v0 }
  0xcb   :  { %v955_v54 = vrot.slane %v953_v62, 4 }
  0xd1   :  { %5344 = vmatmul.mubr.msk.bf16.gmra.mrb[24].mxu0 %vm467_vm4, %v5327_v29  ;;  %v8905_v29 = vmov 0 }
  0xd2   :  { %886 = vmatprep.mubr.bf16.mxu0 %v8833_v0  ;;  %v8906_v29 = vsel %vm7031_vm10, 4294967295, %v8905_v29 }
  0xd3   :  { %8907 = vst [vmem:[#allocation14_spill] sm:$0xff] %v8906_v29 }
  0xd9   :  { %5345 = vmatmul.mubr.msk.bf16.gmra.mrb[28].mxu0 %vm467_vm4, %v5328_v36  ;;  %v954_v36 = vsel %vm7031_vm10, %v952_v24, %v953_v62  ;;  %v6267_v24 = vld [vmem:[#allocation2 + $0x84] ss:$8 sps:$4 sm:$0xff]  }
  0xda   :  { %896 = vmatprep.mubr.bf16.mxu0 %v8833_v0  ;;  %v5358_v53 = vcombine.low %v951_v6, %v954_v36  ;;  %v962_v6 = vrot.slane %v960_v18, 4  ;;  %v5352_v18 = vrot.slane %v6705_v52, 9 }
  0xe1   :  { %5346 = vmatmul.mubr.msk.bf16.gmra.mrb[32].mxu0 %vm467_vm4, %v5329_v21  ;;  %v6262_v21 = vld [vmem:[#allocation2 + $0x74] ss:$8 sps:$4 sm:$0x3f]  }
  0xe2   :  { %906 = vmatprep.mubr.bf16.mxu0 %v8833_v0 }
  0xe9   :  { %5347 = vmatmul.mubr.msk.bf16.gmra.mrb[36].mxu0 %vm467_vm4, %v5330_v13  ;;  %v6264_v13 = vld [vmem:[#allocation2 + $0x70] ss:$8 sps:$4 sm:$0x3f]  }
  0xea   :  { %916 = vmatprep.mubr.bf16.mxu0 %v8833_v0  ;;  %v1589_v44 = vsel %vm504_vm1, %v6264_v13, 0  ;;  %v973_v13 = vrot.slane %v6739_v15, 5 }
  0xf1   :  { %5348 = vmatmul.mubr.msk.bf16.gmra.mrb[40].mxu0 %vm467_vm4, %v5331_v20  ;;  %v957_v20 = vsel %vm7031_vm10, %v955_v54, %v956_v7  ;;  %v970_v7 = vrot.slane %v6711_v57, 5 }
  0xf2   :  { %926 = vmatprep.mubr.bf16.mxu0 %v8833_v0  ;;  %v5359_v62 = vcombine.low %v957_v20, %v961_v16 }
  0xf3   :  { %v971_v20 = vsel %vm7031_vm10, %v5352_v18, %v970_v7  ;;  %v986_v18 = vrot.slane %v6811_v22, 5 }
  0xf9   :  { %5349 = vmatmul.mubr.msk.bf16.gmra.mrb[44].mxu0 %vm467_vm4, %v5332_v42  ;;  %v963_v42 = vrot.slane %v6685_v41, 5 }
  0xfa   :  { %1161 = vmatprep.mubr.bf16.mxu0 %v8833_v0 }
  0xfb   :  { %v965_v36 = vrot.slane %v963_v42, 4 }
 0x101   :  { %5375 = vmatmul.mubr.msk.bf16.vlgmr.msra.gmra.mrb[0].mxu0 %vm467_vm4, %v5358_v53  ;;  %v966_v53 = vrot.slane %v6696_v47, 5 }
 0x102   :  { %1595 = vmatpush1.bf16.msra.mxu0 %v6259_v5  ;;  %1171 = vmatprep.mubr.bf16.mxu0 %v8833_v0  ;;  %v964_v5 = vsel %vm7031_vm10, %v962_v6, %v963_v42  ;;  %v980_v6 = vrot.slane %v6784_v63, 5 }
 0x103   :  { %5403 = vmatprep.subr.msk.bf16.mxu0 %vm504_vm1, %v6262_v21  ;;  %v967_v54 = vsel %vm7031_vm10, %v965_v36, %v966_v53  ;;  %v972_v21 = vrot.slane %v970_v7, 4 }
 0x104   :  { %v5360_v11 = vcombine.low %v964_v5, %v967_v54  ;;  %v983_v5 = vrot.slane %v6779_v58, 5  ;;  %v982_v7 = vrot.slane %v980_v6, 4 }
 0x105   :  { %v974_v16 = vsel %vm7031_vm10, %v972_v21, %v973_v13 }
 0x106   :  { %1597 = vmatpush1.bf16.msra.mxu0 %v1589_v44  ;;  %v5361_v42 = vcombine.low %v971_v20, %v974_v16  ;;  %v975_v44 = vrot.slane %v973_v13, 4  ;;  %v984_v21 = vsel %vm7031_vm10, %v982_v7, %v983_v5  ;;  %v990_v20 = vrot.slane %v6822_v45, 5 }
 0x107   :  { %1979 = vmatprep.subr.bf16.mxu0 %v6267_v24  ;;  %v976_v24 = vrot.slane %v6770_v48, 5  ;;  %v1000_v7 = vrot.slane %v6871_v60, 5 }
 0x109   :  { %5376 = vmatmul.mubr.msk.bf16.gmra.mrb[4].mxu0 %vm467_vm4, %v5359_v62  ;;  %v5353_v62 = vrot.slane %v6754_v33, 9  ;;  %v977_v36 = vsel %vm7031_vm10, %v975_v44, %v976_v24  ;;  %v992_v44 = vrot.slane %v990_v20, 4  ;;  %v993_v24 = vrot.slane %v6831_v55, 5 }
 0x10a   :  { %1181 = vmatprep.mubr.bf16.mxu0 %v8833_v0 }
 0x10b   :  { %v981_v53 = vsel %vm7031_vm10, %v5353_v62, %v980_v6  ;;  %v994_v6 = vsel %vm7031_vm10, %v992_v44, %v993_v24 }
 0x10c   :  { %v5362_v54 = vcombine.low %v977_v36, %v981_v53  ;;  %v995_v53 = vrot.slane %v993_v24, 4 }
 0x111   :  { %5377 = vmatmul.mubr.msk.bf16.gmra.mrb[8].mxu0 %vm467_vm4, %v5360_v11  ;;  %v985_v11 = vrot.slane %v983_v5, 4  ;;  %v996_v5 = vrot.slane %v6843_v14, 5 }
 0x112   :  { %1191 = vmatprep.mubr.bf16.mxu0 %v8833_v0 }
 0x113   :  { %v987_v13 = vsel %vm7031_vm10, %v985_v11, %v986_v18  ;;  %v997_v11 = vsel %vm7031_vm10, %v995_v53, %v996_v5  ;;  %v1013_v5 = vrot.slane %v7004_v39, 5 }
 0x114   :  { %v5363_v16 = vcombine.low %v984_v21, %v987_v13  ;;  %v1003_v21 = vrot.slane %v6879_v25, 5 }
 0x119   :  { %5378 = vmatmul.mubr.msk.bf16.gmra.mrb[12].mxu0 %vm467_vm4, %v5361_v42  ;;  %v5354_v42 = vrot.slane %v6793_v4, 9 }
 0x11a   :  { %1201 = vmatprep.mubr.bf16.mxu0 %v8833_v0 }
 0x11b   :  { %v991_v62 = vsel %vm7031_vm10, %v5354_v42, %v990_v20  ;;  %v1002_v20 = vrot.slane %v1000_v7, 4  ;;  %v1006_v42 = vrot.slane %v6898_v27, 5 }
 0x11c   :  { %v5364_v36 = vcombine.low %v991_v62, %v994_v6  ;;  %v1010_v62 = vrot.slane %v6995_v34, 5 }
 0x11d   :  { %v1004_v44 = vsel %vm7031_vm10, %v1002_v20, %v1003_v21  ;;  %v5357_v20 = vrot.slane %v7009_v46, 9 }
 0x11e   :  { %v1012_v53 = vrot.slane %v1010_v62, 4 }
 0x121   :  { %5379 = vmatmul.mubr.msk.bf16.gmra.mrb[16].mxu0 %vm467_vm4, %v5362_v54  ;;  %v5355_v54 = vrot.slane %v6848_v26, 9 }
 0x122   :  { %1211 = vmatprep.mubr.bf16.mxu0 %v8833_v0 }
 0x123   :  { %v1001_v18 = vsel %vm7031_vm10, %v5355_v54, %v1000_v7  ;;  %v1014_v7 = vsel %vm7031_vm10, %v1012_v53, %v1013_v5 }
 0x124   :  { %v5365_v13 = vcombine.low %v997_v11, %v1001_v18  ;;  %v7124_v11 = vld [vmem:[%s8796_s0 + $0x6c] sm:$0x3] }
 0x129   :  { %5380 = vmatmul.mubr.msk.bf16.gmra.mrb[20].mxu0 %vm467_vm4, %v5363_v16  ;;  %v1005_v16 = vrot.slane %v1003_v21, 4  ;;  %v1015_v21 = vrot.slane %v1013_v5, 4 }
 0x12a   :  { %1221 = vmatprep.mubr.bf16.mxu0 %v8833_v0 }
 0x12b   :  { %v1007_v24 = vsel %vm7031_vm10, %v1005_v16, %v1006_v42  ;;  %v1020_v16 = vrot.slane %v7018_v43, 5 }
 0x12c   :  { %v5366_v6 = vcombine.low %v1004_v44, %v1007_v24  ;;  %v1023_v24 = vrot.slane %v7023_v8, 5 }
 0x12d   :  { %v1021_v44 = vsel %vm7031_vm10, %v5357_v20, %v1020_v16  ;;  %v1353_v20 = vrot.slane %v171_v32, 5  ;;  %v1346_v32 = vrot.slane %v6715_v59, 4 }
 0x12e   :  { %v1025_v53 = vrot.slane %v1023_v24, 4 }
 0x131   :  { %5381 = vmatmul.mubr.msk.bf16.gmra.mrb[24].mxu0 %vm467_vm4, %v5364_v36  ;;  %v5356_v36 = vrot.slane %v6990_v38, 9 }
 0x132   :  { %1231 = vmatprep.mubr.bf16.mxu0 %v8833_v0 }
 0x133   :  { %v1011_v54 = vsel %vm7031_vm10, %v5356_v36, %v1010_v62  ;;  %v7139_v62 = vld [vmem:[%s8796_s0 + $0x7c] sm:$0x3]  ;;  %v1022_v36 = vrot.slane %v1020_v16, 4  ;;  %v1354_v16 = vrot.slane %v174_v37, 6  ;;  %v6265_v37 = vld [vmem:[#allocation2 + $0x80] ss:$8 sps:$4 sm:$0xff]  }
 0x134   :  { %v5367_v18 = vcombine.low %v1011_v54, %v1014_v7  ;;  %v1026_v5 = vrot.slane %v7139_v62, 5 }
 0x135   :  { %v1024_v54 = vsel %vm7031_vm10, %v1022_v36, %v1023_v24  ;;  %v1355_v24 = vor.u32 %v1354_v16, %v1353_v20  ;;  %v1358_v36 = vrot.slane %v180_v49, 6  ;;  %v6268_v49 = vld [vmem:[#allocation2 + $0x94] ss:$8 sps:$4 sm:$0x3f]   ;;  %v8908_v20 = vshrl.u32 %v6711_v57, 16 }
 0x136   :  { %v1027_v7 = vsel %vm7031_vm10, %v1025_v53, %v1026_v5 }
 0x137   :  { %v1356_v23 = vrot.slane %v1355_v24, 4  ;;  %v1377_v16 = vrot.slane %v8908_v20, 5  ;;  %v8915_v20 = vshrl.u32 %v6784_v63, 16 }
 0x139   :  { %5382 = vmatmul.mubr.msk.bf16.gmra.mrb[28].mxu0 %vm467_vm4, %v5365_v13  ;;  %v1016_v13 = vrot.slane %v7124_v11, 5 }
 0x13a   :  { %1241 = vmatprep.mubr.bf16.mxu0 %v8833_v0 }
 0x13b   :  { %v1017_v42 = vsel %vm7031_vm10, %v1015_v21, %v1016_v13  ;;  %v7151_v21 = vld [vmem:[%s8796_s0 + $0xc] sm:$0x3] }
 0x13c   :  { %v1347_v13 = vshrl.u32 %v7151_v21, 16 }
 0x141   :  { %5383 = vmatmul.mubr.msk.bf16.gmra.mrb[32].mxu0 %vm467_vm4, %v5366_v6  ;;  %v5368_v6 = vcombine.low %v1017_v42, %v1021_v44  ;;  %v1349_v42 = vrot.slane %v1347_v13, 5  ;;  %v1350_v44 = vrot.slane %v166_v31, 6  ;;  %v7174_v31 = vld [vmem:[%s8796_s0 + $0x1c] sm:$0x3]  ;;  %v1374_v13 = vrot.slane %v208_v10, 6 }
 0x142   :  { %1251 = vmatprep.mubr.bf16.mxu0 %v8833_v0  ;;  %v1367_v35 = vshrl.u32 %v7174_v31, 16 }
 0x143   :  { %v1351_v53 = vor.u32 %v1350_v44, %v1349_v42  ;;  %v8909_v42 = vshll.u32 %v6711_v57, 16 }
 0x145   :  { %v1352_v59 = vsel %vm6971_vm7, %v1346_v32, %v1351_v53  ;;  %v1378_v44 = vrot.slane %v8909_v42, 6  ;;  %v8910_v53 = vshrl.u32 %v6739_v15, 16  ;;  %v8916_v42 = vshll.u32 %v6784_v63, 16 }
 0x146   :  { %v8919_v63 = vshll.u32 %v6811_v22, 16 }
 0x147   :  { %v1379_v32 = vor.u32 %v1378_v44, %v1377_v16  ;;  %v1397_v16 = vrot.slane %v8915_v20, 5 }
 0x149   :  { %5384 = vmatmul.mubr.msk.bf16.gmra.mrb[36].mxu0 %vm467_vm4, %v5367_v18  ;;  %v5369_v18 = vcombine.low %v1024_v54, %v1027_v7  ;;  %v1362_v54 = vrot.slane %v194_v61, 5  ;;  %v1369_v61 = vrot.slane %v1367_v35, 5  ;;  %v1370_v7 = vrot.slane %v200_v3, 6 }
 0x14a   :  { %1261 = vmatprep.mubr.bf16.mxu0 %v8833_v0 }
 0x14b   :  { %v1364_v56 = vor.u32 %v1363_v19, %v1362_v54  ;;  %v1371_v3 = vor.u32 %v1370_v7, %v1369_v61  ;;  %v7209_v19 = vld [vmem:[%s8796_s0 + $0x2c] sm:$0x3] }
 0x14d   :  { %v1366_v47 = vrot.slane %v1364_v56, 4 }
 0x14f   :  { %v1372_v10 = vsel %vm6971_vm7, %v1366_v47, %v1371_v3  ;;  %v8918_v47 = vshll.u32 %v6779_v58, 16 }
 0x151   :  { %5385 = vmatmul.mubr.msk.bf16.gmra.mrb[40].mxu0 %vm467_vm4, %v5368_v6  ;;  %v1357_v6 = vrot.slane %v184_v51, 5  ;;  %v6270_v51 = vld [vmem:[#allocation2 + $0x90] ss:$8 sps:$4 sm:$0x3f]   ;;  %v1403_v3 = vrot.slane %v8918_v47, 6 }
 0x152   :  { %1271 = vmatprep.mubr.bf16.mxu0 %v8833_v0 }
 0x153   :  { %v1359_v5 = vor.u32 %v1358_v36, %v1357_v6 }
 0x155   :  { %v1360_v41 = vsel %vm6971_vm7, %v1356_v23, %v1359_v5  ;;  %v1361_v6 = vrot.slane %v1359_v5, 4  ;;  %v1382_v23 = vrot.slane %v8910_v53, 5  ;;  %v1381_v5 = vrot.slane %v1379_v32, 4 }
 0x156   :  { %v5388_v24 = vcombine.low %v1352_v59, %v1360_v41  ;;  %v8913_v59 = vshll.u32 %v6754_v33, 16 }
 0x157   :  { %v1365_v57 = vsel %vm6971_vm7, %v1361_v6, %v1364_v56 }
 0x158   :  { %v5389_v35 = vcombine.low %v1365_v57, %v1372_v10  ;;  %v1394_v41 = vrot.slane %v8913_v59, 6  ;;  %v1410_v57 = vrot.slane %v8919_v63, 6  ;;  %v341_v59 = vshrl.u32 %v6990_v38, 16 }
 0x159   :  { %5386 = vmatmul.mubr.msk.bf16.gmra.mrb[44].mxu0 %vm467_vm4, %v5369_v18  ;;  %v1974_v18 = vsel %vm504_vm1, %v6270_v51, 0 }
 0x15a   :  { %1626 = vmatprep.mubr.bf16.mxu0 %v8833_v0 }
 0x161   :  { %5404 = vmatmul.mubr.msk.bf16.vlgmr.msra.gmra.mrb[0].mxu0 %vm467_vm4, %v6983_v30  ;;  %v1373_v30 = vrot.slane %v205_v9, 5  ;;  %v8911_v9 = vshll.u32 %v6739_v15, 16  ;;  %v1387_v15 = vshrl.u32 %v7209_v19, 16 }
 0x162   :  { %1980 = vmatpush1.bf16.msra.mxu0 %v6265_v37  ;;  %1636 = vmatprep.mubr.bf16.mxu0 %v8833_v0 }
 0x163   :  { %5440 = vmatprep.subr.msk.bf16.mxu0 %vm504_vm1, %v6268_v49  ;;  %v1375_v36 = vor.u32 %v1374_v13, %v1373_v30  ;;  %v1383_v52 = vrot.slane %v8911_v9, 6  ;;  %v8912_v49 = vshrl.u32 %v6754_v33, 16  ;;  %v1389_v7 = vrot.slane %v1387_v15, 5 }
 0x164   :  { %v1398_v33 = vrot.slane %v8916_v42, 6  ;;  %vm2817_vm1 = vcmask 187392  }
 0x165   :  { %v1376_v37 = vrot.slane %v1375_v36, 4  ;;  %v1384_v54 = vor.u32 %v1383_v52, %v1382_v23  ;;  %v1393_v51 = vrot.slane %v8912_v49, 5  ;;  %v1407_v36 = vshrl.u32 %v6811_v22, 16 }
 0x166   :  { %1982 = vmatpush1.bf16.msra.mxu0 %v1974_v18  ;;  %v8914_v18 = vshll.u32 %v6770_v48, 16  ;;  %v1399_v23 = vor.u32 %v1398_v33, %v1397_v16  ;;  %v8923_v49 = vshll.u32 %v6822_v45, 16 }
 0x167   :  { %v1380_v56 = vsel %vm6971_vm7, %v1376_v37, %v1379_v32  ;;  %v1385_v61 = vsel %vm6971_vm7, %v1381_v5, %v1384_v54  ;;  %v1395_v13 = vor.u32 %v1394_v41, %v1393_v51  ;;  %v1386_v48 = vrot.slane %v1384_v54, 4 }
 0x168   :  { %v1390_v30 = vrot.slane %v8914_v18, 6  ;;  %v5390_v44 = vcombine.low %v1380_v56, %v1385_v61  ;;  %v1409_v52 = vrot.slane %v1407_v36, 5  ;;  %v8920_v37 = vshrl.u32 %v6793_v4, 16 }
 0x169   :  { %5405 = vmatmul.mubr.msk.bf16.gmra.mrb[4].mxu0 %vm467_vm4, %v5388_v24  ;;  %v8917_v24 = vshrl.u32 %v6779_v58, 16  ;;  %v1396_v53 = vrot.slane %v1395_v13, 4  ;;  %v8921_v54 = vshll.u32 %v6793_v4, 16  ;;  %v1418_v51 = vrot.slane %v8923_v49, 6 }
 0x16a   :  { %1646 = vmatprep.mubr.bf16.mxu0 %v8833_v0  ;;  %v1391_v32 = vor.u32 %v1390_v30, %v1389_v7  ;;  %v1413_v5 = vrot.slane %v8920_v37, 5  ;;  %v344_v41 = vshll.u32 %v6990_v38, 16  ;;  %v350_v56 = vshll.u32 %v6995_v34, 16 }
 0x16b   :  { %v1402_v6 = vrot.slane %v8917_v24, 5  ;;  %v1400_v58 = vsel %vm6971_vm7, %v1396_v53, %v1399_v23  ;;  %v1414_v15 = vrot.slane %v8921_v54, 6  ;;  %v354_v61 = vshrl.u32 %v6995_v34, 16 }
 0x16c   :  { %v1392_v10 = vsel %vm6971_vm7, %v1386_v48, %v1391_v32  ;;  %v1401_v18 = vrot.slane %v1399_v23, 4  ;;  %v1411_v13 = vor.u32 %v1410_v57, %v1409_v52  ;;  %v343_v4 = vrot.slane %v341_v59, 4 }
 0x16d   :  { %v1404_v9 = vor.u32 %v1403_v3, %v1402_v6  ;;  %v5391_v7 = vcombine.low %v1392_v10, %v1400_v58  ;;  %v346_v20 = vrot.slane %v344_v41, 5  ;;  %v356_v16 = vrot.slane %v354_v61, 4 }
 0x16e   :  { %v1415_v42 = vor.u32 %v1414_v15, %v1413_v5  ;;  %v8925_v6 = vshll.u32 %v6831_v55, 16  ;;  %v360_v3 = vshll.u32 %v7004_v39, 16  ;;  %v364_v58 = vshrl.u32 %v7004_v39, 16  ;;  %v7284_v15 = vld [vmem:[%s8796_s0 + $0x4c] sm:$0x3] }
 0x16f   :  { %v1406_v30 = vrot.slane %v1404_v9, 4  ;;  %v347_v36 = vor.u32 %v346_v20, %v343_v4  ;;  %v1405_v32 = vsel %vm6971_vm7, %v1401_v18, %v1404_v9  ;;  %v375_v37 = vshrl.u32 %v7009_v46, 16 }
 0x170   :  { %v1423_v47 = vrot.slane %v8925_v6, 6  ;;  %v362_v63 = vrot.slane %v360_v3, 5  ;;  %v378_v9 = vshll.u32 %v7009_v46, 16  ;;  %v1458_v27 = vrot.slane %v350_v56, 6 }
 0x171   :  { %5406 = vmatmul.mubr.msk.bf16.gmra.mrb[8].mxu0 %vm467_vm4, %v5389_v35  ;;  %v8922_v35 = vshrl.u32 %v6822_v45, 16  ;;  %v352_v45 = vrot.slane %v350_v56, 5  ;;  %v1412_v53 = vsel %vm6971_vm7, %v1406_v30, %v1411_v13  ;;  %v348_v23 = vrot.slane %v347_v36, 4 }
 0x172   :  { %1656 = vmatprep.mubr.bf16.mxu0 %v8833_v0  ;;  %v5392_v30 = vcombine.low %v1405_v32, %v1412_v53  ;;  %v366_v13 = vrot.slane %v364_v58, 4  ;;  %v377_v4 = vrot.slane %v375_v37, 4  ;;  %v380_v20 = vrot.slane %v378_v9, 5 }
 0x173   :  { %v1417_v22 = vrot.slane %v8922_v35, 5  ;;  %v357_v48 = vor.u32 %v356_v16, %v352_v45  ;;  %v353_v5 = vsel %vm6664_vm3, %v348_v23, %v352_v45  ;;  %v1427_v35 = vshrl.u32 %v7284_v15, 16 }
 0x174   :  { %v370_v16 = vshll.u32 %v7124_v11, 16  ;;  %v1463_v56 = vrot.slane %v360_v3, 6 }
 0x175   :  { %v1419_v33 = vor.u32 %v1418_v51, %v1417_v22  ;;  %v358_v52 = vrot.slane %v357_v48, 4  ;;  %v8926_v22 = vshrl.u32 %v6848_v26, 16  ;;  %v8927_v51 = vshll.u32 %v6848_v26, 16 }
 0x176   :  { %v384_v26 = vshll.u32 %v7018_v43, 16  ;;  %v1429_v6 = vrot.slane %v1427_v35, 5  ;;  %v372_v32 = vrot.slane %v370_v16, 5 }
 0x177   :  { %v1421_v57 = vrot.slane %v1419_v33, 4  ;;  %v363_v54 = vsel %vm6664_vm3, %v358_v52, %v362_v63  ;;  %v1433_v49 = vrot.slane %v8926_v22, 5  ;;  %v1437_v52 = vrot.slane %v320_v17, 5 }
 0x178   :  { %v5301_v18 = vcombine.low %v353_v5, %v363_v54  ;;  %v386_v23 = vrot.slane %v384_v26, 5 }
 0x179   :  { %5407 = vmatmul.mubr.msk.bf16.gmra.mrb[12].mxu0 %vm467_vm4, %v5390_v44  ;;  %v8924_v44 = vshrl.u32 %v6831_v55, 16  ;;  %v1416_v55 = vrot.slane %v1415_v42, 4  ;;  %v367_v42 = vor.u32 %v366_v13, %v362_v63  ;;  %v388_v63 = vshrl.u32 %v7018_v43, 16 }
 0x17a   :  { %1666 = vmatprep.mubr.bf16.mxu0 %v8833_v0  ;;  %5318 = vmatmul.mubr.msk.bf16.vlgmr.msra.gmra.mrb[0].mxu1 %vm467_vm4, %v5301_v18  ;;  %v1443_v13 = vrot.slane %v326_v40, 6 }
 0x17b   :  { %v1422_v24 = vrot.slane %v8924_v44, 5  ;;  %v1420_v45 = vsel %vm6971_vm7, %v1416_v55, %v1419_v33  ;;  %643 = vmatprep.mubr.bf16.mxu1 %v8833_v0  ;;  %v381_v44 = vor.u32 %v380_v20, %v377_v4  ;;  %v368_v33 = vrot.slane %v367_v42, 4 }
 0x17c   :  { %v394_v55 = vshll.u32 %v7023_v8, 16  ;;  %v390_v60 = vrot.slane %v388_v63, 4  ;;  %v404_v20 = vshll.u32 %v7139_v62, 16  ;;  %v1477_v3 = vrot.slane %v388_v63, 5 }
 0x17d   :  { %v1424_v10 = vor.u32 %v1423_v47, %v1422_v24  ;;  %v8928_v47 = vshll.u32 %v6843_v14, 16  ;;  %v382_v53 = vrot.slane %v381_v44, 4  ;;  %v1438_v14 = vrot.slane %v316_v2, 6 }
 0x17e   :  { %v373_v5 = vsel %vm6664_vm3, %v368_v33, %v372_v32  ;;  %v396_v2 = vrot.slane %v394_v55, 5  ;;  %v406_v44 = vrot.slane %v404_v20, 5 }
 0x17f   :  { %v1425_v24 = vsel %vm6971_vm7, %v1421_v57, %v1424_v10  ;;  %v1430_v36 = vrot.slane %v8928_v47, 6  ;;  %v398_v57 = vshrl.u32 %v7023_v8, 16  ;;  %v387_v54 = vsel %vm6664_vm3, %v382_v53, %v386_v23 }
 0x180   :  { %v5393_v35 = vcombine.low %v1420_v45, %v1425_v24  ;;  %v1426_v22 = vrot.slane %v1424_v10, 4  ;;  %v1439_v18 = vor.u32 %v1438_v14, %v1437_v52  ;;  %v7337_v10 = vld [vmem:[%s8796_s0 + $0x5c] sm:$0x3]  ;;  %v391_v45 = vor.u32 %v390_v60, %v386_v23 }
 0x181   :  { %5408 = vmatmul.mubr.msk.bf16.gmra.mrb[16].mxu0 %vm467_vm4, %v5391_v7  ;;  %v1434_v7 = vrot.slane %v8927_v51, 6  ;;  %v5302_v51 = vcombine.low %v373_v5, %v387_v54  ;;  %v1447_v4 = vshrl.u32 %v7337_v10, 16  ;;  %v1453_v52 = vrot.slane %v341_v59, 5 }
 0x182   :  { %1676 = vmatprep.mubr.bf16.mxu0 %v8833_v0  ;;  %v392_v40 = vrot.slane %v391_v45, 4  ;;  %v1441_v23 = vrot.slane %v1439_v18, 4  ;;  %v1454_v14 = vrot.slane %v344_v41, 6  ;;  %v1482_v63 = vrot.slane %v398_v57, 5 }
 0x183   :  { %v1435_v48 = vor.u32 %v1434_v7, %v1433_v49  ;;  %v1431_v49 = vor.u32 %v1430_v36, %v1429_v6  ;;  %v400_v7 = vrot.slane %v398_v57, 4  ;;  %5319 = vmatmul.mubr.msk.bf16.gmra.mrb[4].mxu1 %vm467_vm4, %v5302_v51  ;;  %v1449_v47 = vrot.slane %v1447_v4, 5 }
 0x184   :  { %653 = vmatprep.mubr.bf16.mxu1 %v8833_v0  ;;  %v1450_v36 = vrot.slane %v336_v12, 6  ;;  %v1457_v12 = vrot.slane %v354_v61, 5  ;;  %v1462_v61 = vrot.slane %v364_v58, 5  ;;  %v1470_v58 = vrot.slane %v370_v16, 6 }
 0x185   :  { %v1436_v17 = vrot.slane %v1435_v48, 4  ;;  %v401_v42 = vor.u32 %v400_v7, %v396_v2  ;;  %v1432_v25 = vsel %vm6971_vm7, %v1426_v22, %v1431_v49  ;;  %v397_v48 = vsel %vm6664_vm3, %v392_v40, %v396_v2 }
 0x186   :  { %v1451_v54 = vor.u32 %v1450_v36, %v1449_v47  ;;  %v1459_v22 = vor.u32 %v1458_v27, %v1457_v12  ;;  %v1464_v2 = vor.u32 %v1463_v56, %v1462_v61  ;;  %v1473_v7 = vrot.slane %v375_v37, 5  ;;  %v6368_v12 = vld [vmem:[%s8796_s0 + $0x8] sm:$0xf] }
 0x187   :  { %v1440_v24 = vsel %vm6971_vm7, %v1436_v17, %v1439_v18  ;;  %v1467_v17 = vshrl.u32 %v7124_v11, 16  ;;  %v1474_v18 = vrot.slane %v378_v9, 6  ;;  %v1490_v57 = vrot.slane %v404_v20, 6 }
 0x188   :  { %v5394_v53 = vcombine.low %v1432_v25, %v1440_v24  ;;  %v1461_v60 = vrot.slane %v1459_v22, 4  ;;  %v1803_v27 = vrot.slane %v6368_v12, 6  ;;  %v1806_v56 = vrot.slane %v7151_v21, 6  ;;  %v6379_v12 = vld [vmem:[%s8796_s0 + $0x44] sm:$0xf] }
 0x189   :  { %5409 = vmatmul.mubr.msk.bf16.gmra.mrb[20].mxu0 %vm467_vm4, %v5392_v30  ;;  %v1442_v30 = vrot.slane %v330_v50, 5  ;;  %v402_v50 = vrot.slane %v401_v42, 4  ;;  %v1475_v4 = vor.u32 %v1474_v18, %v1473_v7  ;;  %v1466_v42 = vrot.slane %v1464_v2, 4  ;;  %v6371_v7 = vld [vmem:[%s8796_s0 + $0x18] sm:$0xf] }
 0x18a   :  { %1686 = vmatprep.mubr.bf16.mxu0 %v8833_v0  ;;  %v1465_v9 = vsel %vm6971_vm7, %v1461_v60, %v1464_v2  ;;  %v1805_v61 = vrot.slane %v1803_v27, 4  ;;  %v1813_v18 = vrot.slane %v6371_v7, 6  ;;  %v6382_v7 = vld [vmem:[%s8796_s0 + $0x50] sm:$0xf] }
 0x18b   :  { %v1444_v6 = vor.u32 %v1443_v13, %v1442_v30  ;;  %v407_v33 = vsel %vm6664_vm3, %v402_v50, %v406_v44  ;;  %v1469_v30 = vrot.slane %v1467_v17, 5  ;;  %v1478_v13 = vrot.slane %v384_v26, 6  ;;  %v6370_v17 = vld [vmem:[%s8796_s0 + $0x14] sm:$0xf] }
 0x18c   :  { %v5303_v32 = vcombine.low %v397_v48, %v407_v33  ;;  %v1476_v16 = vrot.slane %v1475_v4, 4  ;;  %v1483_v26 = vrot.slane %v394_v55, 6  ;;  %v1487_v50 = vshrl.u32 %v7139_v62, 16  ;;  %v6372_v4 = vld [vmem:[%s8796_s0 + $0x24] sm:$0xf] }
 0x18d   :  { %v1446_v5 = vrot.slane %v1444_v6, 4  ;;  %v1445_v59 = vsel %vm6971_vm7, %v1441_v23, %v1444_v6  ;;  %v1471_v25 = vor.u32 %v1470_v58, %v1469_v30  ;;  %v1479_v40 = vor.u32 %v1478_v13, %v1477_v3  ;;  %v6366_v23 = vld [vmem:[%s8796_s0 + $0x4] sm:$0xf] }
 0x18e   :  { %5320 = vmatmul.mubr.msk.bf16.gmra.mrb[8].mxu1 %vm467_vm4, %v5303_v32  ;;  %v1484_v6 = vor.u32 %v1483_v26, %v1482_v63  ;;  %v1489_v47 = vrot.slane %v1487_v50, 5  ;;  %v1810_v60 = vrot.slane %v6370_v17, 6  ;;  %v1807_v2 = vsel %vm7422_vm13, %v1805_v61, %v1806_v56  ;;  %v6381_v56 = vld [vmem:[%s8796_s0 + $0x48] sm:$0xf] }
 0x18f   :  { %2863 = vmatprep.mubr.bf16.mxu1 %v8833_v0  ;;  %v1452_v41 = vsel %vm6971_vm7, %v1446_v5, %v1451_v54  ;;  %v1472_v44 = vsel %vm6971_vm7, %v1466_v42, %v1471_v25  ;;  %v1480_v24 = vsel %vm6971_vm7, %v1476_v16, %v1479_v40  ;;  %v1481_v48 = vrot.slane %v1479_v40, 4  ;;  %v6374_v16 = vld [vmem:[%s8796_s0 + $0x28] sm:$0xf] }
 0x190   :  { %v5395_v49 = vcombine.low %v1445_v59, %v1452_v41  ;;  %v5397_v36 = vcombine.low %v1472_v44, %v1480_v24  ;;  %v1486_v55 = vrot.slane %v1484_v6, 4  ;;  %v1491_v33 = vor.u32 %v1490_v57, %v1489_v47  ;;  %v6375_v47 = vld [vmem:[%s8796_s0 + $0x30] sm:$0xf] }
 0x191   :  { %5410 = vmatmul.mubr.msk.bf16.gmra.mrb[24].mxu0 %vm467_vm4, %v5393_v35  ;;  %v1455_v35 = vor.u32 %v1454_v14, %v1453_v52  ;;  %v1485_v32 = vsel %vm6971_vm7, %v1481_v48, %v1484_v6  ;;  %v1800_v52 = vrot.slane %v6366_v23, 6  ;;  %v6367_v14 = vld [vmem:[%s8796_s0] sm:$0xf]  ;;  %v8929_v59 = vmov 0 }
 0x192   :  { %1696 = vmatprep.mubr.bf16.mxu0 %v8833_v0  ;;  %v5416_v5 = vrot.slane %v6367_v14, 10  ;;  %v8930_v59 = vsel %vm7422_vm13, 4294967295, %v8929_v59  ;;  %v1812_v58 = vrot.slane %v1810_v60, 4  ;;  %v1815_v3 = vrot.slane %v1813_v18, 4 }
 0x193   :  { %v1456_v51 = vrot.slane %v1455_v35, 4  ;;  %v1802_v54 = vrot.slane %v1800_v52, 4  ;;  %8931 = vst [vmem:[#allocation15_spill] sm:$0xff] %v8930_v59  ;;  %v1816_v13 = vrot.slane %v7174_v31, 6  ;;  %v6373_v31 = vld [vmem:[%s8796_s0 + $0x20] sm:$0xf] }
 0x194   :  { %v1801_v35 = vsel %vm7422_vm13, %v5416_v5, %v1800_v52  ;;  %v5418_v25 = vrot.slane %v6373_v31, 10  ;;  %v1823_v63 = vrot.slane %v6374_v16, 6  ;;  %v1826_v6 = vrot.slane %v7209_v19, 6 }
 0x195   :  { %v1460_v37 = vsel %vm6971_vm7, %v1456_v51, %v1459_v22  ;;  %v1804_v41 = vsel %vm7422_vm13, %v1802_v54, %v1803_v27  ;;  %v5419_v57 = vrot.slane %v6375_v47, 10  ;;  %v1840_v27 = vrot.slane %v6379_v12, 6 }
 0x196   :  { %v5396_v45 = vcombine.low %v1460_v37, %v1465_v9  ;;  %v5424_v22 = vcombine.low %v1801_v35, %v1804_v41  ;;  %v1814_v37 = vsel %vm7422_vm13, %v1812_v58, %v1813_v18  ;;  %v1817_v9 = vsel %vm7422_vm13, %v1815_v3, %v1816_v13  ;;  %v6380_v41 = vld [vmem:[%s8796_s0 + $0x40] sm:$0xf]  ;;  %v6384_v13 = vld [vmem:[%s8796_s0 + $0x58] sm:$0xf] }
 0x197   :  { %v5426_v42 = vcombine.low %v1814_v37, %v1817_v9  ;;  %v1825_v24 = vrot.slane %v1823_v63, 4  ;;  %v1842_v61 = vrot.slane %v1840_v27, 4  ;;  %v5421_v18 = vrot.slane %v6382_v7, 10 }
 0x198   :  { %v1853_v37 = vrot.slane %v6384_v13, 6  ;;  %v5423_v47 = vrot.slane %v7009_v46, 10 }
 0x199   :  { %5411 = vmatmul.mubr.msk.bf16.gmra.mrb[28].mxu0 %vm467_vm4, %v5394_v53  ;;  %v1492_v53 = vsel %vm6971_vm7, %v1486_v55, %v1491_v33  ;;  %v1827_v55 = vsel %vm7422_vm13, %v1825_v24, %v1826_v6  ;;  %v6377_v33 = vld [vmem:[%s8796_s0 + $0x38] sm:$0xf] }
 0x19a   :  { %1706 = vmatprep.mubr.bf16.mxu0 %v8833_v0  ;;  %v5398_v20 = vcombine.low %v1485_v32, %v1492_v53  ;;  %v1833_v32 = vrot.slane %v6377_v33, 6 }
 0x19c   :  { %v1835_v52 = vrot.slane %v1833_v32, 4 }
 0x1a1   :  { %5412 = vmatmul.mubr.msk.bf16.gmra.mrb[32].mxu0 %vm467_vm4, %v5395_v49  ;;  %v6369_v49 = vld [vmem:[%s8796_s0 + $0x10] sm:$0xf] }
 0x1a2   :  { %1716 = vmatprep.mubr.bf16.mxu0 %v8833_v0  ;;  %v5417_v51 = vrot.slane %v6369_v49, 10  ;;  %v1843_v49 = vrot.slane %v6381_v56, 6 }
 0x1a4   :  { %v1811_v21 = vsel %vm7422_vm13, %v5417_v51, %v1810_v60  ;;  %v1844_v17 = vsel %vm7422_vm13, %v1842_v61, %v1843_v49  ;;  %v2180_v61 = vld [vmem:[%s8798_s2] sm:$0x3]  ;;  %s6488_s2 = smov 122  }
 0x1a5   :  { %v5425_v30 = vcombine.low %v1807_v2, %v1811_v21  ;;  %v1845_v2 = vrot.slane %v1843_v49, 4  ;;  %v1846_v21 = vrot.slane %v7284_v15, 6 }
 0x1a7   :  { %v1847_v3 = vsel %vm7422_vm13, %v1845_v2, %v1846_v21 }
 0x1a9   :  { %5413 = vmatmul.mubr.msk.bf16.gmra.mrb[36].mxu0 %vm467_vm4, %v5396_v45  ;;  %v1820_v45 = vrot.slane %v6372_v4, 6 }
 0x1aa   :  { %1726 = vmatprep.mubr.bf16.mxu0 %v8833_v0 }
 0x1ab   :  { %v1822_v40 = vrot.slane %v1820_v45, 4  ;;  %v1821_v26 = vsel %vm7422_vm13, %v5418_v25, %v1820_v45  ;;  %v1855_v45 = vrot.slane %v1853_v37, 4 }
 0x1ad   :  { %v1824_v50 = vsel %vm7422_vm13, %v1822_v40, %v1823_v63  ;;  %v1860_v40 = vrot.slane %v6995_v34, 6  ;;  %v5422_v63 = vrot.slane %v6990_v38, 10  ;;  %v1866_v34 = vrot.slane %v7124_v11, 6 }
 0x1ae   :  { %v5427_v44 = vcombine.low %v1821_v26, %v1824_v50  ;;  %v1863_v50 = vrot.slane %v7004_v39, 6  ;;  %v1870_v38 = vrot.slane %v7018_v43, 6  ;;  %v1876_v11 = vrot.slane %v7139_v62, 6 }
 0x1af   :  { %v1862_v26 = vrot.slane %v1860_v40, 4 }
 0x1b0   :  { %v1865_v6 = vrot.slane %v1863_v50, 4 }
 0x1b1   :  { %5414 = vmatmul.mubr.msk.bf16.gmra.mrb[40].mxu0 %vm467_vm4, %v5397_v36  ;;  %v6376_v36 = vld [vmem:[%s8796_s0 + $0x34] sm:$0xf] }
 0x1b2   :  { %1736 = vmatprep.mubr.bf16.mxu0 %v8833_v0  ;;  %v1830_v48 = vrot.slane %v6376_v36, 6  ;;  %v1867_v39 = vsel %vm7422_vm13, %v1865_v6, %v1866_v34  ;;  %v1873_v36 = vrot.slane %v7023_v8, 6 }
 0x1b4   :  { %v1831_v19 = vsel %vm7422_vm13, %v5419_v57, %v1830_v48  ;;  %v1832_v23 = vrot.slane %v1830_v48, 4  ;;  %v1871_v57 = vsel %vm7422_vm13, %v5423_v47, %v1870_v38 }
 0x1b5   :  { %v5428_v53 = vcombine.low %v1827_v55, %v1831_v19  ;;  %v5434_v48 = vcombine.low %v1867_v39, %v1871_v57  ;;  %v1872_v55 = vrot.slane %v1870_v38, 4  ;;  %v1875_v19 = vrot.slane %v1873_v36, 4 }
 0x1b6   :  { %v1834_v5 = vsel %vm7422_vm13, %v1832_v23, %v1833_v32 }
 0x1b7   :  { %v1874_v46 = vsel %vm7422_vm13, %v1872_v55, %v1873_v36  ;;  %v1877_v43 = vsel %vm7422_vm13, %v1875_v19, %v1876_v11 }
 0x1b8   :  { %v5435_v33 = vcombine.low %v1874_v46, %v1877_v43 }
 0x1b9   :  { %5415 = vmatmul.mubr.msk.bf16.gmra.mrb[44].mxu0 %vm467_vm4, %v5398_v20  ;;  %v6378_v20 = vld [vmem:[%s8796_s0 + $0x3c] sm:$0x3] }
 0x1ba   :  { %2011 = vmatprep.mubr.bf16.mxu0 %v8833_v0  ;;  %v1836_v14 = vrot.slane %v6378_v20, 6 }
 0x1bc   :  { %v1837_v54 = vsel %vm7422_vm13, %v1835_v52, %v1836_v14 }
 0x1bd   :  { %v5429_v35 = vcombine.low %v1834_v5, %v1837_v54 }
 0x1c1   :  { %5441 = vmatmul.mubr.msk.bf16.vlgmr.msra.gmra.mrb[0].mxu0 %vm467_vm4, %v5424_v22  ;;  %v5420_v22 = vrot.slane %v6380_v41, 10 }
 0x1c2   :  { %2021 = vmatprep.mubr.bf16.mxu0 %v8833_v0 }
 0x1c3   :  { %v1841_v51 = vsel %vm7422_vm13, %v5420_v22, %v1840_v27 }
 0x1c4   :  { %v5430_v60 = vcombine.low %v1841_v51, %v1844_v17 }
 0x1c9   :  { %5442 = vmatmul.mubr.msk.bf16.gmra.mrb[4].mxu0 %vm467_vm4, %v5425_v30  ;;  %v6383_v30 = vld [vmem:[%s8796_s0 + $0x54] sm:$0xf] }
 0x1ca   :  { %2031 = vmatprep.mubr.bf16.mxu0 %v8833_v0  ;;  %v1850_v58 = vrot.slane %v6383_v30, 6 }
 0x1cc   :  { %v1851_v15 = vsel %vm7422_vm13, %v5421_v18, %v1850_v58  ;;  %v1852_v4 = vrot.slane %v1850_v58, 4 }
 0x1cd   :  { %v5431_v9 = vcombine.low %v1847_v3, %v1851_v15 }
 0x1ce   :  { %v1854_v31 = vsel %vm7422_vm13, %v1852_v4, %v1853_v37 }
 0x1d1   :  { %5443 = vmatmul.mubr.msk.bf16.gmra.mrb[8].mxu0 %vm467_vm4, %v5426_v42  ;;  %v1856_v42 = vrot.slane %v7337_v10, 6  ;;  %v1861_v10 = vsel %vm7422_vm13, %v5422_v63, %v1860_v40 }
 0x1d2   :  { %2041 = vmatprep.mubr.bf16.mxu0 %v8833_v0 }
 0x1d3   :  { %v1857_v25 = vsel %vm7422_vm13, %v1855_v45, %v1856_v42 }
 0x1d4   :  { %v5432_v16 = vcombine.low %v1854_v31, %v1857_v25 }
 0x1d9   :  { %5444 = vmatmul.mubr.msk.bf16.gmra.mrb[12].mxu0 %vm467_vm4, %v5427_v44  ;;  %v1864_v44 = vsel %vm7422_vm13, %v1862_v26, %v1863_v50 }
 0x1da   :  { %2051 = vmatprep.mubr.bf16.mxu0 %v8833_v0  ;;  %v5433_v24 = vcombine.low %v1861_v10, %v1864_v44 }
 0x1e1   :  { %5445 = vmatmul.mubr.msk.bf16.gmra.mrb[16].mxu0 %vm467_vm4, %v5428_v53 }
 0x1e2   :  { %2061 = vmatprep.mubr.bf16.mxu0 %v8833_v0 }
 0x1e9   :  { %5446 = vmatmul.mubr.msk.bf16.gmra.mrb[20].mxu0 %vm467_vm4, %v5429_v35  ;;  %v2182_v35 = vlaneseq }
 0x1ea   :  { %2071 = vmatprep.mubr.bf16.mxu0 %v8833_v0 }
 0x1eb   :  { %v2183_v41 = vshrl.u32 %v2182_v35, 7 }
 0x1ed   :  { %v2184_v22 = vsub.s32 0, %v2183_v41  ;;  %v2188_v56 = vsub.s32 1, %v2183_v41 }
 0x1ef   :  { %v7587_v49 = vrot.slane %v2180_v61, %v2184_v22  ;;  %v7589_v51 = vrot.slane %v2180_v61, %v2188_v56 }
 0x1f1   :  { %5447 = vmatmul.mubr.msk.bf16.gmra.mrb[24].mxu0 %vm467_vm4, %v5430_v60 }
 0x1f2   :  { %2081 = vmatprep.mubr.bf16.mxu0 %v8833_v0 }
 0x1f9   :  { %5448 = vmatmul.mubr.msk.bf16.gmra.mrb[28].mxu0 %vm467_vm4, %v5431_v9 }
 0x1fa   :  { %2091 = vmatprep.mubr.bf16.mxu0 %v8833_v0 }
 0x201   :  { %5449 = vmatmul.mubr.msk.bf16.gmra.mrb[32].mxu0 %vm467_vm4, %v5432_v16 }
 0x202   :  { %2101 = vmatprep.mubr.bf16.mxu0 %v8833_v0 }
 0x209   :  { %5450 = vmatmul.mubr.msk.bf16.gmra.mrb[36].mxu0 %vm467_vm4, %v5433_v24 }
 0x20a   :  { %2111 = vmatprep.mubr.bf16.mxu0 %v8833_v0 }
 0x211   :  { %5451 = vmatmul.mubr.msk.bf16.gmra.mrb[40].mxu0 %vm467_vm4, %v5434_v48 }
 0x212   :  { %2121 = vmatprep.mubr.bf16.mxu0 %v8833_v0 }
 0x219   :  { %5452 = vmatmul.mubr.msk.bf16.gmra.mrb[44].mxu0 %vm467_vm4, %v5435_v33  ;;  %vm3527_vm4 = vcmask 80896  }
 0x24d   :  { %v7560_v32 = vpop.f32.mrb[0].mxu1 }
 0x24e   :  { %v7562_v8 = vpop.f32.mrb[1].mxu1 }
 0x24f   :  { %v7564_v53 = vpop.f32.mrb[2].mxu1 }
 0x250   :  { %v7566_v62 = vpop.f32.mrb[3].mxu1 }
 0x256   :  { %v7568_v23 = vpop.f32.mrb[4].mxu1 }
 0x257   :  { %v7570_v52 = vpop.f32.mrb[5].mxu1 }
 0x258   :  { %v7572_v20 = vpop.f32.mrb[6].mxu1 }
 0x259   :  { %v7574_v14 = vpop.f32.mrb[7].mxu1 }
 0x261   :  { %v7576_v5 = vpop.f32.mrb[8].mxu1 }
 0x262   :  { %v7578_v54 = vpop.f32.mrb[9].mxu1 }
 0x263   :  { %v7580_v12 = vpop.f32.mrb[10].mxu1 }
 0x264   :  { %v7582_v27 = vpop.f32.mrb[11].mxu1 }
 0x294   :  { %v2013_v17 = vpop.f32.mrb[0].mxu0 }
 0x295   :  { %v7592_v60 = vadd.f32 %v7587_v49, %v2013_v17  ;;  %v2015_v2 = vpop.f32.mrb[1].mxu0 }
 0x296   :  { %v7595_v21 = vadd.f32 %v7589_v51, %v2015_v2  ;;  %v2017_v7 = vpop.f32.mrb[2].mxu0 }
 0x297   :  { %v8859_v18 = vmax.f32 %v7592_v60, 0.0  ;;  %v7599_v30 = vadd.f32 %v7587_v49, %v2017_v7  ;;  %v2019_v58 = vpop.f32.mrb[3].mxu0 }
 0x298   :  { %v8863_v3 = vmax.f32 %v7595_v21, 0.0  ;;  %v7603_v15 = vadd.f32 %v7589_v51, %v2019_v58 }
 0x299   :  { %v8858_v13 = vmax.f32 %v7599_v30, 0.0 }
 0x29a   :  { %v8862_v37 = vmax.f32 %v7603_v15, 0.0  ;;  %v6089_v9 = vpack.i.bf16 %v8863_v3, %v8859_v18 }
 0x29c   :  { %6090 = vrot.lane.b32.xlu0 %v6089_v9, %s6488_s2  ;;  %v2023_v4 = vpop.f32.mrb[4].mxu0  ;;  %v6094_v31 = vpack.i.bf16 %v8862_v37, %v8858_v13 }
 0x29d   :  { %v7613_v45 = vadd.f32 %v7587_v49, %v2023_v4  ;;  %v2025_v42 = vpop.f32.mrb[5].mxu0 }
 0x29e   :  { %v7620_v25 = vadd.f32 %v7589_v51, %v2025_v42  ;;  %v2027_v40 = vpop.f32.mrb[6].mxu0 }
 0x29f   :  { %v8854_v16 = vmax.f32 %v7613_v45, 0.0  ;;  %v7624_v63 = vadd.f32 %v7587_v49, %v2027_v40  ;;  %v2029_v26 = vpop.f32.mrb[7].mxu0 }
 0x2a0   :  { %v8855_v50 = vmax.f32 %v7620_v25, 0.0  ;;  %v7628_v10 = vadd.f32 %v7589_v51, %v2029_v26  ;;  %6095 = vrot.lane.b32.xlu0 %v6094_v31, %s6488_s2 }
 0x2a1   :  { %v8850_v44 = vmax.f32 %v7624_v63, 0.0 }
 0x2a2   :  { %v8851_v24 = vmax.f32 %v7628_v10, 0.0  ;;  %v6099_v6 = vpack.i.bf16 %v8855_v50, %v8854_v16 }
 0x2a4   :  { %6100 = vrot.lane.b32.xlu1 %v6099_v6, %s6488_s2  ;;  %v2033_v34 = vpop.f32.mrb[8].mxu0  ;;  %v6104_v39 = vpack.i.bf16 %v8851_v24, %v8850_v44 }
 0x2a5   :  { %v7639_v47 = vadd.f32 %v7587_v49, %v2033_v34  ;;  %v2035_v38 = vpop.f32.mrb[9].mxu0 }
 0x2a6   :  { %v7646_v57 = vadd.f32 %v7589_v51, %v2035_v38  ;;  %v2037_v36 = vpop.f32.mrb[10].mxu0 }
 0x2a7   :  { %v8846_v48 = vmax.f32 %v7639_v47, 0.0  ;;  %v7650_v55 = vadd.f32 %v7587_v49, %v2037_v36  ;;  %v2039_v19 = vpop.f32.mrb[11].mxu0 }
 0x2a8   :  { %v8847_v11 = vmax.f32 %v7646_v57, 0.0  ;;  %v7654_v46 = vadd.f32 %v7589_v51, %v2039_v19  ;;  %6105 = vrot.lane.b32.xlu1 %v6104_v39, %s6488_s2 }
 0x2a9   :  { %v8842_v43 = vmax.f32 %v7650_v55, 0.0 }
 0x2aa   :  { %v6109_v33 = vpack.i.bf16 %v8847_v11, %v8846_v48  ;;  %v8843_v35 = vmax.f32 %v7654_v46, 0.0 }
 0x2ac   :  { %v6114_v41 = vpack.i.bf16 %v8843_v35, %v8842_v43  ;;  %6110 = vrot.lane.b32.xlu0 %v6109_v33, %s6488_s2  ;;  %v2043_v22 = vpop.f32.mrb[12].mxu0 }
 0x2ad   :  { %v7669_v61 = vadd.f32 %v7587_v49, %v2043_v22  ;;  %v2045_v56 = vpop.f32.mrb[13].mxu0 }
 0x2ae   :  { %v7672_v17 = vadd.f32 %v7589_v51, %v2045_v56  ;;  %6115 = vrot.lane.b32.xlu1 %v6114_v41, %s6488_s2  ;;  %v2047_v2 = vpop.f32.mrb[14].mxu0 }
 0x2af   :  { %v8830_v7 = vmax.f32 %v7669_v61, 0.0  ;;  %v7677_v58 = vadd.f32 %v7587_v49, %v2047_v2  ;;  %v2049_v9 = vpop.f32.mrb[15].mxu0 }
 0x2b0   :  { %v8839_v4 = vmax.f32 %v7672_v17, 0.0  ;;  %v7681_v42 = vadd.f32 %v7589_v51, %v2049_v9 }
 0x2b1   :  { %v8835_v31 = vmax.f32 %v7677_v58, 0.0 }
 0x2b2   :  { %v6119_v40 = vpack.i.bf16 %v8839_v4, %v8830_v7  ;;  %v8838_v26 = vmax.f32 %v7681_v42, 0.0 }
 0x2b4   :  { %v6124_v6 = vpack.i.bf16 %v8838_v26, %v8835_v31  ;;  %6120 = vrot.lane.b32.xlu0 %v6119_v40, %s6488_s2  ;;  %v2053_v34 = vpop.f32.mrb[16].mxu0 }
 0x2b5   :  { %v7695_v38 = vadd.f32 %v7587_v49, %v2053_v34  ;;  %v2055_v39 = vpop.f32.mrb[17].mxu0 }
 0x2b6   :  { %v7698_v36 = vadd.f32 %v7589_v51, %v2055_v39  ;;  %6125 = vrot.lane.b32.xlu1 %v6124_v6, %s6488_s2  ;;  %v2057_v19 = vpop.f32.mrb[18].mxu0 }
 0x2b7   :  { %v8831_v33 = vmax.f32 %v7695_v38, 0.0  ;;  %v7703_v41 = vadd.f32 %v7587_v49, %v2057_v19  ;;  %v2059_v22 = vpop.f32.mrb[19].mxu0 }
 0x2b8   :  { %v8832_v56 = vmax.f32 %v7698_v36, 0.0  ;;  %v7707_v2 = vadd.f32 %v7589_v51, %v2059_v22 }
 0x2b9   :  { %v8836_v9 = vmax.f32 %v7703_v41, 0.0 }
 0x2ba   :  { %v6129_v40 = vpack.i.bf16 %v8832_v56, %v8831_v33  ;;  %v8837_v6 = vmax.f32 %v7707_v2, 0.0 }
 0x2bc   :  { %v6134_v34 = vpack.i.bf16 %v8837_v6, %v8836_v9  ;;  %6130 = vrot.lane.b32.xlu0 %v6129_v40, %s6488_s2  ;;  %v2063_v39 = vpop.f32.mrb[20].mxu0 }
 0x2bd   :  { %v7721_v19 = vadd.f32 %v7587_v49, %v2063_v39  ;;  %v2065_v22 = vpop.f32.mrb[21].mxu0 }
 0x2be   :  { %v7724_v7 = vadd.f32 %v7589_v51, %v2065_v22  ;;  %6135 = vrot.lane.b32.xlu1 %v6134_v34, %s6488_s2  ;;  %v2067_v33 = vpop.f32.mrb[22].mxu0 }
 0x2bf   :  { %v8840_v56 = vmax.f32 %v7721_v19, 0.0  ;;  %v7729_v0 = vadd.f32 %v7587_v49, %v2067_v33  ;;  %v2069_v31 = vpop.f32.mrb[23].mxu0 }
 0x2c0   :  { %v8841_v9 = vmax.f32 %v7724_v7, 0.0  ;;  %v7733_v40 = vadd.f32 %v7589_v51, %v2069_v31 }
 0x2c1   :  { %v8844_v39 = vmax.f32 %v7729_v0, 0.0 }
 0x2c2   :  { %v6139_v22 = vpack.i.bf16 %v8841_v9, %v8840_v56  ;;  %v8845_v34 = vmax.f32 %v7733_v40, 0.0 }
 0x2c4   :  { %v6144_v33 = vpack.i.bf16 %v8845_v34, %v8844_v39  ;;  %6140 = vrot.lane.b32.xlu0 %v6139_v22, %s6488_s2  ;;  %v2073_v6 = vpop.f32.mrb[24].mxu0 }
 0x2c5   :  { %v7747_v31 = vadd.f32 %v7587_v49, %v2073_v6  ;;  %v2075_v26 = vpop.f32.mrb[25].mxu0 }
 0x2c6   :  { %v7750_v4 = vadd.f32 %v7589_v51, %v2075_v26  ;;  %6145 = vrot.lane.b32.xlu1 %v6144_v33, %s6488_s2  ;;  %v2077_v56 = vpop.f32.mrb[26].mxu0 }
 0x2c7   :  { %v8848_v9 = vmax.f32 %v7747_v31, 0.0  ;;  %v7755_v43 = vadd.f32 %v7587_v49, %v2077_v56  ;;  %v2079_v35 = vpop.f32.mrb[27].mxu0 }
 0x2c8   :  { %v8849_v39 = vmax.f32 %v7750_v4, 0.0  ;;  %v7759_v22 = vadd.f32 %v7589_v51, %v2079_v35 }
 0x2c9   :  { %v8852_v6 = vmax.f32 %v7755_v43, 0.0 }
 0x2ca   :  { %v6149_v26 = vpack.i.bf16 %v8849_v39, %v8848_v9  ;;  %v8853_v33 = vmax.f32 %v7759_v22, 0.0 }
 0x2cc   :  { %v6154_v56 = vpack.i.bf16 %v8853_v33, %v8852_v6  ;;  %6150 = vrot.lane.b32.xlu0 %v6149_v26, %s6488_s2  ;;  %v2083_v34 = vpop.f32.mrb[28].mxu0 }
 0x2cd   :  { %v7773_v35 = vadd.f32 %v7587_v49, %v2083_v34  ;;  %v2085_v48 = vpop.f32.mrb[29].mxu0 }
 0x2ce   :  { %v7776_v11 = vadd.f32 %v7589_v51, %v2085_v48  ;;  %6155 = vrot.lane.b32.xlu1 %v6154_v56, %s6488_s2  ;;  %v2087_v9 = vpop.f32.mrb[30].mxu0 }
 0x2cf   :  { %v8856_v39 = vmax.f32 %v7773_v35, 0.0  ;;  %v7781_v44 = vadd.f32 %v7587_v49, %v2087_v9  ;;  %v2089_v24 = vpop.f32.mrb[31].mxu0 }
 0x2d0   :  { %v8857_v6 = vmax.f32 %v7776_v11, 0.0  ;;  %v7785_v26 = vadd.f32 %v7589_v51, %v2089_v24 }
 0x2d1   :  { %v8860_v34 = vmax.f32 %v7781_v44, 0.0 }
 0x2d2   :  { %v6159_v48 = vpack.i.bf16 %v8857_v6, %v8856_v39  ;;  %v8861_v56 = vmax.f32 %v7785_v26, 0.0 }
 0x2d4   :  { %v6164_v9 = vpack.i.bf16 %v8861_v56, %v8860_v34  ;;  %6160 = vrot.lane.b32.xlu0 %v6159_v48, %s6488_s2  ;;  %v2093_v33 = vpop.f32.mrb[32].mxu0 }
 0x2d5   :  { %v7799_v24 = vadd.f32 %v7587_v49, %v2093_v33  ;;  %v2095_v16 = vpop.f32.mrb[33].mxu0 }
 0x2d6   :  { %v7802_v50 = vadd.f32 %v7589_v51, %v2095_v16  ;;  %6165 = vrot.lane.b32.xlu1 %v6164_v9, %s6488_s2  ;;  %v2097_v39 = vpop.f32.mrb[34].mxu0 }
 0x2d7   :  { %v8866_v6 = vmax.f32 %v7799_v24, 0.0  ;;  %v7807_v13 = vadd.f32 %v7587_v49, %v2097_v39  ;;  %v2099_v18 = vpop.f32.mrb[35].mxu0 }
 0x2d8   :  { %v8867_v34 = vmax.f32 %v7802_v50, 0.0  ;;  %v7811_v48 = vadd.f32 %v7589_v51, %v2099_v18 }
 0x2d9   :  { %v8872_v33 = vmax.f32 %v7807_v13, 0.0 }
 0x2da   :  { %v6169_v16 = vpack.i.bf16 %v8867_v34, %v8866_v6  ;;  %v8873_v9 = vmax.f32 %v7811_v48, 0.0 }
 0x2dc   :  { %v6174_v39 = vpack.i.bf16 %v8873_v9, %v8872_v33  ;;  %6170 = vrot.lane.b32.xlu0 %v6169_v16, %s6488_s2  ;;  %v2103_v56 = vpop.f32.mrb[36].mxu0 }
 0x2dd   :  { %v5883_v18 = vadd.f32 %v2103_v56, %v7560_v32  ;;  %v2105_v37 = vpop.f32.mrb[37].mxu0 }
 0x2de   :  { %v5884_v3 = vadd.f32 %v2105_v37, %v7562_v8  ;;  %6175 = vrot.lane.b32.xlu1 %v6174_v39, %s6488_s2  ;;  %v2107_v1 = vpop.f32.mrb[38].mxu0 }
 0x2df   :  { %v7828_v6 = vadd.f32 %v5883_v18, %v7587_v49  ;;  %v5885_v34 = vadd.f32 %v2107_v1, %v7564_v53  ;;  %v2109_v28 = vpop.f32.mrb[39].mxu0 }
 0x2e0   :  { %v7832_v59 = vadd.f32 %v5884_v3, %v7589_v51  ;;  %v5886_v16 = vadd.f32 %v2109_v28, %v7566_v62 }
 0x2e1   :  { %8932 = vst [vmem:[#allocation16_spill] sm:$0xff] %v7828_v6  ;;  %v8876_v33 = vmax.f32 %v7828_v6, 0.0  ;;  %v7837_v32 = vadd.f32 %v5885_v34, %v7587_v49 }
 0x2e2   :  { %v8879_v8 = vmax.f32 %v7832_v59, 0.0  ;;  %v7841_v37 = vadd.f32 %v5886_v16, %v7589_v51 }
 0x2e3   :  { %v8877_v56 = vmax.f32 %v7837_v32, 0.0 }
 0x2e4   :  { %v8878_v1 = vmax.f32 %v7841_v37, 0.0  ;;  %v2113_v53 = vpop.f32.mrb[40].mxu0  ;;  %v6179_v28 = vpack.i.bf16 %v8879_v8, %v8876_v33 }
 0x2e5   :  { %v5887_v62 = vadd.f32 %v2113_v53, %v7568_v23  ;;  %v2115_v3 = vpop.f32.mrb[41].mxu0 }
 0x2e6   :  { %v5888_v34 = vadd.f32 %v2115_v3, %v7570_v52  ;;  %6180 = vrot.lane.b32.xlu0 %v6179_v28, %s6488_s2  ;;  %v2117_v39 = vpop.f32.mrb[42].mxu0  ;;  %v6184_v18 = vpack.i.bf16 %v8878_v1, %v8877_v56 }
 0x2e7   :  { %v7857_v16 = vadd.f32 %v5887_v62, %v7587_v49  ;;  %v5889_v9 = vadd.f32 %v2117_v39, %v7572_v20  ;;  %v2119_v29 = vpop.f32.mrb[43].mxu0 }
 0x2e8   :  { %v7861_v33 = vadd.f32 %v5888_v34, %v7589_v51  ;;  %v5890_v23 = vadd.f32 %v2119_v29, %v7574_v14  ;;  %6185 = vrot.lane.b32.xlu1 %v6184_v18, %s6488_s2 }
 0x2e9   :  { %8933 = vst [vmem:[#allocation17_spill] sm:$0xff] %v7857_v16  ;;  %v8880_v52 = vmax.f32 %v7857_v16, 0.0  ;;  %v7867_v53 = vadd.f32 %v5889_v9, %v7587_v49 }
 0x2ea   :  { %8934 = vst [vmem:[#allocation18_spill] sm:$0xff] %v7861_v33  ;;  %v8887_v28 = vmax.f32 %v7861_v33, 0.0  ;;  %v7871_v62 = vadd.f32 %v5890_v23, %v7589_v51 }
 0x2eb   :  { %8935 = vst [vmem:[#allocation19_spill] sm:$0xff] %v7867_v53  ;;  %v8883_v20 = vmax.f32 %v7867_v53, 0.0 }
 0x2ec   :  { %8936 = vst [vmem:[#allocation20_spill] sm:$0xff] %v7871_v62  ;;  %v8884_v3 = vmax.f32 %v7871_v62, 0.0  ;;  %v2123_v34 = vpop.f32.mrb[44].mxu0  ;;  %v6189_v29 = vpack.i.bf16 %v8887_v28, %v8880_v52 }
 0x2ed   :  { %v5891_v14 = vadd.f32 %v2123_v34, %v7576_v5  ;;  %v2125_v39 = vpop.f32.mrb[45].mxu0 }
 0x2ee   :  { %v5892_v9 = vadd.f32 %v2125_v39, %v7578_v54  ;;  %6190 = vrot.lane.b32.xlu0 %v6189_v29, %s6488_s2  ;;  %v2127_v18 = vpop.f32.mrb[46].mxu0  ;;  %v6194_v23 = vpack.i.bf16 %v8884_v3, %v8883_v20 }
 0x2ef   :  { %v7887_v56 = vadd.f32 %v5891_v14, %v7587_v49  ;;  %v5893_v1 = vadd.f32 %v2127_v18, %v7580_v12  ;;  %v2129_v8 = vpop.f32.mrb[47].mxu0 }
 0x2f0   :  { %v7891_v52 = vadd.f32 %v5892_v9, %v7589_v51  ;;  %v5894_v5 = vadd.f32 %v2129_v8, %v7582_v27  ;;  %6195 = vrot.lane.b32.xlu1 %v6194_v23, %s6488_s2 }
 0x2f1   :  { %8937 = vst [vmem:[#allocation21_spill] sm:$0xff] %v7887_v56  ;;  %v8881_v54 = vmax.f32 %v7887_v56, 0.0  ;;  %v7897_v34 = vadd.f32 %v5893_v1, %v7587_v49 }
 0x2f2   :  { %8938 = vst [vmem:[#allocation22_spill] sm:$0xff] %v7891_v52  ;;  %v8882_v29 = vmax.f32 %v7891_v52, 0.0  ;;  %v7901_v14 = vadd.f32 %v5894_v5, %v7589_v51 }
 0x2f3   :  { %8939 = vst [vmem:[#allocation23_spill] sm:$0xff] %v7897_v34  ;;  %v8885_v12 = vmax.f32 %v7897_v34, 0.0 }
 0x2f4   :  { %8940 = vst [vmem:[#allocation24_spill] sm:$0xff] %v7901_v14  ;;  %v8886_v39 = vmax.f32 %v7901_v14, 0.0  ;;  %v6199_v27 = vpack.i.bf16 %v8882_v29, %v8881_v54  ;;  %v8941_v54 = vmax.f32 %v7595_v21, 0.0 }
 0x2f6   :  { %6200 = vrot.lane.b32.xlu0 %v6199_v27, %s6488_s2  ;;  %v6204_v49 = vpack.i.bf16 %v8886_v39, %v8885_v12  ;;  %v8942_v27 = vmax.f32 %v7603_v15, 0.0  ;;  %v8943_v12 = vmax.f32 %v7592_v60, 0.0  ;;  %v8944_v39 = vmax.f32 %v7599_v30, 0.0 }
 0x2f7   :  { %v8946_v30 = vmax.f32 %v7613_v45, 0.0 }
 0x2f8   :  { %6205 = vrot.lane.b32.xlu1 %v6204_v49, %s6488_s2 }
 0x30e   :  { %v6091_v51 = vpop.permute.xlu0 %6090 }
 0x30f   :  { %v6093_v8 = vunpack.i.h.bf16 %v6091_v51  ;;  %v6092_v1 = vunpack.i.l.bf16 %v6091_v51 }
 0x311   :  { %v2433_v18 = vsel %vm2432_vm14, %v6092_v1, %v6093_v8  ;;  %v2506_v29 = vmax.f32 %v8941_v54, %v6093_v8  ;;  %v8945_v8 = vmax.f32 %v7620_v25, 0.0 }
 0x312   :  { %v6096_v9 = vpop.permute.xlu0 %6095  ;;  %v2505_v49 = vmax.f32 %v8943_v12, %v2433_v18 }
 0x313   :  { %v6098_v23 = vunpack.i.h.bf16 %v6096_v9  ;;  %v6097_v5 = vunpack.i.l.bf16 %v6096_v9  ;;  %v6489_v9 = vmov 65535   ;;  %v2605_v54 = vrot.slane %v2506_v29, 1 }
 0x314   :  { %v2823_v21 = vsel %vm945_vm8, 4294967295, %v6489_v9  ;;  %v2602_v12 = vrot.slane %v2505_v49, 1  ;;  %vm4623_vm8 = vcmask 1045509  }
 0x315   :  { %v2508_v20 = vmax.f32 %v8942_v27, %v6098_v23  ;;  %v2434_v3 = vsel %vm2432_vm14, %v6097_v5, %v6098_v23  ;;  %v7932_v52 = vsel %vm2822_vm0, %v2823_v21, 0 }
 0x316   :  { %v2507_v51 = vmax.f32 %v8944_v39, %v2434_v3  ;;  %v6101_v28 = vpop.permute.xlu1 %6100 }
 0x317   :  { %v2606_v34 = vrot.slane %v2508_v20, 1  ;;  %v6103_v14 = vunpack.i.h.bf16 %v6101_v28  ;;  %v6102_v1 = vunpack.i.l.bf16 %v6101_v28 }
 0x318   :  { %v2603_v15 = vrot.slane %v2507_v51, 1 }
 0x319   :  { %v2510_v23 = vmax.f32 %v8945_v8, %v6103_v14  ;;  %v2435_v60 = vsel %vm2432_vm14, %v6102_v1, %v6103_v14  ;;  %v2607_v27 = vsel %vm2601_vm15, %v2605_v54, %v2606_v34 }
 0x31a   :  { %v2509_v3 = vmax.f32 %v8946_v30, %v2435_v60  ;;  %v6106_v39 = vpop.permute.xlu1 %6105  ;;  %v2604_v14 = vsel %vm2601_vm15, %v2602_v12, %v2603_v15  ;;  %v2731_v45 = vmax.f32 %v2506_v29, %v2607_v27  ;;  %v8949_v12 = vmax.f32 %v7646_v57, 0.0 }
 0x31b   :  { %v2610_v18 = vrot.slane %v2510_v23, 1  ;;  %v6108_v5 = vunpack.i.h.bf16 %v6106_v39  ;;  %v6107_v28 = vunpack.i.l.bf16 %v6106_v39  ;;  %v8947_v39 = vmax.f32 %v7628_v10, 0.0 }
 0x31c   :  { %v2608_v56 = vrot.slane %v2509_v3, 1  ;;  %v8950_v10 = vmax.f32 %v7639_v47, 0.0 }
 0x31d   :  { %v2735_v9 = vmax.f32 %v2510_v23, %v2610_v18  ;;  %v2436_v53 = vsel %vm2432_vm14, %v6107_v28, %v6108_v5  ;;  %v2611_v25 = vsel %vm2601_vm15, %v2606_v34, %v2610_v18  ;;  %v2512_v62 = vmax.f32 %v8947_v39, %v6108_v5 }
 0x31e   :  { %v2734_v1 = vmax.f32 %v2509_v3, %v2608_v56  ;;  %v6111_v8 = vpop.permute.xlu0 %6110  ;;  %v2733_v60 = vmax.f32 %v2508_v20, %v2611_v25  ;;  %v2609_v30 = vsel %vm2601_vm15, %v2603_v15, %v2608_v56  ;;  %v8948_v23 = vmax.f32 %v7624_v63, 0.0 }
 0x31f   :  { %v6113_v54 = vunpack.i.h.bf16 %v6111_v8  ;;  %v6112_v16 = vunpack.i.l.bf16 %v6111_v8  ;;  %v2732_v21 = vmax.f32 %v2507_v51, %v2609_v30  ;;  %v2730_v34 = vmax.f32 %v2505_v49, %v2604_v14 }
 0x320   :  { %v2511_v33 = vmax.f32 %v8948_v23, %v2436_v53  ;;  %v6116_v28 = vpop.permute.xlu1 %6115  ;;  %v2779_v6 = vpack.c.bf16 %v2733_v60, %v2731_v45  ;;  %v2781_v18 = vpack.c.bf16 %v2735_v9, %v2735_v9  ;;  %v2780_v63 = vpack.c.bf16 %v2734_v1, %v2734_v1 }
 0x321   :  { %v2514_v3 = vmax.f32 %v8949_v12, %v6113_v54  ;;  %v2437_v20 = vsel %vm2432_vm14, %v6112_v16, %v6113_v54  ;;  %v6118_v29 = vunpack.i.h.bf16 %v6116_v28  ;;  %v6117_v56 = vunpack.i.l.bf16 %v6116_v28 }
 0x322   :  { %v2513_v15 = vmax.f32 %v8950_v10, %v2437_v20  ;;  %2831 = vmatprep.subr.bf16.mxu1 %v2779_v6  ;;  %v2778_v5 = vpack.c.bf16 %v2732_v21, %v2730_v34  ;;  %v2829_v51 = vand.u32 %v7932_v52, %v2781_v18  ;;  %v2615_v53 = vrot.slane %v2512_v62, 1 }
 0x323   :  { %v2616_v27 = vrot.slane %v2514_v3, 1  ;;  %v8951_v49 = vmax.f32 %v7654_v46, 0.0  ;;  %v2438_v57 = vsel %vm2432_vm14, %v6117_v56, %v6118_v29  ;;  %v2612_v25 = vrot.slane %v2511_v33, 1 }
 0x324   :  { %v2613_v14 = vrot.slane %v2513_v15, 1  ;;  %v8952_v16 = vmax.f32 %v7650_v55, 0.0  ;;  %2832 = vmatpush1.bf16.msra.mxu1 %v2778_v5  ;;  %v2826_v1 = vand.u32 %v7932_v52, %v2780_v63  ;;  %v7960_v55 = vld [vmem:[%s8799_s3] sm:$0x3f]   ;;  %v8953_v10 = vmax.f32 %v7672_v17, 0.0 }
 0x325   :  { %v2516_v9 = vmax.f32 %v8951_v49, %v6118_v29  ;;  %2833 = vmatprep.subr.bf16.mxu1 %v2829_v51  ;;  %v2617_v6 = vsel %vm2601_vm15, %v2615_v53, %v2616_v27  ;;  %v8954_v49 = vmax.f32 %v7681_v42, 0.0 }
 0x326   :  { %v2515_v8 = vmax.f32 %v8952_v16, %v2438_v57  ;;  %v6121_v60 = vpop.permute.xlu0 %6120  ;;  %v2614_v46 = vsel %vm2601_vm15, %v2612_v25, %v2613_v14  ;;  %v2737_v34 = vmax.f32 %v2512_v62, %v2617_v6 }
 0x327   :  { %v2620_v47 = vrot.slane %v2516_v9, 1  ;;  %v6123_v39 = vunpack.i.h.bf16 %v6121_v60  ;;  %v6122_v54 = vunpack.i.l.bf16 %v6121_v60  ;;  %v2736_v56 = vmax.f32 %v2511_v33, %v2614_v46 }
 0x328   :  { %v2618_v45 = vrot.slane %v2515_v8, 1  ;;  %2834 = vmatpush1.bf16.msra.mxu1 %v2826_v1  ;;  %v6126_v28 = vpop.permute.xlu1 %6125 }
 0x329   :  { %v2741_v30 = vmax.f32 %v2516_v9, %v2620_v47  ;;  %v2621_v21 = vsel %vm2601_vm15, %v2616_v27, %v2620_v47  ;;  %v6128_v20 = vunpack.i.h.bf16 %v6126_v28  ;;  %v6127_v29 = vunpack.i.l.bf16 %v6126_v28 }
 0x32a   :  { %v2740_v23 = vmax.f32 %v2515_v8, %v2618_v45  ;;  %v2739_v18 = vmax.f32 %v2514_v3, %v2621_v21  ;;  %v2619_v12 = vsel %vm2601_vm15, %v2613_v14, %v2618_v45  ;;  %v2518_v5 = vmax.f32 %v8953_v10, %v6123_v39 }
 0x32b   :  { %v2738_v63 = vmax.f32 %v2513_v15, %v2619_v12  ;;  %v2785_v53 = vpack.c.bf16 %v2741_v30, %v2741_v30  ;;  %v2439_v27 = vsel %vm2432_vm14, %v6122_v54, %v6123_v39  ;;  %v2520_v9 = vmax.f32 %v8954_v49, %v6128_v20  ;;  %5454 = vmatmul.mubr.msk.bf16.vlgmr.msra.gmra.mrb[12].mxu1 %vm2817_vm1, %v7960_v55 }
 0x32c   :  { %v2783_v51 = vpack.c.bf16 %v2739_v18, %v2737_v34  ;;  %v2440_v57 = vsel %vm2432_vm14, %v6127_v29, %v6128_v20  ;;  %v2784_v62 = vpack.c.bf16 %v2740_v23, %v2740_v23  ;;  %v8955_v3 = vmax.f32 %v7677_v58, 0.0 }
 0x32d   :  { %v2782_v17 = vpack.c.bf16 %v2738_v63, %v2736_v56  ;;  %v2878_v25 = vand.u32 %v7932_v52, %v2785_v53  ;;  %v8956_v15 = vmov 0   ;;  %v2626_v14 = vrot.slane %v2520_v9, 1 }
 0x32e   :  { %v2519_v33 = vmax.f32 %v8955_v3, %v2440_v57  ;;  %2880 = vmatprep.subr.bf16.mxu1 %v2783_v51  ;;  %2912 = vmatprep.mubr.bf16.mxu1 %v8956_v15  ;;  %v2625_v16 = vrot.slane %v2518_v5, 1  ;;  %v6131_v42 = vpop.permute.xlu0 %6130  ;;  %v8957_v8 = vmax.f32 %v7669_v61, 0.0  ;;  %v2875_v58 = vand.u32 %v7932_v52, %v2784_v62 }
 0x32f   :  { %2881 = vmatpush1.bf16.msra.mxu1 %v2782_v17  ;;  %v6133_v6 = vunpack.i.h.bf16 %v6131_v42  ;;  %v6132_v45 = vunpack.i.l.bf16 %v6131_v42  ;;  %v8958_v30 = vmax.f32 %v7698_v36, 0.0  ;;  %v8959_v28 = vmax.f32 %v7695_v38, 0.0 }
 0x330   :  { %v2517_v47 = vmax.f32 %v8957_v8, %v2439_v27  ;;  %2882 = vmatprep.subr.bf16.mxu1 %v2878_v25  ;;  %v2623_v60 = vrot.slane %v2519_v33, 1  ;;  %v6136_v1 = vpop.permute.xlu1 %6135  ;;  %v2627_v46 = vsel %vm2601_vm15, %v2625_v16, %v2626_v14  ;;  %v8960_v63 = vmax.f32 %v7707_v2, 0.0 }
 0x331   :  { %v2522_v39 = vmax.f32 %v8958_v30, %v6133_v6  ;;  %v2441_v54 = vsel %vm2432_vm14, %v6132_v45, %v6133_v6  ;;  %v6138_v21 = vunpack.i.h.bf16 %v6136_v1  ;;  %v6137_v23 = vunpack.i.l.bf16 %v6136_v1 }
 0x332   :  { %v2521_v61 = vmax.f32 %v8959_v28, %v2441_v54  ;;  %v2622_v34 = vrot.slane %v2517_v47, 1  ;;  %v2743_v20 = vmax.f32 %v2518_v5, %v2627_v46  ;;  %v8961_v17 = vmax.f32 %v7703_v41, 0.0 }
 0x333   :  { %2883 = vmatpush1.bf16.msra.mxu1 %v2875_v58  ;;  %v2630_v18 = vrot.slane %v2522_v39, 1  ;;  %v2442_v56 = vsel %vm2432_vm14, %v6137_v23, %v6138_v21  ;;  %v2524_v38 = vmax.f32 %v8960_v63, %v6138_v21  ;;  %v8962_v8 = vmax.f32 %v7724_v7, 0.0 }
 0x334   :  { %v2628_v12 = vrot.slane %v2521_v61, 1  ;;  %v2624_v36 = vsel %vm2601_vm15, %v2622_v34, %v2623_v60  ;;  %v2523_v25 = vmax.f32 %v8961_v17, %v2442_v56  ;;  %v8965_v23 = vmax.f32 %v7729_v0, 0.0 }
 0x335   :  { %v2747_v29 = vmax.f32 %v2522_v39, %v2630_v18  ;;  %v2631_v10 = vsel %vm2601_vm15, %v2626_v14, %v2630_v18  ;;  %v2742_v42 = vmax.f32 %v2517_v47, %v2624_v36  ;;  %v2635_v41 = vrot.slane %v2524_v38, 1 }
 0x336   :  { %5455 = vmatmul.mubr.msk.bf16.vlgmr.msra.gmra.mrb[16].mxu1 %vm2817_vm1, %v7960_v55  ;;  %v2746_v51 = vmax.f32 %v2521_v61, %v2628_v12  ;;  %v6141_v53 = vpop.permute.xlu0 %6140  ;;  %v2745_v27 = vmax.f32 %v2520_v9, %v2631_v10  ;;  %v2629_v49 = vsel %vm2601_vm15, %v2623_v60, %v2628_v12  ;;  %v8963_v60 = vmax.f32 %v7721_v19, 0.0 }
 0x337   :  { %2961 = vmatprep.mubr.bf16.mxu1 %v8956_v15  ;;  %v6143_v5 = vunpack.i.h.bf16 %v6141_v53  ;;  %v6142_v57 = vunpack.i.l.bf16 %v6141_v53  ;;  %v2744_v62 = vmax.f32 %v2519_v33, %v2629_v49  ;;  %v2789_v3 = vpack.c.bf16 %v2747_v29, %v2747_v29 }
 0x338   :  { %v6146_v14 = vpop.permute.xlu1 %6145  ;;  %v2787_v16 = vpack.c.bf16 %v2745_v27, %v2743_v20  ;;  %v2788_v46 = vpack.c.bf16 %v2746_v51, %v2746_v51  ;;  %v8964_v39 = vmax.f32 %v7733_v40, 0.0  ;;  %v2632_v54 = vrot.slane %v2523_v25, 1 }
 0x339   :  { %v2526_v2 = vmax.f32 %v8962_v8, %v6143_v5  ;;  %v2443_v6 = vsel %vm2432_vm14, %v6142_v57, %v6143_v5  ;;  %v6148_v9 = vunpack.i.h.bf16 %v6146_v14  ;;  %v6147_v45 = vunpack.i.l.bf16 %v6146_v14 }
 0x33a   :  { %v2525_v1 = vmax.f32 %v8963_v60, %v2443_v6  ;;  %2929 = vmatprep.subr.bf16.mxu1 %v2787_v16  ;;  %v2786_v58 = vpack.c.bf16 %v2744_v62, %v2742_v42  ;;  %v2927_v33 = vand.u32 %v7932_v52, %v2789_v3  ;;  %v2924_v12 = vand.u32 %v7932_v52, %v2788_v46 }
 0x33b   :  { %v2636_v30 = vrot.slane %v2526_v2, 1  ;;  %v2528_v47 = vmax.f32 %v8964_v39, %v6148_v9  ;;  %v2444_v7 = vsel %vm2432_vm14, %v6147_v45, %v6148_v9  ;;  %v8966_v57 = vmax.f32 %v7750_v4, 0.0 }
 0x33c   :  { %v2633_v21 = vrot.slane %v2525_v1, 1  ;;  %v2527_v28 = vmax.f32 %v8965_v23, %v2444_v7  ;;  %2930 = vmatpush1.bf16.msra.mxu1 %v2786_v58  ;;  %v8967_v42 = vmax.f32 %v7759_v22, 0.0 }
 0x33d   :  { %v2640_v19 = vrot.slane %v2528_v47, 1  ;;  %2931 = vmatprep.subr.bf16.mxu1 %v2927_v33  ;;  %v2637_v61 = vsel %vm2601_vm15, %v2635_v41, %v2636_v30 }
 0x33e   :  { %v2638_v34 = vrot.slane %v2527_v28, 1  ;;  %v6151_v18 = vpop.permute.xlu0 %6150  ;;  %v2634_v20 = vsel %vm2601_vm15, %v2632_v54, %v2633_v21  ;;  %v2749_v51 = vmax.f32 %v2524_v38, %v2637_v61 }
 0x33f   :  { %v2753_v40 = vmax.f32 %v2528_v47, %v2640_v19  ;;  %v6153_v29 = vunpack.i.h.bf16 %v6151_v18  ;;  %v6152_v56 = vunpack.i.l.bf16 %v6151_v18  ;;  %v2641_v10 = vsel %vm2601_vm15, %v2636_v30, %v2640_v19 }
 0x340   :  { %v2752_v36 = vmax.f32 %v2527_v28, %v2638_v34  ;;  %2932 = vmatpush1.bf16.msra.mxu1 %v2924_v12  ;;  %v6156_v0 = vpop.permute.xlu1 %6155  ;;  %v2751_v63 = vmax.f32 %v2526_v2, %v2641_v10  ;;  %v2639_v53 = vsel %vm2601_vm15, %v2633_v21, %v2638_v34  ;;  %v2748_v5 = vmax.f32 %v2523_v25, %v2634_v20 }
 0x341   :  { %v6158_v27 = vunpack.i.h.bf16 %v6156_v0  ;;  %v6157_v49 = vunpack.i.l.bf16 %v6156_v0  ;;  %v2530_v62 = vmax.f32 %v8966_v57, %v6153_v29  ;;  %v2750_v17 = vmax.f32 %v2525_v1, %v2639_v53 }
 0x342   :  { %v2791_v3 = vpack.c.bf16 %v2751_v63, %v2749_v51  ;;  %v2793_v14 = vpack.c.bf16 %v2753_v40, %v2753_v40  ;;  %v2445_v16 = vsel %vm2432_vm14, %v6152_v56, %v6153_v29  ;;  %v2792_v38 = vpack.c.bf16 %v2752_v36, %v2752_v36 }
 0x343   :  { %v2532_v8 = vmax.f32 %v8967_v42, %v6158_v27  ;;  %v2446_v6 = vsel %vm2432_vm14, %v6157_v49, %v6158_v27  ;;  %5456 = vmatmul.mubr.msk.bf16.vlgmr.msra.gmra.mrb[20].mxu1 %vm2817_vm1, %v7960_v55  ;;  %v8968_v2 = vmax.f32 %v7755_v43, 0.0  ;;  %v2790_v4 = vpack.c.bf16 %v2750_v17, %v2748_v5 }
 0x344   :  { %2978 = vmatprep.subr.bf16.mxu1 %v2791_v3  ;;  %v2976_v9 = vand.u32 %v7932_v52, %v2793_v14  ;;  %3010 = vmatprep.mubr.bf16.mxu1 %v8956_v15  ;;  %v2645_v60 = vrot.slane %v2530_v62, 1  ;;  %v8969_v1 = vmax.f32 %v7747_v31, 0.0  ;;  %v2973_v43 = vand.u32 %v7932_v52, %v2792_v38 }
 0x345   :  { %v2531_v25 = vmax.f32 %v8968_v2, %v2446_v6  ;;  %v2646_v45 = vrot.slane %v2532_v8, 1  ;;  %2979 = vmatpush1.bf16.msra.mxu1 %v2790_v4  ;;  %v8970_v47 = vmax.f32 %v7776_v11, 0.0  ;;  %v8971_v28 = vmax.f32 %v7773_v35, 0.0 }
 0x346   :  { %v6161_v22 = vpop.permute.xlu0 %6160  ;;  %v2529_v58 = vmax.f32 %v8969_v1, %v2445_v16  ;;  %2980 = vmatprep.subr.bf16.mxu1 %v2976_v9  ;;  %v8972_v56 = vmax.f32 %v7785_v26, 0.0  ;;  %v8973_v49 = vmax.f32 %v7781_v44, 0.0  ;;  %v8974_v17 = vmax.f32 %v7802_v50, 0.0 }
 0x347   :  { %v6163_v33 = vunpack.i.h.bf16 %v6161_v22  ;;  %v6162_v46 = vunpack.i.l.bf16 %v6161_v22  ;;  %v2643_v41 = vrot.slane %v2531_v25, 1  ;;  %v2647_v39 = vsel %vm2601_vm15, %v2645_v60, %v2646_v45 }
 0x348   :  { %v6166_v30 = vpop.permute.xlu1 %6165  ;;  %v2642_v19 = vrot.slane %v2529_v58, 1  ;;  %v2755_v18 = vmax.f32 %v2530_v62, %v2647_v39  ;;  %v8976_v9 = vmax.f32 %v7811_v48, 0.0  ;;  %v8977_v22 = vmax.f32 %v7807_v13, 0.0 }
 0x349   :  { %v2534_v7 = vmax.f32 %v8970_v47, %v6163_v33  ;;  %v2447_v54 = vsel %vm2432_vm14, %v6162_v46, %v6163_v33  ;;  %v6168_v21 = vunpack.i.h.bf16 %v6166_v30  ;;  %v6167_v23 = vunpack.i.l.bf16 %v6166_v30  ;;  %2981 = vmatpush1.bf16.msra.mxu1 %v2973_v43 }
 0x34a   :  { %v2533_v31 = vmax.f32 %v8971_v28, %v2447_v54  ;;  %v2644_v40 = vsel %vm2601_vm15, %v2642_v19, %v2643_v41 }
 0x34b   :  { %v2650_v61 = vrot.slane %v2534_v7, 1  ;;  %v2448_v20 = vsel %vm2432_vm14, %v6167_v23, %v6168_v21  ;;  %v2536_v35 = vmax.f32 %v8972_v56, %v6168_v21  ;;  %v2754_v3 = vmax.f32 %v2529_v58, %v2644_v40 }
 0x34c   :  { %v2648_v34 = vrot.slane %v2533_v31, 1  ;;  %5457 = vmatmul.mubr.msk.bf16.vlgmr.msra.gmra.mrb[24].mxu1 %vm2817_vm1, %v7960_v55  ;;  %v2535_v5 = vmax.f32 %v8973_v49, %v2448_v20  ;;  %v8978_v20 = vmax.f32 %v7832_v59, 0.0 }
 0x34d   :  { %v2759_v12 = vmax.f32 %v2534_v7, %v2650_v61  ;;  %v2651_v11 = vsel %vm2601_vm15, %v2646_v45, %v2650_v61  ;;  %3059 = vmatprep.mubr.bf16.mxu1 %v8956_v15  ;;  %v2655_v44 = vrot.slane %v2536_v35, 1 }
 0x34e   :  { %v2758_v29 = vmax.f32 %v2533_v31, %v2648_v34  ;;  %v6171_v10 = vpop.permute.xlu0 %6170  ;;  %v2757_v36 = vmax.f32 %v2532_v8, %v2651_v11  ;;  %v2649_v0 = vsel %vm2601_vm15, %v2643_v41, %v2648_v34  ;;  %v8975_v8 = vmax.f32 %v7799_v24, 0.0 }
 0x34f   :  { %v6173_v51 = vunpack.i.h.bf16 %v6171_v10  ;;  %v6172_v63 = vunpack.i.l.bf16 %v6171_v10  ;;  %v2756_v53 = vmax.f32 %v2531_v25, %v2649_v0  ;;  %v2797_v27 = vpack.c.bf16 %v2759_v12, %v2759_v12 }
 0x350   :  { %v6176_v57 = vpop.permute.xlu1 %6175  ;;  %v2795_v62 = vpack.c.bf16 %v2757_v36, %v2755_v18  ;;  %v2796_v25 = vpack.c.bf16 %v2758_v29, %v2758_v29  ;;  %v2652_v58 = vrot.slane %v2535_v5, 1 }
 0x351   :  { %v2538_v26 = vmax.f32 %v8974_v17, %v6173_v51  ;;  %v2449_v14 = vsel %vm2432_vm14, %v6172_v63, %v6173_v51  ;;  %v6178_v16 = vunpack.i.h.bf16 %v6176_v57  ;;  %v6177_v42 = vunpack.i.l.bf16 %v6176_v57 }
 0x352   :  { %v2537_v6 = vmax.f32 %v8975_v8, %v2449_v14  ;;  %3027 = vmatprep.subr.bf16.mxu1 %v2795_v62  ;;  %v2794_v38 = vpack.c.bf16 %v2756_v53, %v2754_v3  ;;  %v3025_v2 = vand.u32 %v7932_v52, %v2797_v27  ;;  %v3022_v41 = vand.u32 %v7932_v52, %v2796_v25 }
 0x353   :  { %v2656_v4 = vrot.slane %v2538_v26, 1  ;;  %v2540_v45 = vmax.f32 %v8976_v9, %v6178_v16  ;;  %v2450_v50 = vsel %vm2432_vm14, %v6177_v42, %v6178_v16  ;;  %v8980_v51 = vmax.f32 %v7837_v32, 0.0  ;;  %v8983_v16 = vld [vmem:[#allocation18_spill] sm:$0xff] }
 0x354   :  { %v2653_v60 = vrot.slane %v2537_v6, 1  ;;  %v2539_v1 = vmax.f32 %v8977_v22, %v2450_v50  ;;  %3028 = vmatpush1.bf16.msra.mxu1 %v2794_v38  ;;  %v8984_v32 = vmax.f32 %v8983_v16, 0.0 }
 0x355   :  { %v2660_v24 = vrot.slane %v2540_v45, 1  ;;  %3029 = vmatprep.subr.bf16.mxu1 %v3025_v2  ;;  %v2657_v33 = vsel %vm2601_vm15, %v2655_v44, %v2656_v4  ;;  %v8985_v2 = vld [vmem:[#allocation17_spill] sm:$0xff] }
 0x356   :  { %v2658_v46 = vrot.slane %v2539_v1, 1  ;;  %v2654_v48 = vsel %vm2601_vm15, %v2652_v58, %v2653_v60  ;;  %v2761_v7 = vmax.f32 %v2536_v35, %v2657_v33  ;;  %v8979_v35 = vmax.f32 %v7841_v37, 0.0  ;;  %v8987_v33 = vld [vmem:[#allocation20_spill] sm:$0xff] }
 0x357   :  { %v2765_v30 = vmax.f32 %v2540_v45, %v2660_v24  ;;  %v2661_v43 = vsel %vm2601_vm15, %v2656_v4, %v2660_v24  ;;  %v2760_v34 = vmax.f32 %v2535_v5, %v2654_v48  ;;  %v8981_v5 = vld [vmem:[#allocation16_spill] sm:$0xff]  ;;  %v8986_v25 = vmax.f32 %v8985_v2, 0.0 }
 0x358   :  { %v2764_v39 = vmax.f32 %v2539_v1, %v2658_v46  ;;  %3030 = vmatpush1.bf16.msra.mxu1 %v3022_v41  ;;  %v6181_v47 = vpop.permute.xlu0 %6180  ;;  %v2763_v13 = vmax.f32 %v2538_v26, %v2661_v43  ;;  %v2659_v54 = vsel %vm2601_vm15, %v2653_v60, %v2658_v46  ;;  %v8982_v57 = vmax.f32 %v8981_v5, 0.0 }
 0x359   :  { %v6183_v21 = vunpack.i.h.bf16 %v6181_v47  ;;  %v2762_v23 = vmax.f32 %v2537_v6, %v2659_v54  ;;  %v2801_v28 = vpack.c.bf16 %v2765_v30, %v2765_v30  ;;  %v6182_v31 = vunpack.i.l.bf16 %v6181_v47  ;;  %v8989_v54 = vld [vmem:[#allocation19_spill] sm:$0xff] }
 0x35a   :  { %v6186_v19 = vpop.permute.xlu1 %6185  ;;  %v2799_v61 = vpack.c.bf16 %v2763_v13, %v2761_v7  ;;  %v2800_v56 = vpack.c.bf16 %v2764_v39, %v2764_v39  ;;  %v8988_v46 = vmax.f32 %v8987_v33, 0.0  ;;  %v6275_v33 = vld [vmem:[#allocation4 + $0x60] sm:$0xff]  }
 0x35b   :  { %v6188_v18 = vunpack.i.h.bf16 %v6186_v19  ;;  %v6187_v12 = vunpack.i.l.bf16 %v6186_v19  ;;  %5458 = vmatmul.mubr.msk.bf16.vlgmr.msra.gmra.mrb[28].mxu1 %vm2817_vm1, %v7960_v55  ;;  %v2542_v11 = vmax.f32 %v8978_v20, %v6183_v21  ;;  %v2798_v40 = vpack.c.bf16 %v2762_v23, %v2760_v34 }
 0x35c   :  { %3076 = vmatprep.subr.bf16.mxu1 %v2799_v61  ;;  %v3074_v29 = vand.u32 %v7932_v52, %v2801_v28  ;;  %3108 = vmatprep.mubr.bf16.mxu1 %v8956_v15  ;;  %v2451_v0 = vsel %vm2432_vm14, %v6182_v31, %v6183_v21  ;;  %v3071_v49 = vand.u32 %v7932_v52, %v2800_v56  ;;  %v8990_v21 = vmax.f32 %v8989_v54, 0.0  ;;  %v8991_v61 = vld [vmem:[#allocation22_spill] sm:$0xff] }
 0x35d   :  { %v2544_v10 = vmax.f32 %v8979_v35, %v6188_v18  ;;  %v2452_v36 = vsel %vm2432_vm14, %v6187_v12, %v6188_v18  ;;  %3077 = vmatpush1.bf16.msra.mxu1 %v2798_v40  ;;  %v2665_v53 = vrot.slane %v2542_v11, 1  ;;  %v2541_v37 = vmax.f32 %v8982_v57, %v2451_v0  ;;  %v8993_v40 = vld [vmem:[#allocation21_spill] sm:$0xff]  ;;  %v8997_v57 = vld [vmem:[#allocation23_spill] sm:$0xff] }
 0x35e   :  { %v2543_v63 = vmax.f32 %v8980_v51, %v2452_v36  ;;  %3078 = vmatprep.subr.bf16.mxu1 %v3074_v29  ;;  %v8992_v34 = vmax.f32 %v8991_v61, 0.0  ;;  %v8994_v29 = vmax.f32 %v8993_v40, 0.0 }
 0x35f   :  { %v2666_v59 = vrot.slane %v2544_v10, 1  ;;  %v2662_v4 = vrot.slane %v2541_v37, 1 }
 0x360   :  { %v6191_v27 = vpop.permute.xlu0 %6190  ;;  %v2663_v17 = vrot.slane %v2543_v63, 1 }
 0x361   :  { %v6193_v62 = vunpack.i.h.bf16 %v6191_v27  ;;  %v6192_v3 = vunpack.i.l.bf16 %v6191_v27  ;;  %3079 = vmatpush1.bf16.msra.mxu1 %v3071_v49  ;;  %v2667_v14 = vsel %vm2601_vm15, %v2665_v53, %v2666_v59 }
 0x362   :  { %v6196_v26 = vpop.permute.xlu1 %6195  ;;  %v2767_v50 = vmax.f32 %v2542_v11, %v2667_v14  ;;  %v2664_v58 = vsel %vm2601_vm15, %v2662_v4, %v2663_v17 }
 0x363   :  { %v2546_v42 = vmax.f32 %v8984_v32, %v6193_v62  ;;  %v2453_v8 = vsel %vm2432_vm14, %v6192_v3, %v6193_v62  ;;  %v6198_v6 = vunpack.i.h.bf16 %v6196_v26  ;;  %v6197_v38 = vunpack.i.l.bf16 %v6196_v26 }
 0x364   :  { %v2545_v44 = vmax.f32 %v8986_v25, %v2453_v8  ;;  %5459 = vmatmul.mubr.msk.bf16.vlgmr.msra.gmra.mrb[32].mxu1 %vm2817_vm1, %v7960_v55  ;;  %v2766_v19 = vmax.f32 %v2541_v37, %v2664_v58  ;;  %v8998_v37 = vmax.f32 %v8997_v57, 0.0  ;;  %v6273_v58 = vld [vmem:[#allocation4 + $0x50] sm:$0xff]  }
 0x365   :  { %v2670_v9 = vrot.slane %v2546_v42, 1  ;;  %3157 = vmatprep.mubr.bf16.mxu1 %v8956_v15  ;;  %v2454_v22 = vsel %vm2432_vm14, %v6197_v38, %v6198_v6  ;;  %v2548_v41 = vmax.f32 %v8988_v46, %v6198_v6  ;;  %v6277_v46 = vld [vmem:[#allocation4 + $0x70] sm:$0xff]  }
 0x366   :  { %v2668_v45 = vrot.slane %v2545_v44, 1  ;;  %v2547_v23 = vmax.f32 %v8990_v21, %v2454_v22 }
 0x367   :  { %v2771_v60 = vmax.f32 %v2546_v42, %v2670_v9  ;;  %v2671_v1 = vsel %vm2601_vm15, %v2666_v59, %v2670_v9  ;;  %v2675_v0 = vrot.slane %v2548_v41, 1 }
 0x368   :  { %v2770_v24 = vmax.f32 %v2545_v44, %v2668_v45  ;;  %v6201_v30 = vpop.permute.xlu0 %6200  ;;  %v2769_v43 = vmax.f32 %v2544_v10, %v2671_v1  ;;  %v2669_v48 = vsel %vm2601_vm15, %v2663_v17, %v2668_v45  ;;  %v2672_v49 = vrot.slane %v2547_v23, 1  ;;  %v6272_v1 = vld [vmem:[#allocation4 + $0x48] sm:$0xff]  }
 0x369   :  { %v6203_v39 = vunpack.i.h.bf16 %v6201_v30  ;;  %v6202_v47 = vunpack.i.l.bf16 %v6201_v30  ;;  %v2768_v7 = vmax.f32 %v2543_v63, %v2669_v48  ;;  %v2805_v13 = vpack.c.bf16 %v2771_v60, %v2771_v60  ;;  %v8995_v63 = vld [vmem:[#allocation24_spill] sm:$0xff] }
 0x36a   :  { %v6206_v28 = vpop.permute.xlu1 %6205  ;;  %v2803_v31 = vpack.c.bf16 %v2769_v43, %v2767_v50  ;;  %v2804_v36 = vpack.c.bf16 %v2770_v24, %v2770_v24  ;;  %v8996_v59 = vmax.f32 %v8995_v63, 0.0  ;;  %v6274_v24 = vld [vmem:[#allocation4 + $0x58] sm:$0xff]   ;;  %v6280_v30 = vld [vmem:[#allocation4 + $0x88] sm:$0x1f]  }
 0x36b   :  { %v2550_v18 = vmax.f32 %v8992_v34, %v6203_v39  ;;  %v2455_v12 = vsel %vm2432_vm14, %v6202_v47, %v6203_v39  ;;  %v6208_v20 = vunpack.i.h.bf16 %v6206_v28  ;;  %v6207_v11 = vunpack.i.l.bf16 %v6206_v28 }
 0x36c   :  { %v2549_v56 = vmax.f32 %v8994_v29, %v2455_v12  ;;  %3125 = vmatprep.subr.bf16.mxu1 %v2803_v31  ;;  %v2802_v35 = vpack.c.bf16 %v2768_v7, %v2766_v19  ;;  %v3123_v10 = vand.u32 %v7932_v52, %v2805_v13  ;;  %v3120_v14 = vand.u32 %v7932_v52, %v2804_v36 }
 0x36d   :  { %v2676_v51 = vrot.slane %v2550_v18, 1  ;;  %v2552_v53 = vmax.f32 %v8996_v59, %v6208_v20  ;;  %v2456_v27 = vsel %vm2432_vm14, %v6207_v11, %v6208_v20  ;;  %v3542_v43 = vsel %vm3540_vm2, %v6280_v30, 0 }
 0x36e   :  { %v2673_v5 = vrot.slane %v2549_v56, 1  ;;  %v2551_v62 = vmax.f32 %v8998_v37, %v2456_v27  ;;  %3126 = vmatpush1.bf16.msra.mxu1 %v2802_v35 }
 0x36f   :  { %v2680_v3 = vrot.slane %v2552_v53, 1  ;;  %3127 = vmatprep.subr.bf16.mxu1 %v3123_v10  ;;  %v2677_v17 = vsel %vm2601_vm15, %v2675_v0, %v2676_v51 }
 0x370   :  { %v2678_v26 = vrot.slane %v2551_v62, 1  ;;  %v2674_v16 = vsel %vm2601_vm15, %v2672_v49, %v2673_v5  ;;  %v2773_v6 = vmax.f32 %v2548_v41, %v2677_v17  ;;  %v6279_v41 = vld [vmem:[#allocation4 + $0x80] sm:$0xff]  }
 0x371   :  { %v2777_v32 = vmax.f32 %v2552_v53, %v2680_v3  ;;  %v2681_v42 = vsel %vm2601_vm15, %v2676_v51, %v2680_v3  ;;  %v2772_v25 = vmax.f32 %v2547_v23, %v2674_v16 }
 0x372   :  { %v2776_v8 = vmax.f32 %v2551_v62, %v2678_v26  ;;  %3128 = vmatpush1.bf16.msra.mxu1 %v3120_v14  ;;  %v2775_v38 = vmax.f32 %v2550_v18, %v2681_v42  ;;  %v2679_v2 = vsel %vm2601_vm15, %v2673_v5, %v2678_v26 }
 0x373   :  { %v2774_v44 = vmax.f32 %v2549_v56, %v2679_v2  ;;  %v2809_v4 = vpack.c.bf16 %v2777_v32, %v2777_v32 }
 0x374   :  { %v2807_v9 = vpack.c.bf16 %v2775_v38, %v2773_v6  ;;  %v2808_v60 = vpack.c.bf16 %v2776_v8, %v2776_v8 }
 0x375   :  { %5460 = vmatmul.mubr.msk.bf16.vlgmr.msra.gmra.mrb[36].mxu1 %vm2817_vm1, %v7960_v55  ;;  %v2806_v45 = vpack.c.bf16 %v2774_v44, %v2772_v25  ;;  %v3172_v50 = vand.u32 %v7932_v52, %v2809_v4 }
 0x376   :  { %3174 = vmatprep.subr.bf16.mxu1 %v2807_v9  ;;  %3206 = vmatprep.mubr.bf16.mxu1 %v8956_v15  ;;  %v3169_v22 = vand.u32 %v7932_v52, %v2808_v60  ;;  %v6276_v52 = vld [vmem:[#allocation4 + $0x68] sm:$0xff]  }
 0x377   :  { %3175 = vmatpush1.bf16.msra.mxu1 %v2806_v45 }
 0x378   :  { %3176 = vmatprep.subr.bf16.mxu1 %v3172_v50 }
 0x37b   :  { %3177 = vmatpush1.bf16.msra.mxu1 %v3169_v22 }
 0x37c   :  { %3544 = vmatprep.subr.bf16.mxu1 %v8956_v15 }
 0x37e   :  { %5461 = vmatmul.mubr.msk.bf16.vlgmr.msra.gmra.mrb[40].mxu1 %vm2817_vm1, %v7960_v55  ;;  %v6278_v55 = vld [vmem:[#allocation4 + $0x78] sm:$0xff]  }
 0x37f   :  { %3545 = vmatpush1.bf16.msra.mxu1 %v6272_v1 }
 0x380   :  { %3546 = vmatprep.subr.bf16.mxu1 %v8956_v15 }
 0x383   :  { %3547 = vmatpush1.bf16.msra.mxu1 %v6273_v58 }
 0x384   :  { %3548 = vmatprep.subr.bf16.mxu1 %v8956_v15 }
 0x387   :  { %3549 = vmatpush1.bf16.msra.mxu1 %v6274_v24 }
 0x388   :  { %3550 = vmatprep.subr.bf16.mxu1 %v8956_v15 }
 0x38b   :  { %3551 = vmatpush1.bf16.msra.mxu1 %v6275_v33 }
 0x38c   :  { %3552 = vmatprep.subr.bf16.mxu1 %v8956_v15 }
 0x38f   :  { %3553 = vmatpush1.bf16.msra.mxu1 %v6276_v52 }
 0x390   :  { %3554 = vmatprep.subr.bf16.mxu1 %v8956_v15 }
 0x393   :  { %3555 = vmatpush1.bf16.msra.mxu1 %v6277_v46 }
 0x394   :  { %3556 = vmatprep.subr.bf16.mxu1 %v8956_v15 }
 0x397   :  { %3557 = vmatpush1.bf16.msra.mxu1 %v6278_v55 }
 0x398   :  { %3558 = vmatprep.subr.bf16.mxu1 %v8956_v15 }
 0x39b   :  { %3559 = vmatpush1.bf16.msra.mxu1 %v6279_v41 }
 0x39c   :  { %3560 = vmatprep.subr.bf16.mxu1 %v8956_v15 }
 0x39f   :  { %3561 = vmatpush1.bf16.msra.mxu1 %v3542_v43 }
 0x3a0   :  { %3689 = vmatprep.subr.bf16.mxu1 %v8956_v15 }
 0x3fe   :  { %v8125_v48 = vpop.f32.mrb[12].mxu1 }
 0x3ff   :  { %v8127_v39 = vpop.f32.mrb[13].mxu1 }
 0x400   :  { %v5693_v47 = vpack.c.bf16 %v8127_v39, %v8125_v48  ;;  %v2869_v7 = vpop.f32.mrb[14].mxu1 }
 0x401   :  { %v2871_v13 = vpop.f32.mrb[15].mxu1 }
 0x402   :  { %v3316_v54 = vshrl.u32 %v5693_v47, 16  ;;  %v3319_v21 = vshll.u32 %v5693_v47, 16  ;;  %v5520_v23 = vrot.slane %v5693_v47, 9  ;;  %v5570_v28 = vrot.slane %v5693_v47, 10 }
 0x403   :  { %v5694_v31 = vpack.c.bf16 %v2871_v13, %v2869_v7 }
 0x404   :  { %v3318_v19 = vrot.slane %v3316_v54, 4  ;;  %v3321_v61 = vrot.slane %v3319_v21, 5  ;;  %v3974_v34 = vrot.slane %v3316_v54, 5  ;;  %v3975_v18 = vrot.slane %v3319_v21, 6 }
 0x405   :  { %v3325_v12 = vshll.u32 %v5694_v31, 16  ;;  %v3756_v20 = vrot.slane %v5694_v31, 5  ;;  %v3978_v11 = vshrl.u32 %v5694_v31, 16  ;;  %v4244_v40 = vrot.slane %v5694_v31, 6 }
 0x406   :  { %v3322_v29 = vor.u32 %v3321_v61, %v3318_v19  ;;  %v3976_v56 = vor.u32 %v3975_v18, %v3974_v34  ;;  %v6281_v19 = vld [vmem:[#allocation4] sm:$0xff]  }
 0x407   :  { %v3327_v35 = vrot.slane %v3325_v12, 5  ;;  %v3980_v10 = vrot.slane %v3978_v11, 5  ;;  %v3981_v36 = vrot.slane %v3325_v12, 6  ;;  %v8133_v51 = vsel %vm7031_vm10, %v5520_v23, %v3756_v20 }
 0x408   :  { %v3323_v59 = vrot.slane %v3322_v29, 4  ;;  %v3977_v53 = vrot.slane %v3976_v56, 4  ;;  %v8139_v49 = vsel %vm7422_vm13, %v5570_v28, %v4244_v40  ;;  %v6282_v56 = vld [vmem:[#allocation4 + $0x8] sm:$0xff]  }
 0x409   :  { %v8135_v63 = vpop.f32.mrb[16].mxu1  ;;  %v3982_v5 = vor.u32 %v3981_v36, %v3980_v10 }
 0x40a   :  { %v8143_v37 = vpop.f32.mrb[17].mxu1  ;;  %v3328_v14 = vsel %vm6664_vm3, %v3323_v59, %v3327_v35  ;;  %v9005_v32 = vpack.c.bf16 %v8135_v63, %v8125_v48 }
 0x40b   :  { %v5695_v62 = vpack.c.bf16 %v8143_v37, %v8135_v63  ;;  %v2918_v17 = vpop.f32.mrb[18].mxu1  ;;  %v8153_v42 = vsel %vm6971_vm7, %v3977_v53, %v3982_v5  ;;  %v9004_v26 = vpack.c.bf16 %v8143_v37, %v8127_v39  ;;  %v6293_v63 = vld [vmem:[#allocation4 + $0xa8] sm:$0xff]   ;;  %v6294_v37 = vld [vmem:[#allocation4 + $0xb0] sm:$0xff]  }
 0x40c   :  { %v2920_v16 = vpop.f32.mrb[19].mxu1 }
 0x40d   :  { %v3330_v8 = vshrl.u32 %v5695_v62, 16  ;;  %v3333_v6 = vshll.u32 %v5695_v62, 16  ;;  %v5521_v38 = vrot.slane %v5695_v62, 9  ;;  %v5571_v2 = vrot.slane %v5695_v62, 10 }
 0x40e   :  { %v5696_v25 = vpack.c.bf16 %v2920_v16, %v2918_v17 }
 0x40f   :  { %v3332_v44 = vrot.slane %v3330_v8, 4  ;;  %v3335_v4 = vrot.slane %v3333_v6, 5  ;;  %v3984_v9 = vrot.slane %v3330_v8, 5  ;;  %v3985_v45 = vrot.slane %v3333_v6, 6 }
 0x410   :  { %v3339_v50 = vshll.u32 %v5696_v25, 16  ;;  %v3760_v60 = vrot.slane %v5696_v25, 5  ;;  %v3988_v22 = vshrl.u32 %v5696_v25, 16  ;;  %v4248_v1 = vrot.slane %v5696_v25, 6 }
 0x411   :  { %v3336_v58 = vor.u32 %v3335_v4, %v3332_v44  ;;  %v3986_v24 = vor.u32 %v3985_v45, %v3984_v9 }
 0x412   :  { %v3341_v33 = vrot.slane %v3339_v50, 5  ;;  %v3990_v52 = vrot.slane %v3988_v22, 5  ;;  %v3991_v46 = vrot.slane %v3339_v50, 6  ;;  %v8157_v55 = vsel %vm7031_vm10, %v5521_v38, %v3760_v60 }
 0x413   :  { %v3337_v41 = vrot.slane %v3336_v58, 4  ;;  %v3987_v47 = vrot.slane %v3986_v24, 4  ;;  %v8165_v13 = vsel %vm7422_vm13, %v5571_v2, %v4248_v1  ;;  %v6283_v2 = vld [vmem:[#allocation4 + $0x10] sm:$0xff]  }
 0x414   :  { %v3992_v7 = vor.u32 %v3991_v46, %v3990_v52  ;;  %v6284_v46 = vld [vmem:[#allocation4 + $0x18] sm:$0xff]  }
 0x415   :  { %v3342_v54 = vsel %vm6664_vm3, %v3337_v41, %v3341_v33 }
 0x416   :  { %v5479_v28 = vcombine.high %v3328_v14, %v3342_v54  ;;  %v5478_v31 = vcombine.low %v3328_v14, %v3342_v54  ;;  %v8175_v61 = vsel %vm6971_vm7, %v3987_v47, %v3992_v7  ;;  %v8177_v34 = vpop.f32.mrb[20].mxu1 }
 0x417   :  { %v8183_v20 = vpop.f32.mrb[21].mxu1 }
 0x418   :  { %5495 = vmatprep.mubr.msk.bf16.mxu1 %vm3527_vm4, %v5479_v28  ;;  %v5697_v11 = vpack.c.bf16 %v8183_v20, %v8177_v34  ;;  %v2967_v40 = vpop.f32.mrb[22].mxu1 }
 0x419   :  { %3577 = vmatmul.mubr.bf16.vlgmr.msra.gmra.mrb[44].mxu1 %v5478_v31  ;;  %v2969_v29 = vpop.f32.mrb[23].mxu1 }
 0x41a   :  { %3690 = vmatpush1.bf16.msra.mxu1 %v6281_v19  ;;  %v3344_v35 = vshrl.u32 %v5697_v11, 16  ;;  %v3347_v10 = vshll.u32 %v5697_v11, 16  ;;  %v5522_v36 = vrot.slane %v5697_v11, 9  ;;  %v5572_v59 = vrot.slane %v5697_v11, 10 }
 0x41b   :  { %3691 = vmatprep.subr.bf16.mxu1 %v8956_v15  ;;  %v5698_v53 = vpack.c.bf16 %v2969_v29, %v2967_v40 }
 0x41c   :  { %v3346_v5 = vrot.slane %v3344_v35, 4  ;;  %v3349_v62 = vrot.slane %v3347_v10, 5  ;;  %v3994_v17 = vrot.slane %v3344_v35, 5  ;;  %v3995_v14 = vrot.slane %v3347_v10, 6  ;;  %v6285_v35 = vld [vmem:[#allocation4 + $0x20] sm:$0xff]  }
 0x41d   :  { %v3353_v16 = vshll.u32 %v5698_v53, 16  ;;  %v3764_v8 = vrot.slane %v5698_v53, 5  ;;  %v3998_v6 = vshrl.u32 %v5698_v53, 16  ;;  %v4252_v38 = vrot.slane %v5698_v53, 6 }
 0x41e   :  { %3692 = vmatpush1.bf16.msra.mxu1 %v6282_v56  ;;  %v3350_v25 = vor.u32 %v3349_v62, %v3346_v5  ;;  %v3996_v44 = vor.u32 %v3995_v14, %v3994_v17 }
 0x41f   :  { %3693 = vmatprep.subr.bf16.mxu1 %v8956_v15  ;;  %v3355_v4 = vrot.slane %v3353_v16, 5  ;;  %v4000_v9 = vrot.slane %v3998_v6, 5  ;;  %v4001_v45 = vrot.slane %v3353_v16, 6  ;;  %v8192_v50 = vsel %vm7031_vm10, %v5522_v36, %v3764_v8  ;;  %v8194_v60 = vpop.f32.mrb[24].mxu1 }
 0x420   :  { %v3351_v22 = vrot.slane %v3350_v25, 4  ;;  %v3997_v1 = vrot.slane %v3996_v44, 4  ;;  %v8198_v58 = vsel %vm7422_vm13, %v5572_v59, %v4252_v38  ;;  %v8202_v52 = vpop.f32.mrb[25].mxu1  ;;  %v6286_v25 = vld [vmem:[#allocation4 + $0x28] sm:$0xff]   ;;  %v9007_v39 = vpack.c.bf16 %v8194_v60, %v8177_v34  ;;  %v6295_v34 = vld [vmem:[#allocation4 + $0xb8] sm:$0xff]  }
 0x421   :  { %v4002_v24 = vor.u32 %v4001_v45, %v4000_v9  ;;  %v5699_v41 = vpack.c.bf16 %v8202_v52, %v8194_v60  ;;  %v3016_v7 = vpop.f32.mrb[26].mxu1  ;;  %v6296_v60 = vld [vmem:[#allocation4 + $0xc0] sm:$0xff]  }
 0x422   :  { %3694 = vmatpush1.bf16.msra.mxu1 %v6283_v2  ;;  %v3356_v54 = vsel %vm6664_vm3, %v3351_v22, %v3355_v4  ;;  %v3018_v28 = vpop.f32.mrb[27].mxu1 }
 0x423   :  { %3695 = vmatprep.subr.bf16.mxu1 %v8956_v15  ;;  %v8213_v31 = vsel %vm6971_vm7, %v3997_v1, %v4002_v24  ;;  %v3358_v19 = vshrl.u32 %v5699_v41, 16  ;;  %v3361_v11 = vshll.u32 %v5699_v41, 16  ;;  %v5523_v40 = vrot.slane %v5699_v41, 9 }
 0x424   :  { %v5573_v29 = vrot.slane %v5699_v41, 10  ;;  %v5700_v56 = vpack.c.bf16 %v3018_v28, %v3016_v7 }
 0x425   :  { %v3360_v10 = vrot.slane %v3358_v19, 4  ;;  %v3363_v36 = vrot.slane %v3361_v11, 5  ;;  %v4004_v59 = vrot.slane %v3358_v19, 5  ;;  %v4005_v53 = vrot.slane %v3361_v11, 6  ;;  %v6287_v11 = vld [vmem:[#allocation4 + $0x30] sm:$0xff]  }
 0x426   :  { %3696 = vmatpush1.bf16.msra.mxu1 %v6284_v46  ;;  %v3367_v5 = vshll.u32 %v5700_v56, 16  ;;  %v3768_v62 = vrot.slane %v5700_v56, 5  ;;  %v4008_v17 = vshrl.u32 %v5700_v56, 16  ;;  %v4256_v14 = vrot.slane %v5700_v56, 6 }
 0x427   :  { %3697 = vmatprep.subr.bf16.mxu1 %v8956_v15  ;;  %v3364_v16 = vor.u32 %v3363_v36, %v3360_v10  ;;  %v4006_v8 = vor.u32 %v4005_v53, %v4004_v59  ;;  %v6288_v53 = vld [vmem:[#allocation4 + $0x38] sm:$0xff]  }
 0x428   :  { %v3369_v6 = vrot.slane %v3367_v5, 5  ;;  %v4010_v38 = vrot.slane %v4008_v17, 5  ;;  %v4011_v2 = vrot.slane %v3367_v5, 6  ;;  %v8218_v44 = vsel %vm7031_vm10, %v5523_v40, %v3768_v62  ;;  %v6289_v17 = vld [vmem:[#allocation4 + $0x40] sm:$0x1f]  }
 0x429   :  { %v3365_v4 = vrot.slane %v3364_v16, 4  ;;  %v4007_v22 = vrot.slane %v4006_v8, 4  ;;  %v8227_v24 = vsel %vm7422_vm13, %v5573_v29, %v4256_v14 }
 0x42a   :  { %3698 = vmatpush1.bf16.msra.mxu1 %v6285_v35  ;;  %v4012_v1 = vor.u32 %v4011_v2, %v4010_v38 }
 0x42b   :  { %3699 = vmatprep.subr.bf16.mxu1 %v8956_v15  ;;  %v3370_v46 = vsel %vm6664_vm3, %v3365_v4, %v3369_v6 }
 0x42c   :  { %v5481_v28 = vcombine.high %v3356_v54, %v3370_v46  ;;  %v5480_v19 = vcombine.low %v3356_v54, %v3370_v46  ;;  %v8237_v40 = vsel %vm6971_vm7, %v4007_v22, %v4012_v1 }
 0x42e   :  { %3700 = vmatpush1.bf16.msra.mxu1 %v6286_v25  ;;  %v8239_v56 = vpop.f32.mrb[28].mxu1  ;;  %5496 = vmatprep.mubr.msk.bf16.mxu1 %vm3527_vm4, %v5481_v28 }
 0x42f   :  { %3701 = vmatprep.subr.bf16.mxu1 %v8956_v15  ;;  %v8247_v10 = vpop.f32.mrb[29].mxu1  ;;  %3585 = vmatmul.mubr.bf16.gmra.mrb[48].mxu1 %v5480_v19  ;;  %v3687_v19 = vsel %vm3540_vm2, %v6289_v17, 0 }
 0x430   :  { %v5701_v54 = vpack.c.bf16 %v8247_v10, %v8239_v56  ;;  %v3065_v36 = vpop.f32.mrb[30].mxu1 }
 0x431   :  { %v3067_v59 = vpop.f32.mrb[31].mxu1 }
 0x432   :  { %3702 = vmatpush1.bf16.msra.mxu1 %v6287_v11  ;;  %v3372_v5 = vshrl.u32 %v5701_v54, 16  ;;  %v3375_v62 = vshll.u32 %v5701_v54, 16  ;;  %v5524_v14 = vrot.slane %v5701_v54, 9  ;;  %v5574_v16 = vrot.slane %v5701_v54, 10 }
 0x433   :  { %3703 = vmatprep.subr.bf16.mxu1 %v8956_v15  ;;  %v5702_v8 = vpack.c.bf16 %v3067_v59, %v3065_v36 }
 0x434   :  { %v3374_v6 = vrot.slane %v3372_v5, 4  ;;  %v3377_v38 = vrot.slane %v3375_v62, 5  ;;  %v4014_v2 = vrot.slane %v3372_v5, 5  ;;  %v4015_v25 = vrot.slane %v3375_v62, 6 }
 0x435   :  { %v3381_v4 = vshll.u32 %v5702_v8, 16  ;;  %v3772_v22 = vrot.slane %v5702_v8, 5  ;;  %v4018_v1 = vshrl.u32 %v5702_v8, 16  ;;  %v4260_v46 = vrot.slane %v5702_v8, 6 }
 0x436   :  { %3704 = vmatpush1.bf16.msra.mxu1 %v6288_v53  ;;  %v3378_v28 = vor.u32 %v3377_v38, %v3374_v6  ;;  %v4016_v11 = vor.u32 %v4015_v25, %v4014_v2 }
 0x437   :  { %3705 = vmatprep.subr.bf16.mxu1 %v8956_v15  ;;  %v3383_v7 = vrot.slane %v3381_v4, 5  ;;  %v4020_v41 = vrot.slane %v4018_v1, 5  ;;  %v4021_v21 = vrot.slane %v3381_v4, 6  ;;  %v8256_v54 = vsel %vm7031_vm10, %v5524_v14, %v3772_v22  ;;  %v8258_v36 = vpop.f32.mrb[32].mxu1 }
 0x438   :  { %v3379_v59 = vrot.slane %v3378_v28, 4  ;;  %v4017_v5 = vrot.slane %v4016_v11, 4  ;;  %v8262_v53 = vsel %vm7422_vm13, %v5574_v16, %v4260_v46  ;;  %v8266_v8 = vpop.f32.mrb[33].mxu1 }
 0x439   :  { %v4022_v62 = vor.u32 %v4021_v21, %v4020_v41  ;;  %v5703_v6 = vpack.c.bf16 %v8266_v8, %v8258_v36  ;;  %v3114_v38 = vpop.f32.mrb[34].mxu1  ;;  %v9008_v48 = vpack.c.bf16 %v8266_v8, %v8247_v10  ;;  %v9011_v10 = vcombine.high %v8133_v51, %v8157_v55 }
 0x43a   :  { %3706 = vmatpush1.bf16.msra.mxu1 %v3687_v19  ;;  %v3384_v2 = vsel %vm6664_vm3, %v3379_v59, %v3383_v7  ;;  %v3116_v16 = vpop.f32.mrb[35].mxu1 }
 0x43b   :  { %3901 = vmatprep.subr.bf16.mxu1 %v8956_v15  ;;  %v8277_v21 = vsel %vm6971_vm7, %v4017_v5, %v4022_v62  ;;  %v3386_v41 = vshrl.u32 %v5703_v6, 16  ;;  %v3389_v25 = vshll.u32 %v5703_v6, 16  ;;  %v5525_v4 = vrot.slane %v5703_v6, 9 }
 0x43c   :  { %v5575_v22 = vrot.slane %v5703_v6, 10  ;;  %v5704_v1 = vpack.c.bf16 %v3116_v16, %v3114_v38 }
 0x43d   :  { %v3388_v46 = vrot.slane %v3386_v41, 4  ;;  %v3391_v28 = vrot.slane %v3389_v25, 5  ;;  %v4024_v19 = vrot.slane %v3386_v41, 5  ;;  %v4025_v11 = vrot.slane %v3389_v25, 6 }
 0x43e   :  { %v3395_v23 = vshll.u32 %v5704_v1, 16  ;;  %v3776_v35 = vrot.slane %v5704_v1, 5  ;;  %v4028_v29 = vshrl.u32 %v5704_v1, 16  ;;  %v4264_v7 = vrot.slane %v5704_v1, 6 }
 0x43f   :  { %v3392_v59 = vor.u32 %v3391_v28, %v3388_v46  ;;  %v4026_v18 = vor.u32 %v4025_v11, %v4024_v19 }
 0x440   :  { %v3397_v12 = vrot.slane %v3395_v23, 5  ;;  %v4030_v45 = vrot.slane %v4028_v29, 5  ;;  %v4031_v9 = vrot.slane %v3395_v23, 6  ;;  %v8281_v5 = vsel %vm7031_vm10, %v5525_v4, %v3776_v35 }
 0x441   :  { %v3393_v62 = vrot.slane %v3392_v59, 4  ;;  %v4027_v16 = vrot.slane %v4026_v18, 4  ;;  %v8289_v25 = vsel %vm7422_vm13, %v5575_v22, %v4264_v7 }
 0x442   :  { %v4032_v41 = vor.u32 %v4031_v9, %v4030_v45  ;;  %9003 = vst [vmem:[#allocation16_spill] sm:$0xff] %v8289_v25 }
 0x443   :  { %v3398_v23 = vsel %vm6664_vm3, %v3393_v62, %v3397_v12 }
 0x444   :  { %v5483_v4 = vcombine.high %v3384_v2, %v3398_v23  ;;  %v5482_v1 = vcombine.low %v3384_v2, %v3398_v23  ;;  %v8299_v46 = vsel %vm6971_vm7, %v4027_v16, %v4032_v41 }
 0x446   :  { %5497 = vmatprep.mubr.msk.bf16.mxu1 %vm3527_vm4, %v5483_v4 }
 0x447   :  { %3593 = vmatmul.mubr.bf16.gmra.mrb[52].mxu1 %v5482_v1 }
 0x448   :  { %v8306_v12 = vpop.f32.mrb[36].mxu1 }
 0x449   :  { %v8308_v45 = vpop.f32.mrb[37].mxu1 }
 0x44a   :  { %v5705_v2 = vpack.c.bf16 %v8308_v45, %v8306_v12  ;;  %v3163_v22 = vpop.f32.mrb[38].mxu1 }
 0x44b   :  { %v3165_v28 = vpop.f32.mrb[39].mxu1 }
 0x44c   :  { %v3400_v19 = vshrl.u32 %v5705_v2, 16  ;;  %v3403_v11 = vshll.u32 %v5705_v2, 16  ;;  %v5526_v7 = vrot.slane %v5705_v2, 9  ;;  %v5576_v59 = vrot.slane %v5705_v2, 10 }
 0x44d   :  { %v5706_v62 = vpack.c.bf16 %v3165_v28, %v3163_v22 }
 0x44e   :  { %v3402_v16 = vrot.slane %v3400_v19, 4  ;;  %v3405_v41 = vrot.slane %v3403_v11, 5  ;;  %v4034_v23 = vrot.slane %v3400_v19, 5  ;;  %v4035_v35 = vrot.slane %v3403_v11, 6 }
 0x44f   :  { %v3409_v4 = vshll.u32 %v5706_v62, 16  ;;  %v3780_v29 = vrot.slane %v5706_v62, 5  ;;  %v4038_v9 = vshrl.u32 %v5706_v62, 16  ;;  %v4268_v1 = vrot.slane %v5706_v62, 6 }
 0x450   :  { %v3406_v18 = vor.u32 %v3405_v41, %v3402_v16  ;;  %v4036_v38 = vor.u32 %v4035_v35, %v4034_v23 }
 0x451   :  { %v4040_v6 = vrot.slane %v4038_v9, 5  ;;  %v4041_v30 = vrot.slane %v3409_v4, 6  ;;  %v8312_v43 = vpop.f32.mrb[40].mxu1  ;;  %v8316_v17 = vsel %vm7031_vm10, %v5526_v7, %v3780_v29  ;;  %v3411_v2 = vrot.slane %v3409_v4, 5 }
 0x452   :  { %v8320_v28 = vpop.f32.mrb[41].mxu1  ;;  %v3407_v19 = vrot.slane %v3406_v18, 4  ;;  %v4037_v11 = vrot.slane %v4036_v38, 4  ;;  %v8328_v29 = vsel %vm7422_vm13, %v5576_v59, %v4268_v1 }
 0x453   :  { %v4042_v14 = vor.u32 %v4041_v30, %v4040_v6  ;;  %v5707_v35 = vpack.c.bf16 %v8320_v28, %v8312_v43  ;;  %v5716_v9 = vpack.c.bf16 %v8320_v28, %v8308_v45  ;;  %v3212_v62 = vpop.f32.mrb[42].mxu1 }
 0x454   :  { %v3214_v7 = vpop.f32.mrb[43].mxu1  ;;  %v3412_v16 = vsel %vm6664_vm3, %v3407_v19, %v3411_v2 }
 0x455   :  { %v3414_v41 = vshrl.u32 %v5707_v35, 16  ;;  %v3417_v23 = vshll.u32 %v5707_v35, 16  ;;  %v5527_v18 = vrot.slane %v5707_v35, 9  ;;  %v5708_v38 = vpack.c.bf16 %v3214_v7, %v3212_v62 }
 0x456   :  { %v8334_v30 = vsel %vm6971_vm7, %v4037_v11, %v4042_v14  ;;  %v5577_v47 = vrot.slane %v5707_v35, 10 }
 0x457   :  { %v3416_v6 = vrot.slane %v3414_v41, 4  ;;  %v3419_v4 = vrot.slane %v3417_v23, 5  ;;  %v4044_v45 = vrot.slane %v3414_v41, 5  ;;  %v4045_v28 = vrot.slane %v3417_v23, 6 }
 0x458   :  { %v3423_v22 = vshll.u32 %v5708_v38, 16  ;;  %v3784_v33 = vrot.slane %v5708_v38, 5  ;;  %v4048_v59 = vshrl.u32 %v5708_v38, 16  ;;  %v4272_v1 = vrot.slane %v5708_v38, 6 }
 0x459   :  { %v3420_v57 = vor.u32 %v3419_v4, %v3416_v6  ;;  %v4046_v3 = vor.u32 %v4045_v28, %v4044_v45  ;;  %v6292_v6 = vld [vmem:[#allocation4 + $0xa0] sm:$0xff]   ;;  %v6301_v45 = vld [vmem:[#allocation4 + $0xe8] sm:$0xff]   ;;  %v9014_v28 = vcombine.low %v8192_v50, %v8218_v44 }
 0x45a   :  { %v3425_v2 = vrot.slane %v3423_v22, 5  ;;  %v4050_v19 = vrot.slane %v4048_v59, 5  ;;  %v4051_v25 = vrot.slane %v3423_v22, 6  ;;  %v8338_v62 = vsel %vm7031_vm10, %v5527_v18, %v3784_v33  ;;  %v6300_v4 = vld [vmem:[#allocation4 + $0xe0] sm:$0xff]   ;;  %v6303_v59 = vld [vmem:[#allocation4 + $0xf8] sm:$0xff]  }
 0x45b   :  { %v3421_v14 = vrot.slane %v3420_v57, 4  ;;  %v5535_v11 = vcombine.high %v8316_v17, %v8338_v62  ;;  %v5534_v7 = vcombine.low %v8316_v17, %v8338_v62  ;;  %v4047_v41 = vrot.slane %v4046_v3, 4 }
 0x45c   :  { %v4052_v23 = vor.u32 %v4051_v25, %v4050_v19  ;;  %v8346_v35 = vsel %vm7422_vm13, %v5577_v47, %v4272_v1  ;;  %v6290_v47 = vld [vmem:[#allocation4 + $0x90] sm:$0xff]   ;;  %v9006_v25 = vpack.c.bf16 %v8202_v52, %v8183_v20  ;;  %v9009_v20 = vpack.c.bf16 %v8258_v36, %v8239_v56  ;;  %v6297_v56 = vld [vmem:[#allocation4 + $0xc8] sm:$0xff]  }
 0x45d   :  { %v3426_v22 = vsel %vm6664_vm3, %v3421_v14, %v3425_v2  ;;  %v5585_v0 = vcombine.high %v8328_v29, %v8346_v35  ;;  %v5584_v57 = vcombine.low %v8328_v29, %v8346_v35  ;;  %v9010_v52 = vpack.c.bf16 %v8312_v43, %v8306_v12  ;;  %v6298_v36 = vld [vmem:[#allocation4 + $0xd0] sm:$0x1f]   ;;  %v6307_v2 = vld [vmem:[#allocation4 + $0x118] sm:$0x1f]   ;;  %v6308_v14 = vld [vmem:[#allocation4 + $0x120] sm:$0xff]  }
 0x45e   :  { %v5485_v33 = vcombine.high %v3412_v16, %v3426_v22  ;;  %v5484_v18 = vcombine.low %v3412_v16, %v3426_v22  ;;  %v8356_v38 = vsel %vm6971_vm7, %v4047_v41, %v4052_v23  ;;  %v6291_v16 = vld [vmem:[#allocation4 + $0x98] sm:$0xff]   ;;  %v3899_v8 = vsel %vm3540_vm2, %v6298_v36, 0  ;;  %v6312_v23 = vld [vmem:[#allocation4 + $0x140] sm:$0xff]  }
 0x45f   :  { %v5556_v27 = vcombine.high %v8334_v30, %v8356_v38  ;;  %v5555_v3 = vcombine.low %v8334_v30, %v8356_v38  ;;  %v9012_v43 = vcombine.low %v8133_v51, %v8157_v55  ;;  %v9013_v12 = vcombine.high %v8192_v50, %v8218_v44  ;;  %v6302_v55 = vld [vmem:[#allocation4 + $0xf0] sm:$0xff]   ;;  %v6304_v50 = vld [vmem:[#allocation4 + $0x100] sm:$0xff]   ;;  %v6305_v44 = vld [vmem:[#allocation4 + $0x108] sm:$0xff]  }
 0x460   :  { %5498 = vmatprep.mubr.msk.bf16.mxu1 %vm3527_vm4, %v5485_v33  ;;  %v9015_v51 = vcombine.high %v8256_v54, %v8281_v5  ;;  %v9016_v1 = vcombine.low %v8256_v54, %v8281_v5  ;;  %v9017_v54 = vcombine.high %v8153_v42, %v8175_v61  ;;  %v6306_v5 = vld [vmem:[#allocation4 + $0x110] sm:$0xff]   ;;  %v4167_v19 = vsel %vm3540_vm2, %v6307_v2, 0  ;;  %v6316_v33 = vld [vmem:[#allocation4 + $0x160] sm:$0x1f]  }
 0x461   :  { %3601 = vmatmul.mubr.bf16.gmra.mrb[56].mxu1 %v5484_v18  ;;  %v9018_v17 = vcombine.low %v8153_v42, %v8175_v61  ;;  %v9019_v62 = vcombine.high %v8213_v31, %v8237_v40  ;;  %v9020_v41 = vcombine.low %v8213_v31, %v8237_v40  ;;  %v9021_v42 = vcombine.high %v8277_v21, %v8299_v46  ;;  %v6311_v61 = vld [vmem:[#allocation4 + $0x138] sm:$0xff]   ;;  %v6313_v31 = vld [vmem:[#allocation4 + $0x148] sm:$0xff]   ;;  %v6314_v40 = vld [vmem:[#allocation4 + $0x150] sm:$0xff]  }
 0x462   :  { %5516 = vmatprep.mubr.msk.bf16.mxu1 %vm3527_vm4, %v9004_v26  ;;  %v9022_v22 = vcombine.low %v8277_v21, %v8299_v46  ;;  %v9023_v21 = vcombine.high %v8139_v49, %v8165_v13  ;;  %v6315_v46 = vld [vmem:[#allocation4 + $0x158] sm:$0xff]   ;;  %v4387_v18 = vsel %vm3540_vm2, %v6316_v33, 0  ;;  %v9024_v30 = vcombine.low %v8139_v49, %v8165_v13 }
 0x463   :  { %v9025_v38 = vcombine.high %v8198_v58, %v8227_v24  ;;  %vm6492_vm3 = vmmov 0   ;;  %vm4614_vm7 = vcmask 1042434   ;;  %vm4626_vm10 = vcmask 1046534  }
 0x469   :  { %3722 = vmatmul.mubr.bf16.vlgmr.msra.gmra.mrb[60].mxu1 %v9005_v32 }
 0x46a   :  { %3902 = vmatpush1.bf16.msra.mxu1 %v6290_v47  ;;  %5517 = vmatprep.mubr.msk.bf16.mxu1 %vm3527_vm4, %v9006_v25 }
 0x46b   :  { %3903 = vmatprep.subr.bf16.mxu1 %v8956_v15 }
 0x46e   :  { %3904 = vmatpush1.bf16.msra.mxu1 %v6291_v16 }
 0x46f   :  { %3905 = vmatprep.subr.bf16.mxu1 %v8956_v15 }
 0x471   :  { %3730 = vmatmul.mubr.bf16.gmra.mrb[64].mxu1 %v9007_v39 }
 0x472   :  { %3906 = vmatpush1.bf16.msra.mxu1 %v6292_v6  ;;  %5518 = vmatprep.mubr.msk.bf16.mxu1 %vm3527_vm4, %v9008_v48 }
 0x473   :  { %3907 = vmatprep.subr.bf16.mxu1 %v8956_v15 }
 0x476   :  { %3908 = vmatpush1.bf16.msra.mxu1 %v6293_v63 }
 0x477   :  { %3909 = vmatprep.subr.bf16.mxu1 %v8956_v15 }
 0x479   :  { %3738 = vmatmul.mubr.bf16.gmra.mrb[68].mxu1 %v9009_v20 }
 0x47a   :  { %3910 = vmatpush1.bf16.msra.mxu1 %v6294_v37  ;;  %5519 = vmatprep.mubr.msk.bf16.mxu1 %vm3527_vm4, %v5716_v9  ;;  %v6299_v9 = vld [vmem:[#allocation4 + $0xd8] sm:$0xff]  }
 0x47b   :  { %3911 = vmatprep.subr.bf16.mxu1 %v8956_v15 }
 0x47e   :  { %3912 = vmatpush1.bf16.msra.mxu1 %v6295_v34 }
 0x47f   :  { %3913 = vmatprep.subr.bf16.mxu1 %v8956_v15 }
 0x481   :  { %3746 = vmatmul.mubr.bf16.gmra.mrb[72].mxu1 %v9010_v52 }
 0x482   :  { %3914 = vmatpush1.bf16.msra.mxu1 %v6296_v60  ;;  %5545 = vmatprep.mubr.msk.bf16.mxu1 %vm3527_vm4, %v9011_v10 }
 0x483   :  { %3915 = vmatprep.subr.bf16.mxu1 %v8956_v15 }
 0x486   :  { %3916 = vmatpush1.bf16.msra.mxu1 %v6297_v56 }
 0x487   :  { %3917 = vmatprep.subr.bf16.mxu1 %v8956_v15 }
 0x48a   :  { %3918 = vmatpush1.bf16.msra.mxu1 %v3899_v8 }
 0x48b   :  { %4169 = vmatprep.subr.bf16.mxu1 %v8956_v15 }
 0x48d   :  { %3934 = vmatmul.mubr.bf16.vlgmr.msra.gmra.mrb[76].mxu1 %v9012_v43 }
 0x48e   :  { %5546 = vmatprep.mubr.msk.bf16.mxu1 %vm3527_vm4, %v9013_v12  ;;  %4170 = vmatpush1.bf16.msra.mxu1 %v6299_v9 }
 0x48f   :  { %4171 = vmatprep.subr.bf16.mxu1 %v8956_v15 }
 0x492   :  { %4172 = vmatpush1.bf16.msra.mxu1 %v6300_v4 }
 0x493   :  { %4173 = vmatprep.subr.bf16.mxu1 %v8956_v15 }
 0x495   :  { %3942 = vmatmul.mubr.bf16.gmra.mrb[80].mxu1 %v9014_v28 }
 0x496   :  { %5547 = vmatprep.mubr.msk.bf16.mxu1 %vm3527_vm4, %v9015_v51  ;;  %4174 = vmatpush1.bf16.msra.mxu1 %v6301_v45 }
 0x497   :  { %4175 = vmatprep.subr.bf16.mxu1 %v8956_v15 }
 0x49a   :  { %4176 = vmatpush1.bf16.msra.mxu1 %v6302_v55 }
 0x49b   :  { %4177 = vmatprep.subr.bf16.mxu1 %v8956_v15 }
 0x49d   :  { %3950 = vmatmul.mubr.bf16.gmra.mrb[84].mxu1 %v9016_v1 }
 0x49e   :  { %5548 = vmatprep.mubr.msk.bf16.mxu1 %vm3527_vm4, %v5535_v11  ;;  %4178 = vmatpush1.bf16.msra.mxu1 %v6303_v59  ;;  %v6309_v11 = vld [vmem:[#allocation4 + $0x128] sm:$0xff]  }
 0x49f   :  { %4179 = vmatprep.subr.bf16.mxu1 %v8956_v15 }
 0x4a2   :  { %4180 = vmatpush1.bf16.msra.mxu1 %v6304_v50 }
 0x4a3   :  { %4181 = vmatprep.subr.bf16.mxu1 %v8956_v15 }
 0x4a5   :  { %3958 = vmatmul.mubr.bf16.gmra.mrb[88].mxu1 %v5534_v7  ;;  %v6310_v7 = vld [vmem:[#allocation4 + $0x130] sm:$0xff]  }
 0x4a6   :  { %4182 = vmatpush1.bf16.msra.mxu1 %v6305_v44  ;;  %5566 = vmatprep.mubr.msk.bf16.mxu1 %vm3527_vm4, %v9017_v54 }
 0x4a7   :  { %4183 = vmatprep.subr.bf16.mxu1 %v8956_v15 }
 0x4aa   :  { %4184 = vmatpush1.bf16.msra.mxu1 %v6306_v5 }
 0x4ab   :  { %4185 = vmatprep.subr.bf16.mxu1 %v8956_v15 }
 0x4ae   :  { %4186 = vmatpush1.bf16.msra.mxu1 %v4167_v19 }
 0x4af   :  { %4389 = vmatprep.subr.bf16.mxu1 %v8956_v15 }
 0x4b1   :  { %4202 = vmatmul.mubr.bf16.vlgmr.msra.gmra.mrb[92].mxu1 %v9018_v17 }
 0x4b2   :  { %5567 = vmatprep.mubr.msk.bf16.mxu1 %vm3527_vm4, %v9019_v62  ;;  %4390 = vmatpush1.bf16.msra.mxu1 %v6308_v14 }
 0x4b3   :  { %4391 = vmatprep.subr.bf16.mxu1 %v8956_v15 }
 0x4b6   :  { %4392 = vmatpush1.bf16.msra.mxu1 %v6309_v11 }
 0x4b7   :  { %4393 = vmatprep.subr.bf16.mxu1 %v8956_v15 }
 0x4b9   :  { %4210 = vmatmul.mubr.bf16.gmra.mrb[96].mxu1 %v9020_v41 }
 0x4ba   :  { %5568 = vmatprep.mubr.msk.bf16.mxu1 %vm3527_vm4, %v9021_v42  ;;  %4394 = vmatpush1.bf16.msra.mxu1 %v6310_v7 }
 0x4bb   :  { %4395 = vmatprep.subr.bf16.mxu1 %v8956_v15 }
 0x4be   :  { %4396 = vmatpush1.bf16.msra.mxu1 %v6311_v61 }
 0x4bf   :  { %4397 = vmatprep.subr.bf16.mxu1 %v8956_v15 }
 0x4c1   :  { %4218 = vmatmul.mubr.bf16.gmra.mrb[100].mxu1 %v9022_v22 }
 0x4c2   :  { %5569 = vmatprep.mubr.msk.bf16.mxu1 %vm3527_vm4, %v5556_v27  ;;  %4398 = vmatpush1.bf16.msra.mxu1 %v6312_v23  ;;  %v9026_v27 = vcombine.low %v8198_v58, %v8227_v24 }
 0x4c3   :  { %4399 = vmatprep.subr.bf16.mxu1 %v8956_v15 }
 0x4c6   :  { %4400 = vmatpush1.bf16.msra.mxu1 %v6313_v31 }
 0x4c7   :  { %4401 = vmatprep.subr.bf16.mxu1 %v8956_v15 }
 0x4c9   :  { %4226 = vmatmul.mubr.bf16.gmra.mrb[104].mxu1 %v5555_v3  ;;  %v9027_v3 = vld [vmem:[#allocation16_spill] sm:$0xff] }
 0x4ca   :  { %4402 = vmatpush1.bf16.msra.mxu1 %v6314_v40  ;;  %5595 = vmatprep.mubr.msk.bf16.mxu1 %vm3527_vm4, %v9023_v21  ;;  %v9028_v26 = vcombine.high %v8262_v53, %v9027_v3 }
 0x4cb   :  { %4403 = vmatprep.subr.bf16.mxu1 %v8956_v15 }
 0x4ce   :  { %4404 = vmatpush1.bf16.msra.mxu1 %v6315_v46 }
 0x4cf   :  { %4405 = vmatprep.subr.bf16.mxu1 %v8956_v15  ;;  %v9029_v15 = vcombine.low %v8262_v53, %v9027_v3 }
 0x4d2   :  { %4406 = vmatpush1.bf16.msra.mxu1 %v4387_v18 }
 0x4d5   :  { %4422 = vmatmul.mubr.bf16.vlgmr.msra.gmra.mrb[108].mxu1 %v9024_v30 }
 0x4d6   :  { %5596 = vmatprep.mubr.msk.bf16.mxu1 %vm3527_vm4, %v9025_v38 }
 0x4dd   :  { %4430 = vmatmul.mubr.bf16.gmra.mrb[112].mxu1 %v9026_v27 }
 0x4de   :  { %5597 = vmatprep.mubr.msk.bf16.mxu1 %vm3527_vm4, %v9028_v26 }
 0x4e5   :  { %4438 = vmatmul.mubr.bf16.gmra.mrb[116].mxu1 %v9029_v15 }
 0x4e6   :  { %5598 = vmatprep.mubr.msk.bf16.mxu1 %vm3527_vm4, %v5585_v0 }
 0x4ec   :  { %v3578_v49 = vpop.f32.mrb[44].mxu1 }
 0x4ed   :  { %v3580_v13 = vpop.f32.mrb[45].mxu1  ;;  %4446 = vmatmul.mubr.bf16.gmra.mrb[120].mxu1 %v5584_v57 }
 0x4ee   :  { %v3581_v58 = vpop.f32.mrb[46].mxu1 }
 0x4ef   :  { %v3583_v24 = vpop.f32.mrb[47].mxu1 }
 0x502   :  { %v3586_v47 = vpop.f32.mrb[48].mxu1 }
 0x503   :  { %v3588_v32 = vpop.f32.mrb[49].mxu1 }
 0x504   :  { %v3589_v25 = vpop.f32.mrb[50].mxu1 }
 0x505   :  { %v3591_v16 = vpop.f32.mrb[51].mxu1 }
 0x51a   :  { %v3594_v6 = vpop.f32.mrb[52].mxu1 }
 0x51b   :  { %v3596_v53 = vpop.f32.mrb[53].mxu1 }
 0x51c   :  { %v3597_v39 = vpop.f32.mrb[54].mxu1 }
 0x51d   :  { %v3599_v48 = vpop.f32.mrb[55].mxu1 }
 0x534   :  { %v3602_v63 = vpop.f32.mrb[56].mxu1 }
 0x535   :  { %v3604_v37 = vpop.f32.mrb[57].mxu1 }
 0x536   :  { %v3605_v20 = vpop.f32.mrb[58].mxu1 }
 0x537   :  { %v3607_v0 = vpop.f32.mrb[59].mxu1 }
 0x53c   :  { %v3723_v34 = vpop.f32.mrb[60].mxu1 }
 0x53d   :  { %v3724_v60 = vadd.f32 %v3723_v34, %v3578_v49  ;;  %v3725_v52 = vpop.f32.mrb[61].mxu1 }
 0x53e   :  { %v3726_v10 = vpop.f32.mrb[62].mxu1 }
 0x53f   :  { %v3727_v29 = vadd.f32 %v3726_v10, %v3581_v58  ;;  %v3728_v35 = vpop.f32.mrb[63].mxu1 }
 0x544   :  { %v3731_v57 = vpop.f32.mrb[64].mxu1 }
 0x545   :  { %v3732_v56 = vadd.f32 %v3731_v57, %v3586_v47  ;;  %v3733_v36 = vpop.f32.mrb[65].mxu1 }
 0x546   :  { %v3734_v8 = vpop.f32.mrb[66].mxu1 }
 0x547   :  { %v3735_v9 = vadd.f32 %v3734_v8, %v3589_v25  ;;  %v3736_v43 = vpop.f32.mrb[67].mxu1  ;;  %v5599_v8 = vld [vmem:[%s8801_s5] ss:$0 sm:$0xff]  ;;  %s6490_s5 = smov 112  }
 0x54c   :  { %v3739_v12 = vpop.f32.mrb[68].mxu1 }
 0x54d   :  { %v3740_v4 = vadd.f32 %v3739_v12, %v3594_v6  ;;  %v3741_v45 = vpop.f32.mrb[69].mxu1 }
 0x54e   :  { %v3742_v28 = vpop.f32.mrb[70].mxu1 }
 0x54f   :  { %v3743_v51 = vadd.f32 %v3742_v28, %v3597_v39  ;;  %v3744_v55 = vpop.f32.mrb[71].mxu1 }
 0x554   :  { %v3747_v59 = vpop.f32.mrb[72].mxu1 }
 0x555   :  { %v3748_v1 = vadd.f32 %v3747_v59, %v3602_v63  ;;  %v3749_v50 = vpop.f32.mrb[73].mxu1 }
 0x556   :  { %v3750_v44 = vpop.f32.mrb[74].mxu1 }
 0x557   :  { %v3751_v54 = vadd.f32 %v3750_v44, %v3605_v20  ;;  %v3752_v5 = vpop.f32.mrb[75].mxu1 }
 0x560   :  { %v3935_v2 = vpop.f32.mrb[76].mxu1 }
 0x561   :  { %v3966_v19 = vadd.f32 %v3935_v2, %v3724_v60  ;;  %v3937_v14 = vpop.f32.mrb[77].mxu1 }
 0x562   :  { %v3938_v17 = vpop.f32.mrb[78].mxu1 }
 0x563   :  { %v3967_v62 = vadd.f32 %v3938_v17, %v3727_v29  ;;  %v3940_v11 = vpop.f32.mrb[79].mxu1 }
 0x568   :  { %v3943_v7 = vpop.f32.mrb[80].mxu1 }
 0x569   :  { %v3968_v41 = vadd.f32 %v3943_v7, %v3732_v56  ;;  %v3945_v42 = vpop.f32.mrb[81].mxu1 }
 0x56a   :  { %v3946_v61 = vpop.f32.mrb[82].mxu1 }
 0x56b   :  { %v3969_v23 = vadd.f32 %v3946_v61, %v3735_v9  ;;  %v3948_v22 = vpop.f32.mrb[83].mxu1 }
 0x570   :  { %v3951_v31 = vpop.f32.mrb[84].mxu1 }
 0x571   :  { %v3970_v40 = vadd.f32 %v3951_v31, %v3740_v4  ;;  %v3953_v21 = vpop.f32.mrb[85].mxu1  ;;  %v6318_v31 = vld [vmem:[%s8802_s6 + $0x40] sm:$0xff]  }
 0x572   :  { %v3954_v46 = vpop.f32.mrb[86].mxu1 }
 0x573   :  { %v3971_v33 = vadd.f32 %v3954_v46, %v3743_v51  ;;  %v3956_v18 = vpop.f32.mrb[87].mxu1 }
 0x578   :  { %v3959_v30 = vpop.f32.mrb[88].mxu1 }
 0x579   :  { %v3972_v38 = vadd.f32 %v3959_v30, %v3748_v1  ;;  %v3961_v27 = vpop.f32.mrb[89].mxu1  ;;  %v6319_v30 = vld [vmem:[%s8802_s6 + $0x48] sm:$0xff]  }
 0x57a   :  { %v3962_v3 = vpop.f32.mrb[90].mxu1 }
 0x57b   :  { %v3973_v26 = vadd.f32 %v3962_v3, %v3751_v54  ;;  %v3964_v15 = vpop.f32.mrb[91].mxu1 }
 0x584   :  { %v4203_v49 = vpop.f32.mrb[92].mxu1 }
 0x585   :  { %v4234_v13 = vadd.f32 %v4203_v49, %v3966_v19  ;;  %v4205_v58 = vpop.f32.mrb[93].mxu1 }
 0x586   :  { %v4206_v24 = vpop.f32.mrb[94].mxu1  ;;  %v6320_v58 = vld [vmem:[%s8802_s6 + $0x50] sm:$0xff]  }
 0x587   :  { %v4235_v47 = vadd.f32 %v4206_v24, %v3967_v62  ;;  %v4208_v32 = vpop.f32.mrb[95].mxu1  ;;  %v6317_v62 = vld [vmem:[%s8802_s6 + $0x38] sm:$0xff]  }
 0x58c   :  { %v4211_v25 = vpop.f32.mrb[96].mxu1 }
 0x58d   :  { %v4236_v16 = vadd.f32 %v4211_v25, %v3968_v41  ;;  %v4213_v6 = vpop.f32.mrb[97].mxu1  ;;  %v6491_v41 = vmov 0.0  }
 0x58e   :  { %v4214_v53 = vpop.f32.mrb[98].mxu1  ;;  %5767 = vmatprep.subr.bf16.mxu1 %v6491_v41  ;;  %5781 = vmatprep.mubr.msk.bf16.mxu1 %vm6492_vm3, %v6491_v41 }
 0x58f   :  { %v4237_v39 = vadd.f32 %v4214_v53, %v3969_v23  ;;  %v4216_v48 = vpop.f32.mrb[99].mxu1  ;;  %5768 = vmatpush3.bf16.msra.mxu1 %v6317_v62 }
 0x590   :  { %5769 = vmatprep.subr.bf16.mxu1 %v6491_v41  ;;  %v6322_v48 = vld [vmem:[%s8802_s6 + $0x60] sm:$0xff]  }
 0x593   :  { %5770 = vmatpush3.bf16.msra.mxu1 %v6318_v31 }
 0x594   :  { %v4219_v63 = vpop.f32.mrb[100].mxu1  ;;  %5771 = vmatprep.subr.bf16.mxu1 %v6491_v41 }
 0x595   :  { %v4238_v37 = vadd.f32 %v4219_v63, %v3970_v40  ;;  %v4221_v20 = vpop.f32.mrb[101].mxu1  ;;  %v6323_v63 = vld [vmem:[%s8802_s6 + $0x68] sm:$0xff]  }
 0x596   :  { %v4222_v0 = vpop.f32.mrb[102].mxu1 }
 0x597   :  { %v4239_v34 = vadd.f32 %v4222_v0, %v3971_v33  ;;  %v4224_v60 = vpop.f32.mrb[103].mxu1  ;;  %5772 = vmatpush3.bf16.msra.mxu1 %v6319_v30 }
 0x598   :  { %5773 = vmatprep.subr.bf16.mxu1 %v6491_v41 }
 0x59b   :  { %5774 = vmatpush3.bf16.msra.mxu1 %v6320_v58 }
 0x59c   :  { %v4227_v52 = vpop.f32.mrb[104].mxu1  ;;  %5775 = vmatprep.subr.bf16.mxu1 %v6491_v41 }
 0x59d   :  { %v4240_v10 = vadd.f32 %v4227_v52, %v3972_v38  ;;  %v4229_v29 = vpop.f32.mrb[105].mxu1 }
 0x59e   :  { %v4230_v35 = vpop.f32.mrb[106].mxu1 }
 0x59f   :  { %v4241_v57 = vadd.f32 %v4230_v35, %v3973_v26  ;;  %v4232_v56 = vpop.f32.mrb[107].mxu1 }
 0x5a8   :  { %v4423_v36 = vpop.f32.mrb[108].mxu1 }
 0x5a9   :  { %v4454_v9 = vadd.f32 %v4423_v36, %v4234_v13  ;;  %v4425_v43 = vpop.f32.mrb[109].mxu1 }
 0x5aa   :  { %v4426_v12 = vpop.f32.mrb[110].mxu1 }
 0x5ab   :  { %v8504_v4 = vadd.f32 %v5599_v8, %v4454_v9  ;;  %v4455_v45 = vadd.f32 %v4426_v12, %v4235_v47  ;;  %v4428_v28 = vpop.f32.mrb[111].mxu1 }
 0x5ad   :  { %v8506_v51 = vadd.f32 %v5599_v8, %v4455_v45  ;;  %v4477_v55 = vmax.f32 %v8504_v4, 0.0 }
 0x5af   :  { %v4478_v59 = vmax.f32 %v8506_v51, 0.0 }
 0x5b0   :  { %v4431_v1 = vpop.f32.mrb[112].mxu1 }
 0x5b1   :  { %v4456_v50 = vadd.f32 %v4431_v1, %v4236_v16  ;;  %v4433_v44 = vpop.f32.mrb[113].mxu1  ;;  %v6209_v54 = vpack.i.bf16 %v4478_v59, %v4477_v55  ;;  %v6321_v16 = vld [vmem:[%s8802_s6 + $0x58] sm:$0xff]  }
 0x5b2   :  { %v4434_v5 = vpop.f32.mrb[114].mxu1  ;;  %5776 = vmatpush3.bf16.msra.mxu1 %v6321_v16 }
 0x5b3   :  { %v8514_v2 = vadd.f32 %v5599_v8, %v4456_v50  ;;  %v4457_v19 = vadd.f32 %v4434_v5, %v4237_v39  ;;  %v4436_v14 = vpop.f32.mrb[115].mxu1  ;;  %6210 = vrot.lane.b32.xlu0 %v6209_v54, %s6490_s5  ;;  %5777 = vmatprep.subr.bf16.mxu1 %v6491_v41 }
 0x5b5   :  { %v8517_v17 = vadd.f32 %v5599_v8, %v4457_v19  ;;  %v4479_v11 = vmax.f32 %v8514_v2, 0.0 }
 0x5b6   :  { %5778 = vmatpush3.bf16.msra.mxu1 %v6322_v48 }
 0x5b7   :  { %v4480_v7 = vmax.f32 %v8517_v17, 0.0  ;;  %5779 = vmatprep.subr.bf16.mxu1 %v6491_v41 }
 0x5b8   :  { %v4439_v42 = vpop.f32.mrb[116].mxu1 }
 0x5b9   :  { %v4458_v61 = vadd.f32 %v4439_v42, %v4238_v37  ;;  %v4441_v23 = vpop.f32.mrb[117].mxu1  ;;  %v6214_v22 = vpack.i.bf16 %v4479_v11, %v4480_v7 }
 0x5ba   :  { %v4442_v40 = vpop.f32.mrb[118].mxu1  ;;  %5780 = vmatpush3.bf16.msra.mxu1 %v6323_v63 }
 0x5bb   :  { %v8533_v21 = vadd.f32 %v5599_v8, %v4458_v61  ;;  %v4459_v46 = vadd.f32 %v4442_v40, %v4239_v34  ;;  %v4444_v33 = vpop.f32.mrb[119].mxu1  ;;  %6215 = vrot.lane.b32.xlu1 %v6214_v22, %s6490_s5  ;;  %5785 = vmatprep.subr.bf16.mxu1 %v6491_v41 }
 0x5bd   :  { %v8536_v18 = vadd.f32 %v5599_v8, %v4459_v46  ;;  %v4481_v38 = vmax.f32 %v8533_v21, 0.0 }
 0x5bf   :  { %v4482_v27 = vmax.f32 %v8536_v18, 0.0 }
 0x5c0   :  { %v4447_v3 = vpop.f32.mrb[120].mxu1 }
 0x5c1   :  { %v4460_v26 = vadd.f32 %v4447_v3, %v4240_v10  ;;  %v4449_v15 = vpop.f32.mrb[121].mxu1  ;;  %v6219_v49 = vpack.i.bf16 %v4482_v27, %v4481_v38 }
 0x5c2   :  { %v4450_v13 = vpop.f32.mrb[122].mxu1 }
 0x5c3   :  { %v8550_v24 = vadd.f32 %v5599_v8, %v4460_v26  ;;  %v4461_v47 = vadd.f32 %v4450_v13, %v4241_v57  ;;  %v4452_v32 = vpop.f32.mrb[123].mxu1  ;;  %6220 = vrot.lane.b32.xlu0 %v6219_v49, %s6490_s5 }
 0x5c5   :  { %v8553_v25 = vadd.f32 %v5599_v8, %v4461_v47  ;;  %v4483_v6 = vmax.f32 %v8550_v24, 0.0 }
 0x5c7   :  { %v4484_v53 = vmax.f32 %v8553_v25, 0.0 }
 0x5c9   :  { %v6224_v39 = vpack.i.bf16 %v4484_v53, %v4483_v6 }
 0x5cb   :  { %6225 = vrot.lane.b32.xlu1 %v6224_v39, %s6490_s5 }
 0x625   :  { %v6211_v37 = vpop.permute.xlu0 %6210 }
 0x626   :  { %v6213_v20 = vunpack.i.h.bf16 %v6211_v37  ;;  %v6212_v0 = vunpack.i.l.bf16 %v6211_v37 }
 0x628   :  { %v4518_v34 = vmax.f32 %v4478_v59, %v6213_v20  ;;  %v4517_v60 = vmax.f32 %v4477_v55, %v6212_v0 }
 0x62a   :  { %v4534_v52 = vrot.slane %v4518_v34, 1  ;;  %v4533_v10 = vrot.slane %v4517_v60, 1 }
 0x62c   :  { %v4550_v29 = vmax.f32 %v4518_v34, %v4534_v52  ;;  %v4549_v35 = vmax.f32 %v4517_v60, %v4533_v10 }
 0x62d   :  { %v6216_v57 = vpop.permute.xlu1 %6215 }
 0x62e   :  { %v4558_v56 = vpack.c.bf16 %v4550_v29, %v4550_v29  ;;  %v4557_v36 = vpack.c.bf16 %v4549_v35, %v4549_v35  ;;  %v6218_v8 = vunpack.i.h.bf16 %v6216_v57  ;;  %v6217_v9 = vunpack.i.l.bf16 %v6216_v57 }
 0x630   :  { %v8581_v43 = vunpack.c.l.b16 %v4558_v56  ;;  %v8583_v12 = vunpack.c.l.b16 %v4557_v36  ;;  %v4519_v45 = vmax.f32 %v4479_v11, %v6218_v8  ;;  %v4520_v4 = vmax.f32 %v4480_v7, %v6217_v9 }
 0x632   :  { %v4950_v28 = vrot.slane %v8581_v43, 5  ;;  %v4949_v51 = vrot.slane %v8583_v12, 6  ;;  %v4535_v55 = vrot.slane %v4519_v45, 1  ;;  %v4536_v59 = vrot.slane %v4520_v4, 1 }
 0x633   :  { %v4611_v49 = vrot.slane %v8581_v43, 1  ;;  %v4610_v13 = vrot.slane %v8583_v12, 2 }
 0x634   :  { %v4951_v1 = vsel %vm4612_vm5, %v4950_v28, %v4949_v51  ;;  %v4551_v50 = vmax.f32 %v4519_v45, %v4535_v55  ;;  %v4552_v54 = vmax.f32 %v4520_v4, %v4536_v59  ;;  %v6324_v51 = vld [vmem:[%s8802_s6] sm:$0xff]   ;;  %v6325_v59 = vld [vmem:[%s8802_s6 + $0x8] sm:$0xff]  }
 0x635   :  { %v6221_v44 = vpop.permute.xlu0 %6220  ;;  %v4613_v48 = vsel %vm4612_vm5, %v4611_v49, %v4610_v13  ;;  %v4833_v49 = vrot.slane %v8583_v12, 4 }
 0x636   :  { %v6223_v5 = vunpack.i.h.bf16 %v6221_v44  ;;  %v6222_v19 = vunpack.i.l.bf16 %v6221_v44  ;;  %v4559_v14 = vpack.c.bf16 %v4551_v50, %v4551_v50  ;;  %v4560_v2 = vpack.c.bf16 %v4552_v54, %v4552_v54  ;;  %v6327_v54 = vld [vmem:[%s8802_s6 + $0x18] sm:$0xff]  }
 0x637   :  { %v4718_v50 = vrot.slane %v8581_v43, 7 }
 0x638   :  { %v4522_v62 = vmax.f32 %v4482_v27, %v6223_v5  ;;  %v4521_v17 = vmax.f32 %v4481_v38, %v6222_v19  ;;  %v8594_v11 = vunpack.c.l.b16 %v4559_v14  ;;  %v8596_v7 = vunpack.c.l.b16 %v4560_v2 }
 0x639   :  { %v4719_v5 = vsel %vm4612_vm5, %v4718_v50, %v8583_v12 }
 0x63a   :  { %v4538_v42 = vrot.slane %v4522_v62, 1  ;;  %v4537_v61 = vrot.slane %v4521_v17, 1  ;;  %v4952_v23 = vrot.slane %v8594_v11, 4  ;;  %v4954_v22 = vrot.slane %v8596_v7, 3 }
 0x63b   :  { %v4615_v24 = vsel %vm4614_vm7, %v8594_v11, %v4613_v48  ;;  %v4720_v44 = vrot.slane %v8594_v11, 6  ;;  %v4722_v19 = vrot.slane %v8596_v7, 5  ;;  %v4836_v13 = vrot.slane %v8594_v11, 2 }
 0x63c   :  { %v4953_v31 = vsel %vm4614_vm7, %v4952_v23, %v4951_v1  ;;  %v4554_v40 = vmax.f32 %v4522_v62, %v4538_v42  ;;  %v4553_v46 = vmax.f32 %v4521_v17, %v4537_v61  ;;  %v6326_v1 = vld [vmem:[%s8802_s6 + $0x10] sm:$0xff]   ;;  %v6328_v62 = vld [vmem:[%s8802_s6 + $0x20] sm:$0xff]  }
 0x63d   :  { %v6226_v33 = vpop.permute.xlu1 %6225  ;;  %v4955_v21 = vsel %vm4617_vm6, %v4954_v22, %v4953_v31  ;;  %v4721_v14 = vsel %vm4614_vm7, %v4720_v44, %v4719_v5  ;;  %v6329_v22 = vld [vmem:[%s8802_s6 + $0x28] sm:$0xff]  }
 0x63e   :  { %v4562_v18 = vpack.c.bf16 %v4554_v40, %v4554_v40  ;;  %v4561_v30 = vpack.c.bf16 %v4553_v46, %v4553_v46  ;;  %v6228_v38 = vunpack.i.h.bf16 %v6226_v33  ;;  %v6227_v27 = vunpack.i.l.bf16 %v6226_v33  ;;  %v6330_v33 = vld [vmem:[%s8802_s6 + $0x30] sm:$0xff]  }
 0x63f   :  { %v4723_v17 = vsel %vm4617_vm6, %v4722_v19, %v4721_v14 }
 0x640   :  { %v8602_v3 = vunpack.c.l.b16 %v4562_v18  ;;  %v8604_v26 = vunpack.c.l.b16 %v4561_v30  ;;  %v4524_v15 = vmax.f32 %v4484_v53, %v6228_v38  ;;  %v4523_v58 = vmax.f32 %v4483_v6, %v6227_v27  ;;  %v6331_v18 = vld [vmem:[%s8802_s6 + $0x70] sm:$0xff]   ;;  %v6332_v38 = vld [vmem:[%s8802_s6 + $0x78] sm:$0xff]   ;;  %v6333_v27 = vld [vmem:[%s8802_s6 + $0x80] sm:$0xff]  }
 0x641   :  { %v4616_v53 = vrot.slane %v8596_v7, 7 }
 0x642   :  { %v4958_v47 = vrot.slane %v8602_v3, 1  ;;  %v4956_v32 = vrot.slane %v8604_v26, 2  ;;  %v4540_v16 = vrot.slane %v4524_v15, 1  ;;  %v4539_v39 = vrot.slane %v4523_v58, 1 }
 0x643   :  { %v4619_v6 = vrot.slane %v8604_v26, 6  ;;  %v4618_v60 = vsel %vm4617_vm6, %v4616_v53, %v4615_v24  ;;  %v4622_v52 = vrot.slane %v8602_v3, 5  ;;  %v4724_v2 = vrot.slane %v8604_v26, 4  ;;  %v6339_v24 = vld [vmem:[%s8802_s6 + $0xb0] sm:$0xff]  }
 0x644   :  { %v4957_v25 = vsel %vm4620_vm9, %v4956_v32, %v4955_v21  ;;  %v4556_v63 = vmax.f32 %v4524_v15, %v4540_v16  ;;  %v4555_v37 = vmax.f32 %v4523_v58, %v4539_v39  ;;  %v4726_v42 = vrot.slane %v8602_v3, 3  ;;  %v6334_v58 = vld [vmem:[%s8802_s6 + $0x88] sm:$0xff]  }
 0x645   :  { %v4959_v20 = vsel %vm4623_vm8, %v4958_v47, %v4957_v25  ;;  %v4621_v35 = vsel %vm4620_vm9, %v4619_v6, %v4618_v60  ;;  %v4725_v61 = vsel %vm4620_vm9, %v4724_v2, %v4723_v17  ;;  %v4834_v15 = vrot.slane %v8581_v43, 3  ;;  %v6335_v43 = vld [vmem:[%s8802_s6 + $0x90] sm:$0xff]   ;;  %v6340_v6 = vld [vmem:[%s8802_s6 + $0xb8] sm:$0xff]  }
 0x646   :  { %v4564_v0 = vpack.c.bf16 %v4556_v63, %v4556_v63  ;;  %v4563_v34 = vpack.c.bf16 %v4555_v37, %v4555_v37  ;;  %v4624_v9 = vsel %vm4623_vm8, %v4622_v52, %v4621_v35  ;;  %v4727_v40 = vsel %vm4623_vm8, %v4726_v42, %v4725_v61  ;;  %v6338_v37 = vld [vmem:[%s8802_s6 + $0xa8] sm:$0xff]   ;;  %v6343_v60 = vld [vmem:[%s8802_s6 + $0xd0] sm:$0xff]   ;;  %v6344_v52 = vld [vmem:[%s8802_s6 + $0xd8] sm:$0xff]  }
 0x647   :  { %v4835_v47 = vsel %vm4612_vm5, %v4834_v15, %v4833_v49  ;;  %v4838_v32 = vrot.slane %v8596_v7, 1  ;;  %v4841_v12 = vrot.slane %v8602_v3, 7  ;;  %v6336_v7 = vld [vmem:[%s8802_s6 + $0x98] sm:$0xff]   ;;  %v6346_v35 = vld [vmem:[#allocation6 + $0x8] sm:$0xff]   ;;  %v5674_v42 = vld [vmem:[%s8803_s7] ss:$0 sm:$0xff] }
 0x648   :  { %v8623_v10 = vunpack.c.l.b16 %v4564_v0  ;;  %v8625_v29 = vunpack.c.l.b16 %v4563_v34  ;;  %v4837_v16 = vsel %vm4614_vm7, %v4836_v13, %v4835_v47  ;;  %v6341_v0 = vld [vmem:[%s8802_s6 + $0xc0] sm:$0xff]   ;;  %v6342_v34 = vld [vmem:[%s8802_s6 + $0xc8] sm:$0xff]   ;;  %v6358_v15 = vld [vmem:[#allocation7 + $0x28] sm:$0xff]  }
 0x649   :  { %v4839_v11 = vsel %vm4617_vm6, %v4838_v32, %v4837_v16  ;;  %v6359_v49 = vld [vmem:[#allocation7 + $0x30] sm:$0xff]   ;;  %v6360_v13 = vld [vmem:[#allocation7 + $0x38] sm:$0xff]  }
 0x64a   :  { %v4628_v57 = vrot.slane %v8623_v10, 3  ;;  %v4961_v56 = vrot.slane %v8623_v10, 7  ;;  %v4625_v36 = vrot.slane %v8625_v29, 4  ;;  %v4960_v8 = vsel %vm4626_vm10, %v8625_v29, %v4959_v20 }
 0x64b   :  { %v4728_v23 = vrot.slane %v8625_v29, 2  ;;  %v4730_v31 = vrot.slane %v8623_v10, 1  ;;  %v4840_v39 = vsel %vm4620_vm9, %v8604_v26, %v4839_v11  ;;  %v4843_v48 = vrot.slane %v8625_v29, 6  ;;  %v6337_v26 = vld [vmem:[%s8802_s6 + $0xa0] sm:$0xff]   ;;  %v6345_v29 = vld [vmem:[#allocation6] sm:$0xff]  }
 0x64c   :  { %v8635_v45 = vsel %vm4629_vm11, %v4961_v56, %v4960_v8  ;;  %v4627_v4 = vsel %vm4626_vm10, %v4625_v36, %v4624_v9  ;;  %v4842_v25 = vsel %vm4623_vm8, %v4841_v12, %v4840_v39  ;;  %v4845_v53 = vrot.slane %v8623_v10, 5  ;;  %v6348_v56 = vld [vmem:[#allocation6 + $0x18] sm:$0xff]   ;;  %v6349_v36 = vld [vmem:[#allocation6 + $0x20] sm:$0xff]   ;;  %v6350_v8 = vld [vmem:[#allocation6 + $0x28] sm:$0xff]  }
 0x64d   :  { %v4630_v28 = vsel %vm4629_vm11, %v4628_v57, %v4627_v4  ;;  %v4729_v46 = vsel %vm4626_vm10, %v4728_v23, %v4727_v40  ;;  %v4844_v3 = vsel %vm4626_vm10, %v4843_v48, %v4842_v25  ;;  %v4963_v10 = vpack.c.b16 %v8635_v45, %v8635_v45  ;;  %v6347_v57 = vld [vmem:[#allocation6 + $0x10] sm:$0xff]   ;;  %v6352_v45 = vld [vmem:[#allocation6 + $0x38] sm:$0xff]  }
 0x64e   :  { %v4631_v55 = vpack.c.b16 %v4630_v28, %v4630_v28  ;;  %v4731_v21 = vsel %vm4629_vm11, %v4730_v31, %v4729_v46  ;;  %v4846_v63 = vsel %vm4629_vm11, %v4845_v53, %v4844_v3  ;;  %v6351_v9 = vld [vmem:[#allocation6 + $0x30] sm:$0xff]   ;;  %v5684_v48 = vld [vmem:[%s8807_s11] ss:$0 sm:$0xff] }
 0x64f   :  { %v4732_v30 = vpack.c.b16 %v4731_v21, %v4731_v21  ;;  %v4847_v20 = vpack.c.b16 %v4846_v63, %v4846_v63 }
 0x650   :  { %5782 = vmatmul.mubr.msk.bf16.vlgmr.msra.gmra.mrb[124].mxu1 %vm4674_vm12, %v4631_v55 }
 0x651   :  { %5786 = vmatpush3.bf16.msra.mxu1 %v6324_v51  ;;  %5799 = vmatprep.mubr.msk.bf16.mxu1 %vm6492_vm3, %v6491_v41 }
 0x652   :  { %5787 = vmatprep.subr.bf16.mxu1 %v6491_v41 }
 0x655   :  { %5788 = vmatpush3.bf16.msra.mxu1 %v6325_v59 }
 0x656   :  { %5789 = vmatprep.subr.bf16.mxu1 %v6491_v41 }
 0x659   :  { %5790 = vmatpush3.bf16.msra.mxu1 %v6326_v1 }
 0x65a   :  { %5791 = vmatprep.subr.bf16.mxu1 %v6491_v41 }
 0x65d   :  { %5792 = vmatpush3.bf16.msra.mxu1 %v6327_v54 }
 0x65e   :  { %5793 = vmatprep.subr.bf16.mxu1 %v6491_v41 }
 0x661   :  { %5794 = vmatpush3.bf16.msra.mxu1 %v6328_v62 }
 0x662   :  { %5795 = vmatprep.subr.bf16.mxu1 %v6491_v41 }
 0x665   :  { %5796 = vmatpush3.bf16.msra.mxu1 %v6329_v22 }
 0x666   :  { %5797 = vmatprep.subr.bf16.mxu1 %v6491_v41 }
 0x669   :  { %5798 = vmatpush3.bf16.msra.mxu1 %v6330_v33  ;;  %v6353_v33 = vld [vmem:[#allocation7] sm:$0xff]  }
 0x66a   :  { %5803 = vmatprep.subr.bf16.mxu1 %v6491_v41 }
 0x66c   :  { %5800 = vmatmul.mubr.msk.bf16.vlgmr.msra.gmra.mrb[128].mxu1 %vm4674_vm12, %v4732_v30  ;;  %v6355_v30 = vld [vmem:[#allocation7 + $0x10] sm:$0xff]  }
 0x66d   :  { %5804 = vmatpush3.bf16.msra.mxu1 %v6331_v18  ;;  %5817 = vmatprep.mubr.msk.bf16.mxu1 %vm6492_vm3, %v6491_v41  ;;  %v6354_v18 = vld [vmem:[#allocation7 + $0x8] sm:$0xff]  }
 0x66e   :  { %5805 = vmatprep.subr.bf16.mxu1 %v6491_v41 }
 0x671   :  { %5806 = vmatpush3.bf16.msra.mxu1 %v6332_v38  ;;  %v6356_v38 = vld [vmem:[#allocation7 + $0x18] sm:$0xff]  }
 0x672   :  { %5807 = vmatprep.subr.bf16.mxu1 %v6491_v41 }
 0x675   :  { %5808 = vmatpush3.bf16.msra.mxu1 %v6333_v27  ;;  %v6357_v27 = vld [vmem:[#allocation7 + $0x20] sm:$0xff]  }
 0x676   :  { %5809 = vmatprep.subr.bf16.mxu1 %v6491_v41 }
 0x679   :  { %5810 = vmatpush3.bf16.msra.mxu1 %v6334_v58  ;;  %v5675_v58 = vld [vmem:[%s8805_s9] ss:$0 sm:$0xff] }
 0x67a   :  { %5811 = vmatprep.subr.bf16.mxu1 %v6491_v41 }
 0x67d   :  { %5812 = vmatpush3.bf16.msra.mxu1 %v6335_v43 }
 0x67e   :  { %5813 = vmatprep.subr.bf16.mxu1 %v6491_v41 }
 0x681   :  { %5814 = vmatpush3.bf16.msra.mxu1 %v6336_v7 }
 0x682   :  { %5815 = vmatprep.subr.bf16.mxu1 %v6491_v41 }
 0x685   :  { %5816 = vmatpush3.bf16.msra.mxu1 %v6337_v26 }
 0x686   :  { %5821 = vmatprep.subr.bf16.mxu1 %v6491_v41 }
 0x688   :  { %5818 = vmatmul.mubr.msk.bf16.vlgmr.msra.gmra.mrb[132].mxu1 %vm4674_vm12, %v4847_v20 }
 0x689   :  { %5822 = vmatpush3.bf16.msra.mxu1 %v6338_v37  ;;  %5835 = vmatprep.mubr.msk.bf16.mxu1 %vm6492_vm3, %v6491_v41 }
 0x68a   :  { %5823 = vmatprep.subr.bf16.mxu1 %v6491_v41 }
 0x68d   :  { %5824 = vmatpush3.bf16.msra.mxu1 %v6339_v24 }
 0x68e   :  { %5825 = vmatprep.subr.bf16.mxu1 %v6491_v41 }
 0x691   :  { %5826 = vmatpush3.bf16.msra.mxu1 %v6340_v6 }
 0x692   :  { %5827 = vmatprep.subr.bf16.mxu1 %v6491_v41 }
 0x695   :  { %5828 = vmatpush3.bf16.msra.mxu1 %v6341_v0 }
 0x696   :  { %5829 = vmatprep.subr.bf16.mxu1 %v6491_v41 }
 0x699   :  { %5830 = vmatpush3.bf16.msra.mxu1 %v6342_v34 }
 0x69a   :  { %5831 = vmatprep.subr.bf16.mxu1 %v6491_v41 }
 0x69d   :  { %5832 = vmatpush3.bf16.msra.mxu1 %v6343_v60 }
 0x69e   :  { %5833 = vmatprep.subr.bf16.mxu1 %v6491_v41 }
 0x6a1   :  { %5834 = vmatpush3.bf16.msra.mxu1 %v6344_v52 }
 0x6a2   :  { %5839 = vmatprep.subr.bf16.mxu1 %v6491_v41 }
 0x6a4   :  { %5836 = vmatmul.mubr.msk.bf16.vlgmr.msra.gmra.mrb[136].mxu1 %vm4674_vm12, %v4963_v10 }
 0x6a5   :  { %5855 = vmatprep.mubr.msk.bf16.mxu1 %vm6492_vm3, %v6491_v41  ;;  %5840 = vmatpush3.bf16.msra.mxu1 %v6345_v29 }
 0x6a6   :  { %5841 = vmatprep.subr.bf16.mxu1 %v6491_v41 }
 0x6a9   :  { %5842 = vmatpush3.bf16.msra.mxu1 %v6346_v35 }
 0x6aa   :  { %5843 = vmatprep.subr.bf16.mxu1 %v6491_v41 }
 0x6ad   :  { %5844 = vmatpush3.bf16.msra.mxu1 %v6347_v57 }
 0x6ae   :  { %5845 = vmatprep.subr.bf16.mxu1 %v6491_v41 }
 0x6b1   :  { %5846 = vmatpush3.bf16.msra.mxu1 %v6348_v56 }
 0x6b2   :  { %5847 = vmatprep.subr.bf16.mxu1 %v6491_v41 }
 0x6b5   :  { %5848 = vmatpush3.bf16.msra.mxu1 %v6349_v36 }
 0x6b6   :  { %5849 = vmatprep.subr.bf16.mxu1 %v6491_v41 }
 0x6b9   :  { %5850 = vmatpush3.bf16.msra.mxu1 %v6350_v8 }
 0x6ba   :  { %5851 = vmatprep.subr.bf16.mxu1 %v6491_v41 }
 0x6bd   :  { %5852 = vmatpush3.bf16.msra.mxu1 %v6351_v9 }
 0x6be   :  { %5853 = vmatprep.subr.bf16.mxu1 %v6491_v41 }
 0x6c1   :  { %5854 = vmatpush3.bf16.msra.mxu1 %v6352_v45 }
 0x6c2   :  { %5859 = vmatprep.subr.bf16.mxu1 %v6491_v41 }
 0x723   :  { %v4712_v4 = vpop.f32.mrb[124].mxu1 }
 0x724   :  { %v5783_v28 = vpop.f32.mrb[125].mxu1 }
 0x725   :  { %v4715_v51 = vpop.f32.mrb[126].mxu1 }
 0x726   :  { %v5784_v55 = vpop.f32.mrb[127].mxu1 }
 0x73f   :  { %v4812_v59 = vpop.f32.mrb[128].mxu1 }
 0x740   :  { %v4813_v1 = vadd.f32 %v4812_v59, %v4712_v4  ;;  %v5801_v50 = vpop.f32.mrb[129].mxu1 }
 0x741   :  { %v4815_v44 = vpop.f32.mrb[130].mxu1 }
 0x742   :  { %v5802_v54 = vpop.f32.mrb[131].mxu1 }
 0x75b   :  { %v4927_v5 = vpop.f32.mrb[132].mxu1 }
 0x75c   :  { %v4933_v19 = vadd.f32 %v4927_v5, %v4813_v1  ;;  %v5819_v14 = vpop.f32.mrb[133].mxu1 }
 0x75d   :  { %v4930_v2 = vpop.f32.mrb[134].mxu1 }
 0x75e   :  { %v5820_v62 = vpop.f32.mrb[135].mxu1 }
 0x777   :  { %v5043_v17 = vpop.f32.mrb[136].mxu1 }
 0x778   :  { %v5049_v61 = vadd.f32 %v5043_v17, %v4933_v19  ;;  %v5837_v23 = vpop.f32.mrb[137].mxu1 }
 0x779   :  { %v5046_v22 = vpop.f32.mrb[138].mxu1 }
 0x77a   :  { %v5057_v31 = vadd.f32 %v5674_v42, %v5049_v61  ;;  %v5838_v40 = vpop.f32.mrb[139].mxu1 }
 0x77c   :  { %v5058_v46 = vmax.f32 %v5057_v31, 0.0 }
 0x77e   :  { %v5059_v21 = vpack.c.bf16 %v5058_v46, %v5058_v46 }
 0x780   :  { %5856 = vmatmul.mubr.bf16.vlgmr.msra.gmra.mrb[140].mxu1 %v5059_v21 }
 0x781   :  { %5860 = vmatpush3.bf16.msra.mxu1 %v6353_v33  ;;  %5875 = vmatprep.mubr.msk.bf16.mxu1 %vm6492_vm3, %v6491_v41 }
 0x782   :  { %5861 = vmatprep.subr.bf16.mxu1 %v6491_v41 }
 0x785   :  { %5862 = vmatpush3.bf16.msra.mxu1 %v6354_v18 }
 0x786   :  { %5863 = vmatprep.subr.bf16.mxu1 %v6491_v41 }
 0x789   :  { %5864 = vmatpush3.bf16.msra.mxu1 %v6355_v30 }
 0x78a   :  { %5865 = vmatprep.subr.bf16.mxu1 %v6491_v41 }
 0x78d   :  { %5866 = vmatpush3.bf16.msra.mxu1 %v6356_v38 }
 0x78e   :  { %5867 = vmatprep.subr.bf16.mxu1 %v6491_v41 }
 0x791   :  { %5868 = vmatpush3.bf16.msra.mxu1 %v6357_v27 }
 0x792   :  { %5869 = vmatprep.subr.bf16.mxu1 %v6491_v41 }
 0x795   :  { %5870 = vmatpush3.bf16.msra.mxu1 %v6358_v15 }
 0x796   :  { %5871 = vmatprep.subr.bf16.mxu1 %v6491_v41 }
 0x799   :  { %5872 = vmatpush3.bf16.msra.mxu1 %v6359_v49 }
 0x79a   :  { %5873 = vmatprep.subr.bf16.mxu1 %v6491_v41 }
 0x79d   :  { %5874 = vmatpush3.bf16.msra.mxu1 %v6360_v13 }
 0x853   :  { %v5165_v47 = vpop.f32.mrb[140].mxu1 }
 0x854   :  { %v5166_v32 = vadd.f32 %v5675_v58, %v5165_v47  ;;  %v5857_v16 = vpop.f32.mrb[141].mxu1 }
 0x855   :  { %v5168_v43 = vpop.f32.mrb[142].mxu1 }
 0x856   :  { %v5171_v12 = vmax.f32 %v5166_v32, 0.0  ;;  %v5858_v11 = vpop.f32.mrb[143].mxu1 }
 0x858   :  { %v5172_v39 = vpack.c.bf16 %v5171_v12, %v5171_v12 }
 0x85a   :  { %5876 = vmatmul.mubr.bf16.vlgmr.msra.gmra.mrb[144].mxu1 %v5172_v39 }
 0x92d   :  { %v5278_v7 = vpop.f32.mrb[144].mxu1 }
 0x92e   :  { %v5279_v41 = vadd.f32 %v5684_v48, %v5278_v7  ;;  %v5877_v25 = vpop.f32.mrb[145].mxu1 }
 0x92f   :  { %v5281_v53 = vpop.f32.mrb[146].mxu1 }
 0x930   :  { %5284 = vst [vmem:[%s8808_s12] sm:$0xff] %v5279_v41  ;;  %v5878_v3 = vpop.f32.mrb[147].mxu1 }
 0x931   :  { %5289 = vsyncpa [#allocation3], 1 }
 0x932   :  { %5290 = vsyncpa [#allocation5], 1 }
 0x933   :  { %5291 = vsyncpa [#allocation8], 1 }

</bundles_post_ra>
